<compile_context>
chip_gen: v5e
topology: v5e:2x2
jax: 0.10.0
libtpu: 0.0.40
codegen_flags: <defaults>
</compile_context>

<pallas_src>
import functools

import jax
import jax.numpy as jnp
import numpy as np
from jax.experimental import pallas as pl
from jax.experimental.pallas import tpu as pltpu

_DEQUANT_CHUNK = 512  # weight rows dequantized (int8 -> bf16) per inner step (layer 1)


# ------------------------------ Pallas kernels --------------------------------
def _fused_linear_acc_kernel(x_ref, w_ref, s_ref, t_ref, o_ref, acc_ref, *,
                             apply_relu, ck):
    """K-tiled: out = maybe_relu((x @ dequant(w_q)) * scale + shift).

    Grid axis 0: output-feature blocks (parallel / megacore); axis 1: K reduction
    (arbitrary), accumulated in an f32 VMEM scratch.  Weights arrive as int8 and are
    dequantized in `ck`-row chunks on the VPU (idle in this DMA-bound kernel).
    """
    k = pl.program_id(1)

    @pl.when(k == 0)
    def _():
        acc_ref[...] = jnp.zeros_like(acc_ref)

    tk = w_ref.shape[0]
    n_chunks = tk // ck

    def chunk_step(c, acc):
        r = pl.multiple_of(c * ck, ck)
        # int8 -> f32 -> bf16 is exact for |q| <= 127; bf16 x bf16 on the MXU, f32 acc.
        w_c = w_ref[pl.ds(r, ck), :].astype(jnp.float32).astype(jnp.bfloat16)
        x_c = x_ref[:, pl.ds(r, ck)]
        return acc + jnp.dot(x_c, w_c, preferred_element_type=jnp.float32)

    acc_ref[...] += jax.lax.fori_loop(
        0, n_chunks, chunk_step, jnp.zeros(acc_ref.shape, jnp.float32))

    @pl.when(k == pl.num_programs(1) - 1)
    def _():
        y = acc_ref[...] * s_ref[...] + t_ref[...]
        if apply_relu:
            y = jnp.maximum(y, 0.0)
        o_ref[...] = y.astype(o_ref.dtype)


def _fused_linear_single_kernel(x_ref, w_ref, s_ref, t_ref, o_ref, *, apply_relu):
    """Single-K-step specialization (layers 2-5): no scratch accumulator, no init/finalize."""
    w = w_ref[...].astype(jnp.float32).astype(jnp.bfloat16)  # dequant int8 weight tile
    y = jnp.dot(x_ref[...], w, preferred_element_type=jnp.float32)
    y = y * s_ref[...] + t_ref[...]
    if apply_relu:
        y = jnp.maximum(y, 0.0)
    o_ref[...] = y.astype(o_ref.dtype)


def fused_linear(x, w_blocked, scale, shift, *, apply_relu, tk, tn, out_dtype,
                 vmem_limit):
    """x: (B, K) bf16, w_blocked: (nb, K, tn) int8, scale/shift: (1, nb*tn) f32."""
    B, K = x.shape
    nb, Kw, tnw = w_blocked.shape
    assert K == Kw and tnw == tn and K % tk == 0
    N = nb * tn
    k_steps = K // tk

    if k_steps == 1:
        kernel = functools.partial(_fused_linear_single_kernel, apply_relu=apply_relu)
        grid = (nb,)
        in_specs = [
            pl.BlockSpec((B, K), lambda j: (0, 0)),          # full activation row
            pl.BlockSpec((None, K, tn), lambda j: (j, 0, 0)),  # contiguous int8 block
            pl.BlockSpec((1, tn), lambda j: (0, j)),           # folded scale (f32)
            pl.BlockSpec((1, tn), lambda j: (0, j)),           # folded shift (f32)
        ]
        out_specs = pl.BlockSpec((B, tn), lambda j: (0, j))
        scratch_shapes = ()
        dim_sem = ("parallel",)
    else:
        assert tk % _DEQUANT_CHUNK == 0
        kernel = functools.partial(_fused_linear_acc_kernel, apply_relu=apply_relu,
                                   ck=_DEQUANT_CHUNK)
        grid = (nb, k_steps)  # N parallel (megacore), K reduction last / arbitrary
        in_specs = [
            pl.BlockSpec((B, tk), lambda j, k: (0, k)),
            pl.BlockSpec((None, tk, tn), lambda j, k: (j, k, 0)),
            pl.BlockSpec((1, tn), lambda j, k: (0, j)),
            pl.BlockSpec((1, tn), lambda j, k: (0, j)),
        ]
        out_specs = pl.BlockSpec((B, tn), lambda j, k: (0, j))
        scratch_shapes = (pltpu.VMEM((B, tn), jnp.float32),)
        dim_sem = ("parallel", "arbitrary")

    return pl.pallas_call(
        kernel,
        out_shape=jax.ShapeDtypeStruct((B, N), out_dtype),
        grid_spec=pltpu.PrefetchScalarGridSpec(
            num_scalar_prefetch=0,
            grid=grid,
            in_specs=in_specs,
            out_specs=out_specs,
            scratch_shapes=scratch_shapes,
        ),
        compiler_params=pltpu.CompilerParams(
            dimension_semantics=dim_sem,
            vmem_limit_bytes=vmem_limit,
        ),
    )(x, w_blocked, scale, shift)


# ----------------------------- per-chip configuration -------------------------
def _chip_config():
    """Per-generation tile / VMEM sizing (review item).

    v5e/v6e: 128 MiB VMEM, single TensorCore -> full-N layer-1 tile, larger VMEM limit.
    v7x / unknown: conservative 48 MiB limit (v7x has 64 MiB per TC) and two layer-1
    N-blocks so both TensorCores get work via the "parallel" grid axis.
    """
    kind = ""
    try:
        kind = jax.devices()[0].device_kind.lower()
    except Exception:
        pass
    big_vmem_single_tc = any(t in kind for t in ("v5", "v6", "trillium"))
    if big_vmem_single_tc:
        return dict(l1_tk=10752, l1_tn=2048, vmem_limit=80 * 1024 * 1024)
    return dict(l1_tk=10752, l1_tn=1024, vmem_limit=48 * 1024 * 1024)


# --------------------------- parameter construction --------------------------
def make_linear_params(key, fan_in, fan_out):
    """PyTorch-style uniform(-1/sqrt(fan_in), 1/sqrt(fan_in)) init (f32)."""
    kw, kb = jax.random.split(key)
    bound = 1.0 / np.sqrt(fan_in)
    w = jax.random.uniform(kw, (fan_in, fan_out), jnp.float32, -bound, bound)
    b = jax.random.uniform(kb, (fan_out,), jnp.float32, -bound, bound)
    return w, b


def make_bn_params(key, n):
    k1, k2, k3, k4 = jax.random.split(key, 4)
    gamma = jax.random.uniform(k1, (n,), jnp.float32, 0.5, 1.5)
    beta = jax.random.uniform(k2, (n,), jnp.float32, -0.1, 0.1)
    rmean = jax.random.uniform(k3, (n,), jnp.float32, -0.1, 0.1)
    rvar = jax.random.uniform(k4, (n,), jnp.float32, 0.5, 1.5)
    return gamma, beta, rmean, rvar


def quantize_weights_int8(w):
    """Symmetric per-output-channel int8 quantization: w ~= w_q * qs[None, :]."""
    absmax = jnp.max(jnp.abs(w), axis=0)
    qs = jnp.maximum(absmax, 1e-12) / 127.0
    w_q = jnp.clip(jnp.round(w / qs[None, :]), -127.0, 127.0).astype(jnp.int8)
    return w_q, qs


def fold_scales(qs, bias, bn, eps=1e-5):
    """Fold int8 dequant scale + linear bias + eval-mode BN into per-feature scale/shift.

    Kernel computes (x @ w_q) * scale + shift; dequant is per output column, so it
    commutes with the per-N BN affine:  scale = qs * gamma/sqrt(var+eps).
    """
    if bn is None:
        scale = qs
        shift = bias
    else:
        gamma, beta, rmean, rvar = bn
        s_bn = gamma / jnp.sqrt(rvar + eps)
        scale = qs * s_bn
        shift = (bias - rmean) * s_bn + beta
    return (scale.reshape(1, -1).astype(jnp.float32),
            shift.reshape(1, -1).astype(jnp.float32))


def build_params(key, cfg):
    # (fan_in, fan_out, has_bn, has_relu, tk, tn, n_pad) per layer of linear_relu_stack.
    layer_cfg = [
        (224 * 224 * 3, 2048, True, True, cfg["l1_tk"], cfg["l1_tn"], 2048),
        (2048, 2048, True, True, 2048, 1024, 2048),   # (Dropout(0.5) -> identity, eval)
        (2048, 1024, True, True, 2048, 512, 1024),    # (Dropout(0.5) -> identity, eval)
        (1024, 512, True, True, 1024, 256, 512),
        (512, 102, False, False, 512, 128, 128),      # N padded 102 -> 128 (lane-dense)
    ]
    params = []
    for fan_in, fan_out, has_bn, has_relu, tk, tn, n_pad in layer_cfg:
        key, klin, kbn = jax.random.split(key, 3)
        w, b = make_linear_params(klin, fan_in, fan_out)
        w_q, qs = quantize_weights_int8(w)
        bn = make_bn_params(kbn, fan_out) if has_bn else None
        scale, shift = fold_scales(qs, b, bn)
        if n_pad != fan_out:  # zero-pad output features to a lane-dense width
            pad = n_pad - fan_out
            w_q = jnp.pad(w_q, ((0, 0), (0, pad)))
            scale = jnp.pad(scale, ((0, 0), (0, pad)), constant_values=1.0)
            shift = jnp.pad(shift, ((0, 0), (0, pad)))
        # Column-blocked, per-block-contiguous HBM layout: (nb, K, tn) so every (tk, tn)
        # weight DMA is a contiguous slab instead of an N-strided one.
        nb = n_pad // tn
        w_blk = jnp.transpose(w_q.reshape(fan_in, nb, tn), (1, 0, 2))
        params.append(dict(w=w_blk, scale=scale, shift=shift, relu=has_relu,
                           tk=tk, tn=tn, n_valid=fan_out))
    return params
    # TODO(synk): remove the VPU dequant entirely by using the native MXU low-precision
    # paths: int8 x int8 (with dynamically quantized activations) on v5e/v6e, and the
    # bf16 x fp8(e4m3) mixed MXU path on v7x (which has no integer MXU).


# -------------------------------- forward ------------------------------------
def improved_nn_forward(x_nchw, params, vmem_limit):
    B = x_nchw.shape[0]
    x = x_nchw.reshape(B, -1).astype(jnp.bfloat16)  # nn.Flatten (row-major), bf16 stream
    for i, p in enumerate(params):
        last = i == len(params) - 1
        out_dtype = jnp.float32 if last else jnp.bfloat16
        y = fused_linear(x, p["w"], p["scale"], p["shift"],
                         apply_relu=p["relu"], tk=p["tk"], tn=p["tn"],
                         out_dtype=out_dtype, vmem_limit=vmem_limit)
        if y.shape[1] != p["n_valid"]:
            y = y[:, :p["n_valid"]]
        x = y
    return x
    # TODO(synk): shave the per-layer pipeline bubbles by fusing layers 2-5 into one
    # pallas_call (nested emit_pipeline) or prefetching the next layer's first weight
    # tile via a cross-call DMA future (SEMAPHORE/VMEM outputs).
    # TODO(synk): training-mode Dropout(0.5) RNG and BatchNorm batch statistics are not
    # reproduced; this implements the deterministic eval-mode forward pass.


def reference_forward(x_nchw, params):
    """Plain-XLA reference using the same int8-quantized weights / bf16 activations."""
    B = x_nchw.shape[0]
    x = x_nchw.reshape(B, -1).astype(jnp.bfloat16)
    for i, p in enumerate(params):
        last = i == len(params) - 1
        nb, K, tn = p["w"].shape
        w = jnp.transpose(p["w"], (1, 0, 2)).reshape(K, nb * tn).astype(jnp.bfloat16)
        y = jnp.dot(x, w, preferred_element_type=jnp.float32)
        y = y * p["scale"] + p["shift"]
        if p["relu"]:
            y = jnp.maximum(y, 0.0)
        y = y[:, :p["n_valid"]]
        x = y.astype(jnp.float32) if last else y.astype(jnp.bfloat16)
    return x


if __name__ == "__main__":
    key = jax.random.PRNGKey(0)
    key, kx, kp = jax.random.split(key, 3)

    # Input shape is fixed by Linear(224*224*3, 2048); batch kept small (2).
    x = jax.random.normal(kx, (2, 3, 224, 224), jnp.float32)  # NCHW
    cfg = _chip_config()
    params = build_params(kp, cfg)

    logits = improved_nn_forward(x, params, cfg["vmem_limit"])
    logits = jax.block_until_ready(logits)
    assert logits.shape == (2, 102) and logits.dtype == jnp.float32

    ref = jax.block_until_ready(reference_forward(x, params))
    # Kernel and reference use identical int8 weights / bf16 activations; tolerance
    # covers f32 accumulation-order and per-layer bf16 rounding differences.
    np.testing.assert_allclose(np.asarray(logits), np.asarray(ref),
                               rtol=2e-2, atol=2e-2)

    print("KERNEL_OK")
</pallas_src>

<mosaic_0001>
module attributes {stable_mosaic.version = 11 : i64} {
  func.func @_fused_linear_acc_kernel(%arg0: i32, %arg1: i32, %arg2: memref<2x10752xbf16, #tpu.memory_space<vmem>>, %arg3: memref<1x10752x1024xi8, #tpu.memory_space<vmem>>, %arg4: memref<1x1024xf32, #tpu.memory_space<vmem>>, %arg5: memref<1x1024xf32, #tpu.memory_space<vmem>>, %arg6: memref<2x1024xbf16, #tpu.memory_space<vmem>>, %arg7: memref<2x1024xf32, #tpu.memory_space<vmem>>) attributes {dimension_semantics = [#tpu.dimension_semantics<parallel>, #tpu.dimension_semantics<arbitrary>], iteration_bounds = array<i64: 2, 14>, scalar_prefetch = 0 : i64, scratch_operands = 1 : i64, tpu.core_type = #tpu.core_type<tc>, window_params = [{transform_indices = @transform_0, window_bounds = array<i64: 2, 10752>}, {transform_indices = @transform_1, window_bounds = array<i64: 1, 10752, 1024>}, {transform_indices = @transform_2, window_bounds = array<i64: 1, 1024>}, {transform_indices = @transform_3, window_bounds = array<i64: 1, 1024>}, {transform_indices = @transform_4, window_bounds = array<i64: 2, 1024>}]} {
    %c0_i32 = arith.constant 0 : i32
    %0 = arith.cmpi eq, %arg1, %c0_i32 : i32
    %1 = arith.extui %0 : i1 to i32
    %c0_i32_0 = arith.constant 0 : i32
    %2 = arith.cmpi ne, %1, %c0_i32_0 : i32
    scf.if %2 {
      %cst_7 = arith.constant 0.000000e+00 : f32
      %12 = vector.broadcast %cst_7 : f32 to vector<2x1024xf32>
      %c0_8 = arith.constant 0 : index
      %c0_9 = arith.constant 0 : index
      %13 = vector.load %arg7[%c0_8, %c0_9] : memref<2x1024xf32, #tpu.memory_space<vmem>>, vector<2x1024xf32>
      tpu.vector_store %arg7[%c0_8, %c0_9], %12 {strides = array<i32>} : memref<2x1024xf32, #tpu.memory_space<vmem>>, vector<2x1024xf32>,
    } else {
    }
    %c0 = arith.constant 0 : index
    %c0_1 = arith.constant 0 : index
    %3 = vector.load %arg7[%c0, %c0_1] : memref<2x1024xf32, #tpu.memory_space<vmem>>, vector<2x1024xf32>
    %cst = arith.constant 0.000000e+00 : f32
    %4 = vector.broadcast %cst : f32 to vector<2x1024xf32>
    %c0_i32_2 = arith.constant 0 : i32
    %c21_i32 = arith.constant 21 : i32
    %5 = arith.addi %c0_i32_2, %c21_i32 : i32
    %c1_i32 = arith.constant 1 : i32
    %6 = scf.for %arg8 = %c0_i32_2 to %5 step %c1_i32 iter_args(%arg9 = %4) -> (vector<2x1024xf32>)  : i32 {
      %c512_i32 = arith.constant 512 : i32
      %12 = arith.muli %arg8, %c512_i32 : i32
      %13 = tpu.assume_multiple %12, 512 : i32
      %c0_7 = arith.constant 0 : index
      %14 = arith.index_cast %13 : i32 to index
      %c0_8 = arith.constant 0 : index
      %15 = vector.load %arg3[%c0_7, %14, %c0_8] : memref<1x10752x1024xi8, #tpu.memory_space<vmem>>, vector<1x512x1024xi8>
      %16 = vector.shape_cast %15 : vector<1x512x1024xi8> to vector<512x1024xi8>
      %17 = arith.sitofp %16 : vector<512x1024xi8> to vector<512x1024xf32>
      %18 = arith.truncf %17 : vector<512x1024xf32> to vector<512x1024xbf16>
      %c0_9 = arith.constant 0 : index
      %19 = arith.index_cast %13 : i32 to index
      %20 = vector.load %arg2[%c0_9, %19] : memref<2x10752xbf16, #tpu.memory_space<vmem>>, vector<2x512xbf16>
      %cst_10 = arith.constant dense<0.000000e+00> : vector<2x1024xf32>
      %21 = tpu.matmul %20, %18, %cst_10 {dimension_numbers = #tpu.dot_dimension_numbers<[1], [0], [0], [1], [0, 0, 1, 1], [], []>} : vector<2x512xbf16>, vector<512x1024xbf16>, vector<2x1024xf32> -> vector<2x1024xf32>
      %22 = arith.addf %arg9, %21 : vector<2x1024xf32>
      scf.yield %22 : vector<2x1024xf32>
    }
    %c21_i32_3 = arith.constant 21 : i32
    %7 = arith.addf %3, %6 : vector<2x1024xf32>
    %c0_4 = arith.constant 0 : index
    %c0_5 = arith.constant 0 : index
    %8 = vector.load %arg7[%c0_4, %c0_5] : memref<2x1024xf32, #tpu.memory_space<vmem>>, vector<2x1024xf32>
    tpu.vector_store %arg7[%c0_4, %c0_5], %7 {strides = array<i32>} : memref<2x1024xf32, #tpu.memory_space<vmem>>, vector<2x1024xf32>,
    %c13_i32 = arith.constant 13 : i32
    %9 = arith.cmpi eq, %arg1, %c13_i32 : i32
    %10 = arith.extui %9 : i1 to i32
    %c0_i32_6 = arith.constant 0 : i32
    %11 = arith.cmpi ne, %10, %c0_i32_6 : i32
    scf.if %11 {
      %c0_7 = arith.constant 0 : index
      %c0_8 = arith.constant 0 : index
      %12 = vector.load %arg7[%c0_7, %c0_8] : memref<2x1024xf32, #tpu.memory_space<vmem>>, vector<2x1024xf32>
      %c0_9 = arith.constant 0 : index
      %c0_10 = arith.constant 0 : index
      %13 = vector.load %arg4[%c0_9, %c0_10] : memref<1x1024xf32, #tpu.memory_space<vmem>>, vector<1x1024xf32>
      %14 = vector.broadcast %13 : vector<1x1024xf32> to vector<2x1024xf32>
      %15 = arith.mulf %12, %14 : vector<2x1024xf32>
      %c0_11 = arith.constant 0 : index
      %c0_12 = arith.constant 0 : index
      %16 = vector.load %arg5[%c0_11, %c0_12] : memref<1x1024xf32, #tpu.memory_space<vmem>>, vector<1x1024xf32>
      %17 = vector.broadcast %16 : vector<1x1024xf32> to vector<2x1024xf32>
      %18 = arith.addf %15, %17 : vector<2x1024xf32>
      %cst_13 = arith.constant 0.000000e+00 : f32
      %19 = vector.broadcast %cst_13 : f32 to vector<2x1024xf32>
      %20 = arith.maximumf %18, %19 : vector<2x1024xf32>
      %21 = arith.truncf %20 : vector<2x1024xf32> to vector<2x1024xbf16>
      %c0_14 = arith.constant 0 : index
      %c0_15 = arith.constant 0 : index
      %22 = vector.load %arg6[%c0_14, %c0_15] : memref<2x1024xbf16, #tpu.memory_space<vmem>>, vector<2x1024xbf16>
      tpu.vector_store %arg6[%c0_14, %c0_15], %21 {strides = array<i32>} : memref<2x1024xbf16, #tpu.memory_space<vmem>>, vector<2x1024xbf16>,
    } else {
    }
    return
  }
  func.func @transform_0(%arg0: i32, %arg1: i32) -> (i32, i32) {
    %c0_i32 = arith.constant 0 : i32
    %c0_i32_0 = arith.constant 0 : i32
    return %c0_i32, %arg1 : i32, i32
  }
  func.func @transform_1(%arg0: i32, %arg1: i32) -> (i32, i32, i32) {
    %c0_i32 = arith.constant 0 : i32
    %c0_i32_0 = arith.constant 0 : i32
    return %arg0, %arg1, %c0_i32 : i32, i32, i32
  }
  func.func @transform_2(%arg0: i32, %arg1: i32) -> (i32, i32) {
    %c0_i32 = arith.constant 0 : i32
    %c0_i32_0 = arith.constant 0 : i32
    return %c0_i32, %arg0 : i32, i32
  }
  func.func @transform_3(%arg0: i32, %arg1: i32) -> (i32, i32) {
    %c0_i32 = arith.constant 0 : i32
    %c0_i32_0 = arith.constant 0 : i32
    return %c0_i32, %arg0 : i32, i32
  }
  func.func @transform_4(%arg0: i32, %arg1: i32) -> (i32, i32) {
    %c0_i32 = arith.constant 0 : i32
    %c0_i32_0 = arith.constant 0 : i32
    return %c0_i32, %arg0 : i32, i32
  }
}

</mosaic_0001>

<bundles_post_ra>
// kernel: tpu_custom_call.1
= control target key start
LH: loop header
LB: loop body
LE: loop exit
PB: predicated region body
PF: predicated region fallthrough
CT: control target
= control target key end

     0   :  { %s3874_s0 = inlined_call_operand.hbm [shape: bf16[2,150528], index: 0, kind: input, shape index: {}]   ;;  %s3875_s1 = inlined_call_operand.hbm [shape: s8[2,150528,1024], index: 1, kind: input, shape index: {}]   ;;  %s3876_s2 = inlined_call_operand.hbm [shape: f32[1,2048], index: 2, kind: input, shape index: {}]   ;;  %s3877_s3 = inlined_call_operand.hbm [shape: f32[1,2048], index: 3, kind: input, shape index: {}]   ;;  %s3878_s4 = inlined_call_operand.hbm [shape: bf16[2,2048], index: 4, kind: output, shape index: {}]  }
   0x1   :  { %3887 = sst [smem:[#allocation29_spill]] %s3874_s0 }
   0x2   :  { %3888 = sst [smem:[#allocation30_spill]] %s3875_s1 }
   0x3   :  { %3889 = sst [smem:[#allocation31_spill]] %s3876_s2 }
   0x4   :  { %3890 = sst [smem:[#allocation32_spill]] %s3877_s3 }
   0x5   :  { %3891 = sst [smem:[#allocation33_spill]] %s3878_s4 }
   0x6   :  { %9 = vsyncpa [#allocation4], 0 }
   0x7   :  { %11 = vsyncpa [#allocation4 + $0x1], 0 }
   0x8   :  { %12 = vsyncpa [#allocation7], 0 }
   0x9   :  { %14 = vsyncpa [#allocation7 + $0x1], 0 }
   0xa   :  { %15 = vsyncpa [#allocation10], 0 }
   0xb   :  { %17 = vsyncpa [#allocation10 + $0x1], 0 }
   0xc   :  { %18 = vsyncpa [#allocation5], 0 }
   0xd   :  { %20 = vsyncpa [#allocation5 + $0x1], 0  ;;  %s3206_s15 = smov 0   ;;  %s3208_s16 = smov 0  }
   0xe   :  { %s3210_s17 = smov 0   ;;  %s3212_s18 = smov 0  }
   0xf   :  { %s3214_s19 = smov 0   ;;  %s3216_s20 = smov 0  }
  0x10   :  { %s3218_s21 = smov 0   ;;  %s3220_s22 = smov 0  }
  0x11   :  { %s3222_s23 = smov 0   ;;  %s3224_s24 = smov 0  }
  0x12   :  { %s3226_s25 = smov 0   ;;  %s3228_s26 = smov 0  }
  0x13   :  { %s3230_s27 = smov 0   ;;  %s3232_s28 = smov 0  }
  0x14 LB: > { %3892 = sst [smem:[#allocation17_spill]] %s3096_s17  ;;  %s35_s29 = sadd.s32 1, %s3132_s26  ;;  %s3140_s28 = sphi %s3232_s28, %s26_s28   ;;  %s3136_s27 = sphi %s3230_s27, %s3943_s27   ;;  %s3132_s26 = sphi %s3228_s26, %s3942_s26   ;;  %s3128_s25 = sphi %s3226_s25, %s3941_s25   ;;  %s3124_s24 = sphi %s3224_s24, %s3940_s24   ;;  %s3120_s23 = sphi %s3222_s23, %s3939_s23   ;;  %s3116_s22 = sphi %s3220_s22, %s3949_s22   ;;  %s3112_s21 = sphi %s3218_s21, %s3948_s21   ;;  %s3108_s20 = sphi %s3216_s20, %s3937_s20   ;;  %s3104_s19 = sphi %s3214_s19, %s3947_s19   ;;  %s3100_s18 = sphi %s3212_s18, %s3946_s18   ;;  %s3096_s17 = sphi %s3210_s17, %s3935_s17   ;;  %s3092_s16 = sphi %s3208_s16, %s3945_s16   ;;  %s3088_s15 = sphi %s3206_s15, %s3944_s15  }
  0x15   : > { %3893 = sst [smem:[#allocation18_spill]] %s3108_s20  ;;  %s38_s30 = sadd.s32 1, %s3136_s27 }
  0x16   : > { %3894 = sst [smem:[#allocation19_spill]] %s3120_s23  ;;  %p36_p0 = scmp.ge.s32.totalorder %s35_s29, 14 }
  0x17   : > { %3895 = sst [smem:[#allocation20_spill]] %s3124_s24  ;;  %p53_p1 = scmp.eq.s32.totalorder %s3140_s28, 0 }
  0x18   : > { %3896 = sst [smem:[#allocation21_spill]] %s3128_s25  ;;  %s73_s5 = sadd.s32 1, %s3108_s20 }
  0x19   : > { %3897 = sst [smem:[#allocation22_spill]] %s3132_s26  ;;  %p80_p2 = scmp.ne.s32.totalorder %s3108_s20, %s3104_s19 }
  0x1a   : > { %3898 = sst [smem:[#allocation23_spill]] %s3136_s27  ;;  %s3951_s29 = smov (%p36_p0, %s35_s29), 0 }
  0x1b   : > { %3899 = sst [smem:[#allocation24_spill]] %s3951_s29  ;;  %s3953_s30 = smov (!%p36_p0, %s38_s30), %s3136_s27 }
  0x1c   : > { %s3287_s6 = ssub.s32 %s3132_s26, %s3951_s29  ;;  %p3291_p3 = por %p80_p2, %p53_p1 }
  0x1d   : > { %p40_p4 = scmp.ge.s32.totalorder %s3953_s30, 2  ;;  %p86_p5 = scmp.ne.s32.totalorder %s3104_s19, %s3100_s18 }
  0x1e   : > { %p2629_p6 = scmp.lt.s32.totalorder %s3140_s28, 28  ;;  %s207_s8 = sand.u32 1, %s3140_s28  }
  0x1f   : > { %s3955_s30 = smov (%p40_p4, %s3953_s30), 0  ;;  %s209_s9 = sand.u32 1, %s3108_s20  }
  0x20   : > { %3901 = sst [smem:[#allocation25_spill]] %s3955_s30  ;;  %s3304_s10 = ssub.s32 %s3136_s27, %s3955_s30 }
  0x21   : > { %s70_s11 = sor.u32 %s3304_s10, %s3287_s6  ;;  %s2598_s12 = smul.u32 21504, %s209_s9 }
  0x22   : > { %p71_p7 = scmp.eq.s32.totalorder %s70_s11, 0  ;;  %s2595_s13 = smul.u32 2688, %s3132_s26 }
  0x23   : > { %s2599_s14 = smul.u32 37632, %s3136_s27  ;;  %s211_s25 = scalar_lea.vmem [#allocation6], %s2598_s12 }
  0x24   : > { %s3311_s29 = scalar_select %p71_p7, %s3108_s20, %s73_s5  }
  0x25   : > { %s217_s4 = sadd.s32 %s2599_s14, %s2595_s13  ;;  %s222_s24 = sshll.u32 %s211_s25, 4  ;;  %s223_s24 = int_to_ptr.vmem [resolvable:$true] %s222_s24 }
  0x26   : > { %3902 = sst [smem:[#allocation26_spill]] %s3311_s29  ;;  %s2577_s3 = sshll.u32 %s217_s4, 3 }
  0x27   : > { %s3903_s1 = sld [smem:[#allocation30_spill]]  ;;  %p2616_p8 = pnand %p2629_p6, %p3291_p3 }
  0x28   : > { %p2582_p9 = scmp.ge.s32.totalorder %s3140_s28, 1  ;;  %s3321_s25 = scalar_lea.sflag [#allocation7], %s207_s8 }
  0x29   : > { %s3178_s4 = smov 1024   ;;  %s3179_s11 = smov 64  }
  0x2a   : > { %p268_p10 = scmp.lt.s32.totalorder %s3140_s28, 29  ;;  %p43_p12 = scmp.eq.s32.totalorder %s3287_s6, 0 }
  0x2b   : > { %s45_s30 = sadd.s32 1, %s3120_s23  ;;  %p52_p13 = scmp.ne.s32.totalorder %s3120_s23, %s3116_s22 }
  0x2c   : > { %p3325_p11 = pnand %p2582_p9, %p268_p10  ;;  %p58_p2 = scmp.ne.s32.totalorder %s3116_s22, %s3112_s21 }
  0x2d   : > { %s219_s9 = scalar_lea.hbm %s3903_s1, %s2577_s3  ;;  %s3330_s3 = sadd.s32 4294967295, %s3140_s28  }
  0x2e   : > { %s220_s5 = sshll.u32 %s219_s9, 4  ;;  %p54_p0 = por %p53_p1, %p52_p13  ;;  %s221_s5 = int_to_ptr.hbm [resolvable:$true] %s220_s5 }
  0x2f   : > { %2618 = dma.hbm_to_vmem [thread:$0]  (!%p2616_p8), %s221_s5, 344064, %s223_s24, %s3321_s25, %s3178_s4, %s3178_s4, %s3179_s11  }
  0x30   : > { %s3337_s7 = scalar_select %p43_p12, %s3120_s23, %s45_s30  }
  0x31   : > { %p59_p3 = scmp.eq.s32.totalorder %s3330_s3, 0  ;;  %s188_s24 = sand.u32 1, %s3120_s23  }
  0x32   : > { %3905 = sst [smem:[#allocation27_spill]] %s3337_s7  ;;  %s2597_s8 = smul.u32 84, %s188_s24 }
  0x33   : > { %p3347_p4 = por %p59_p3, %p58_p2  ;;  %p3356_p7 = por %p86_p5, %p59_p3 }
  0x34   : > { %s193_s21 = smul.u32 84, %s3132_s26  ;;  %s192_s13 = scalar_lea.vmem [#allocation3], %s2597_s8 }
  0x35   : > { %s200_s14 = sshll.u32 %s192_s13, 4  ;;  %p2613_p8 = pnand %p2629_p6, %p54_p0  ;;  %s201_s14 = int_to_ptr.vmem [resolvable:$true] %s200_s14 }
  0x36   : > { %s3908_s0 = sld [smem:[#allocation29_spill]]  ;;  %s189_s11 = scalar_lea.sflag [#allocation4], %s188_s24 }
  0x37   : > { %s2573_s30 = sadd.s32 4294967294, %s3140_s28   ;;  %p97_p5 = scmp.eq.s32.totalorder %s3304_s10, 0 }
  0x38   : > { %s99_s1 = sadd.s32 1, %s3096_s17  ;;  %p106_p9 = scmp.ne.s32.totalorder %s3096_s17, %s3092_s16 }
  0x39   : > { %p112_p10 = scmp.ne.s32.totalorder %s3092_s16, %s3088_s15  ;;  %p162_p0 = scmp.eq.s32.totalorder %s3330_s3, 27 }
  0x3a   : > { %s3374_s8 = scalar_select %p97_p5, %s3096_s17, %s99_s1  }
  0x3b   : > { %p3378_p12 = por %p106_p9, %p53_p1  ;;  %p3384_p13 = por %p112_p10, %p59_p3 }
  0x3c   : > { %s196_s4 = scalar_lea.hbm %s3908_s0, %s193_s21  ;;  %3909 = sst [smem:[#allocation28_spill]] %s3374_s8 }
  0x3d   : > { %s198_s18 = sshll.u32 %s196_s4, 4  ;;  %p168_p2 = scmp.eq.s32.totalorder %s2573_s30, 27  ;;  %s199_s18 = int_to_ptr.hbm [resolvable:$true] %s198_s18 }
  0x3e   : > { %2615 = dma.hbm_to_vmem [thread:$0]  (!%p2613_p8), %s199_s18, 1344, %s201_s14, %s189_s11  }
  0x3f   : > { %s234_s10 = sand.u32 1, %s3096_s17   ;;  %s2579_s24 = sshll.u32 %s3136_s27, 3 }
  0x40   : > { %p3391_p8 = por %p162_p0, %p106_p9  ;;  %p3395_p5 = por %p168_p2, %p112_p10 }
  0x41   : > { %s2578_s9 = sshll.u32 %s234_s10, 3  ;;  %s3914_s18 = sld [smem:[#allocation31_spill]] }
  0x42   : > { %s236_s26 = scalar_lea.vmem [#allocation8], %s2578_s9  ;;  %p2619_p1 = pnand %p2629_p6, %p3378_p12 }
  0x43   : > { %s244_s7 = sshll.u32 %s236_s26, 4  ;;  %s3915_s23 = sld [smem:[#allocation32_spill]]  ;;  %s245_s7 = int_to_ptr.vmem [resolvable:$true] %s244_s7 }
  0x44   : > { %s255_s8 = scalar_lea.vmem [#allocation9], %s2578_s9  ;;  %s252_s5 = scalar_lea.sflag [#allocation10], %s234_s10 }
  0x45   : > { %s263_s17 = sshll.u32 %s255_s8, 4  ;;  %s274_s26 = sand.u32 (!%p3325_p11), 1, %s3116_s22   ;;  %s264_s17 = int_to_ptr.vmem [resolvable:$true] %s263_s17 }
  0x46   : > { %s3413_s13 = smul.u32 (!%p3325_p11), 84, %s274_s26  ;;  %s275_s4 = scalar_lea.sflag (!%p3325_p11), [#allocation4], %s274_s26 }
  0x47   : > { %s240_s11 = scalar_lea.hbm %s3914_s18, %s2579_s24 }
  0x48   : > { %s242_s0 = sshll.u32 %s240_s11, 4  ;;  %272 = sbr.rel (%p3325_p11) target bundleno = 648 (0x288), region = 36  ;;  %s243_s0 = int_to_ptr.hbm [resolvable:$true] %s242_s0 }
  0x49   : > { %s259_s29 = scalar_lea.hbm %s3915_s23, %s2579_s24  ;;  %s278_s27 = scalar_lea.vmem (!%p3325_p11), [#allocation3], %s3413_s13 }
  0x4a   : > { %2621 = dma.hbm_to_vmem [thread:$0]  (!%p2619_p1), %s243_s0, 128, %s245_s7, %s3321_s25  }
  0x4b   : > { %s261_s20 = sshll.u32 %s259_s29, 4  ;;  %s262_s20 = int_to_ptr.hbm [resolvable:$true] %s261_s20 }
  0x4c   : > { %2624 = dma.hbm_to_vmem [thread:$0]  (!%p2619_p1), %s262_s20, 128, %s264_s17, %s252_s5  }
  0x4d   : > { %3067 = dma.done.wait (%p3347_p4), %s275_s4, 1344  }
  0x4e   : > { %3069 = vsyncadd (%p3347_p4), %s275_s4, 4294965952  ;;  %s284_s0 = sand.u32 1, %s3330_s3   ;;  %s286_s17 = sand.u32 1, %s3104_s19  }
  0x4f   : > { %s3422_s20 = smul.u32 21504, %s286_s17  ;;  %s285_s23 = scalar_lea.sflag [#allocation7], %s284_s0 }
  0x51   : > { %s288_s29 = scalar_lea.vmem [#allocation6], %s3422_s20 }
  0x52   : > { %3071 = dma.done.wait (%p3356_p7), %s285_s23, 344064  }
  0x53   : > { %3073 = vsyncadd (%p3356_p7), %s285_s23, 4294623232  ;;  %s3430_s25 = sand.u32 1, %s3092_s16  }
  0x54   : > { %s3433_s2 = sshll.u32 %s3430_s25, 3 }
  0x55   : > { %s298_s3 = scalar_lea.vmem [#allocation8], %s3433_s2 }
  0x56   : > { %3075 = dma.done.wait (%p3384_p13), %s285_s23, 128  }
  0x57   : > { %3077 = vsyncadd (%p3384_p13), %s285_s23, 4294967168  ;;  %s305_s7 = scalar_lea.sflag [#allocation10], %s3430_s25  ;;  %s308_s12 = scalar_lea.vmem [#allocation9], %s3433_s2 }
  0x58   : > { %3079 = dma.done.wait (%p3384_p13), %s305_s7, 128  }
  0x59   : > { %3081 = vsyncadd (%p3384_p13), %s305_s7, 4294967168  ;;  %s348_s6 = scalar_lea.vmem [#allocation11], %s3433_s2  ;;  %s3916_s8 = sld [smem:[#allocation20_spill]] }
  0x5f   : > { %p2586_p6 = scmp.ne.s32.totalorder %s3916_s8, 0 }
  0x61   : > { %357 = sbr.rel (%p2586_p6) target bundleno = 105 (0x69), region = 56 }
  0x66   : > { %v3180_v0 = vmov 0.0  }
  0x67   : > { %358 = vst [vmem:[#allocation2] sm:$0xff] %v3180_v0 }
  0x68   : > { %359 = vst [vmem:[#allocation2 + $0x8] sm:$0xff] %v3180_v0 }
  0x69 PF: > { %v3452_v3 = vmov 0.0   ;;  %v3454_v4 = vmov 0.0   ;;  %v3456_v5 = vmov 0.0   ;;  %v3458_v6 = vmov 0.0   ;;  %s3468_s21 = smov 0  }
  0x6a   : > { %v3460_v7 = vmov 0.0   ;;  %v3462_v8 = vmov 0.0   ;;  %v3464_v9 = vmov 0.0   ;;  %v3466_v10 = vmov 0.0  }
  0x6e   : > { %v3448_v1 = vld [vmem:[#allocation2] sm:$0xff] }
  0x6f   : > { %v3450_v2 = vld [vmem:[#allocation2 + $0x8] sm:$0xff] }
  0x70 LB: >> { %s2587_s10 = sshll.u32 %s3176_s21, 9  ;;  %s367_s21 = sadd.s32 1, %s3176_s21   ;;  %s3176_s21 = sphi %s3468_s21, %s367_s21   ;;  %v3172_v10 = vphi %v3466_v10, %v3929_v10   ;;  %v3168_v9 = vphi %v3464_v9, %v3928_v9   ;;  %v3164_v8 = vphi %v3462_v8, %v3927_v8   ;;  %v3160_v7 = vphi %v3460_v7, %v3926_v7   ;;  %v3156_v6 = vphi %v3458_v6, %v3925_v6   ;;  %v3152_v5 = vphi %v3456_v5, %v3924_v5   ;;  %v3148_v4 = vphi %v3454_v4, %v3923_v4   ;;  %v3144_v3 = vphi %v3452_v3, %v3922_v3  }
  0x71   : >> { %s377_s24 = sshra.s32 %s2587_s10, 5  ;;  %s1790_s11 = sshra.s32 %s2587_s10, 7 }
  0x72   : >> { %s2596_s9 = sshll.u32 %s377_s24, 6  ;;  %s1792_s30 = scalar_lea.vmem %s278_s27, %s1790_s11 [#allocation3] }
  0x73   : >> { %s3502_s18 = scalar_lea.vmem %s288_s29, %s2596_s9 [#allocation6]  ;;  %p364_p11 = scmp.ge.s32.totalorder %s367_s21, 21  }
  0x74   : >> { %v406_v11 = vld [vmem:[%s3502_s18 + $0xc0] sm:$0xff]  ;;  %vm2242_vm0 = vcmask (%p364_p11), 1041408   ;;  %vm2244_vm1 = vcmask (%p364_p11), 1045508   ;;  %vm2246_vm2 = vcmask (%p364_p11), 1043456   ;;  %s3930_s5 = sld [smem:[#allocation20_spill]] (%p364_p11) }
  0x75   : >> { %v438_v12 = vld [vmem:[%s3502_s18 + $0x1c0] sm:$0xff]  ;;  %v622_v14 = vunpack.c.2.s8 %v406_v11  ;;  %v630_v15 = vunpack.c.3.s8 %v406_v11  ;;  %v606_v33 = vunpack.c.0.s8 %v406_v11  ;;  %v614_v34 = vunpack.c.1.s8 %v406_v11 }
  0x76   : >> { %v470_v13 = vld [vmem:[%s3502_s18 + $0x2c0] sm:$0xff]  ;;  %v750_v16 = vunpack.c.2.s8 %v438_v12  ;;  %v758_v17 = vunpack.c.3.s8 %v438_v12  ;;  %v734_v37 = vunpack.c.0.s8 %v438_v12  ;;  %v742_v38 = vunpack.c.1.s8 %v438_v12 }
  0x77   : >> { %v502_v18 = vld [vmem:[%s3502_s18 + $0x3c0] sm:$0xff]  ;;  %v878_v19 = vunpack.c.2.s8 %v470_v13  ;;  %v886_v20 = vunpack.c.3.s8 %v470_v13  ;;  %v1134_v23 = vcvt.s32.f32 %v622_v14  ;;  %v1142_v24 = vcvt.s32.f32 %v630_v15 }
  0x78   : >> { %v1006_v21 = vunpack.c.2.s8 %v502_v18  ;;  %v1014_v22 = vunpack.c.3.s8 %v502_v18  ;;  %v1262_v25 = vcvt.s32.f32 %v750_v16  ;;  %v1270_v26 = vcvt.s32.f32 %v758_v17  ;;  %v398_v39 = vld [vmem:[%s3502_s18 + $0x80] sm:$0xff] }
  0x79   : >> { %v1390_v27 = vcvt.s32.f32 %v878_v19  ;;  %v1398_v28 = vcvt.s32.f32 %v886_v20  ;;  %v1590_v31 = vpack.c.bf16 %v1142_v24, %v1134_v23  ;;  %v1118_v40 = vcvt.s32.f32 %v606_v33  ;;  %v430_v48 = vld [vmem:[%s3502_s18 + $0x180] sm:$0xff] }
  0x7a   : >> { %v1518_v29 = vcvt.s32.f32 %v1006_v21  ;;  %v1526_v30 = vcvt.s32.f32 %v1014_v22  ;;  %v1654_v32 = vpack.c.bf16 %v1270_v26, %v1262_v25  ;;  %v1126_v41 = vcvt.s32.f32 %v614_v34  ;;  %v462_v53 = vld [vmem:[%s3502_s18 + $0x280] sm:$0xff]  ;;  %p2590_p3 = scmp.ne.s32.totalorder (%p364_p11), %s3930_s5, 13 }
  0x7b   : >> { %v1718_v35 = vpack.c.bf16 %v1398_v28, %v1390_v27  ;;  %1804 = vmatpush.bf16.msra.mxu0 %v1590_v31  ;;  %v862_v42 = vunpack.c.0.s8 %v470_v13  ;;  %v870_v43 = vunpack.c.1.s8 %v470_v13  ;;  %v1246_v44 = vcvt.s32.f32 %v734_v37  ;;  %v494_v58 = vld [vmem:[%s3502_s18 + $0x380] sm:$0xff] }
  0x7c   : >> { %v1782_v36 = vpack.c.bf16 %v1526_v30, %v1518_v29  ;;  %1817 = vmatpush.bf16.msra.mxu1 %v1654_v32  ;;  %v1254_v45 = vcvt.s32.f32 %v742_v38  ;;  %v990_v46 = vunpack.c.0.s8 %v502_v18  ;;  %v998_v47 = vunpack.c.1.s8 %v502_v18  ;;  %v390_v29 = vld [vmem:[%s3502_s18 + $0x40] sm:$0xff] }
  0x7d   : >> { %1830 = vmatpush.bf16.msra.mxu2 %v1718_v35  ;;  %v1582_v49 = vpack.c.bf16 %v1126_v41, %v1118_v40  ;;  %v1374_v50 = vcvt.s32.f32 %v862_v42  ;;  %v1382_v51 = vcvt.s32.f32 %v870_v43  ;;  %v590_v52 = vunpack.c.2.s8 %v398_v39  ;;  %v422_v38 = vld [vmem:[%s3502_s18 + $0x140] sm:$0xff] }
  0x7e   : >> { %1843 = vmatpush.bf16.msra.mxu3 %v1782_v36  ;;  %v1646_v54 = vpack.c.bf16 %v1254_v45, %v1246_v44  ;;  %v1502_v55 = vcvt.s32.f32 %v990_v46  ;;  %v1510_v56 = vcvt.s32.f32 %v998_v47  ;;  %v598_v57 = vunpack.c.3.s8 %v398_v39  ;;  %v454_v43 = vld [vmem:[%s3502_s18 + $0x240] sm:$0xff] }
  0x7f   : >> { %1805 = vmatpush.bf16.msra.mxu0 %v1582_v49  ;;  %v1710_v59 = vpack.c.bf16 %v1382_v51, %v1374_v50  ;;  %v1102_v60 = vcvt.s32.f32 %v590_v52  ;;  %v718_v61 = vunpack.c.2.s8 %v430_v48  ;;  %v726_v62 = vunpack.c.3.s8 %v430_v48 }
  0x80   : >> { %1818 = vmatpush.bf16.msra.mxu1 %v1646_v54  ;;  %v1774_v63 = vpack.c.bf16 %v1510_v56, %v1502_v55  ;;  %v1110_v0 = vcvt.s32.f32 %v598_v57  ;;  %v846_v11 = vunpack.c.2.s8 %v462_v53  ;;  %v854_v12 = vunpack.c.3.s8 %v462_v53 }
  0x81   : >> { %1831 = vmatpush.bf16.msra.mxu2 %v1710_v59  ;;  %v1230_v13 = vcvt.s32.f32 %v718_v61  ;;  %v1238_v14 = vcvt.s32.f32 %v726_v62  ;;  %v974_v15 = vunpack.c.2.s8 %v494_v58  ;;  %v982_v16 = vunpack.c.3.s8 %v494_v58 }
  0x82   : >> { %1844 = vmatpush.bf16.msra.mxu3 %v1774_v63  ;;  %v1574_v17 = vpack.c.bf16 %v1110_v0, %v1102_v60  ;;  %v1358_v18 = vcvt.s32.f32 %v846_v11  ;;  %v1366_v19 = vcvt.s32.f32 %v854_v12  ;;  %v574_v20 = vunpack.c.0.s8 %v398_v39 }
  0x83   : >> { %v1638_v21 = vpack.c.bf16 %v1238_v14, %v1230_v13  ;;  %v1486_v22 = vcvt.s32.f32 %v974_v15  ;;  %v1494_v23 = vcvt.s32.f32 %v982_v16  ;;  %v582_v24 = vunpack.c.1.s8 %v398_v39 }
  0x84   : >> { %1806 = vmatpush.bf16.msra.mxu0 %v1574_v17  ;;  %v1702_v25 = vpack.c.bf16 %v1366_v19, %v1358_v18  ;;  %v1086_v26 = vcvt.s32.f32 %v574_v20  ;;  %v702_v27 = vunpack.c.0.s8 %v430_v48  ;;  %v710_v28 = vunpack.c.1.s8 %v430_v48  ;;  %v486_v48 = vld [vmem:[%s3502_s18 + $0x340] sm:$0xff] }
  0x85   : >> { %1819 = vmatpush.bf16.msra.mxu1 %v1638_v21  ;;  %v1766_v30 = vpack.c.bf16 %v1494_v23, %v1486_v22  ;;  %v1094_v31 = vcvt.s32.f32 %v582_v24  ;;  %v830_v32 = vunpack.c.0.s8 %v462_v53  ;;  %v838_v33 = vunpack.c.1.s8 %v462_v53  ;;  %v382_v19 = vld [vmem:[%s3502_s18] sm:$0xff] }
  0x86   : >> { %1832 = vmatpush.bf16.msra.mxu2 %v1702_v25  ;;  %v1214_v34 = vcvt.s32.f32 %v702_v27  ;;  %v1222_v35 = vcvt.s32.f32 %v710_v28  ;;  %v958_v36 = vunpack.c.0.s8 %v494_v58  ;;  %v966_v37 = vunpack.c.1.s8 %v494_v58  ;;  %v414_v28 = vld [vmem:[%s3502_s18 + $0x100] sm:$0xff] }
  0x87   : >> { %1845 = vmatpush.bf16.msra.mxu3 %v1766_v30  ;;  %v1566_v39 = vpack.c.bf16 %v1094_v31, %v1086_v26  ;;  %v1342_v40 = vcvt.s32.f32 %v830_v32  ;;  %v1350_v41 = vcvt.s32.f32 %v838_v33  ;;  %v558_v42 = vunpack.c.2.s8 %v390_v29  ;;  %v446_v33 = vld [vmem:[%s3502_s18 + $0x200] sm:$0xff] }
  0x88   : >> { %v1630_v44 = vpack.c.bf16 %v1222_v35, %v1214_v34  ;;  %v1470_v45 = vcvt.s32.f32 %v958_v36  ;;  %v1478_v46 = vcvt.s32.f32 %v966_v37  ;;  %v566_v47 = vunpack.c.3.s8 %v390_v29 }
  0x89   : >> { %1807 = vmatpush.bf16.msra.mxu0 %v1566_v39  ;;  %v1694_v49 = vpack.c.bf16 %v1350_v41, %v1342_v40  ;;  %v1070_v50 = vcvt.s32.f32 %v558_v42  ;;  %v686_v51 = vunpack.c.2.s8 %v422_v38  ;;  %v694_v52 = vunpack.c.3.s8 %v422_v38 }
  0x8a   : >> { %1820 = vmatpush.bf16.msra.mxu1 %v1630_v44  ;;  %v1758_v53 = vpack.c.bf16 %v1478_v46, %v1470_v45  ;;  %v1078_v54 = vcvt.s32.f32 %v566_v47  ;;  %v814_v55 = vunpack.c.2.s8 %v454_v43  ;;  %v822_v56 = vunpack.c.3.s8 %v454_v43 }
  0x8b   : >> { %1833 = vmatpush.bf16.msra.mxu2 %v1694_v49  ;;  %v1198_v57 = vcvt.s32.f32 %v686_v51  ;;  %v1206_v58 = vcvt.s32.f32 %v694_v52  ;;  %v942_v59 = vunpack.c.2.s8 %v486_v48  ;;  %v950_v60 = vunpack.c.3.s8 %v486_v48 }
  0x8c   : >> { %1846 = vmatpush.bf16.msra.mxu3 %v1758_v53  ;;  %v1558_v61 = vpack.c.bf16 %v1078_v54, %v1070_v50  ;;  %v1326_v62 = vcvt.s32.f32 %v814_v55  ;;  %v1334_v63 = vcvt.s32.f32 %v822_v56  ;;  %v542_v0 = vunpack.c.0.s8 %v390_v29  ;;  %v1793_v55 = vld [vmem:[%s1792_s30] sm:$0xf] }
  0x8d   : >> { %v1622_v11 = vpack.c.bf16 %v1206_v58, %v1198_v57  ;;  %v1454_v12 = vcvt.s32.f32 %v942_v59  ;;  %v1462_v13 = vcvt.s32.f32 %v950_v60  ;;  %v550_v14 = vunpack.c.1.s8 %v390_v29  ;;  %1795 = vst [vmem:[#allocation1] ss:$9 sm:$0xff] %v1793_v55 }
  0x8e   : >> { %1808 = vmatpush.bf16.msra.mxu0 %v1558_v61  ;;  %v1686_v15 = vpack.c.bf16 %v1334_v63, %v1326_v62  ;;  %v1054_v16 = vcvt.s32.f32 %v542_v0  ;;  %v670_v17 = vunpack.c.0.s8 %v422_v38  ;;  %v678_v18 = vunpack.c.1.s8 %v422_v38  ;;  %v478_v38 = vld [vmem:[%s3502_s18 + $0x300] sm:$0xff]  ;;  %v407_v0 = vld [vmem:[%s3502_s18 + $0xc8] sm:$0xff] }
  0x8f   : >> { %1821 = vmatpush.bf16.msra.mxu1 %v1622_v11  ;;  %v1750_v20 = vpack.c.bf16 %v1462_v13, %v1454_v12  ;;  %v1062_v21 = vcvt.s32.f32 %v550_v14  ;;  %v798_v22 = vunpack.c.0.s8 %v454_v43  ;;  %v806_v23 = vunpack.c.1.s8 %v454_v43 }
  0x90   : >> { %1834 = vmatpush.bf16.msra.mxu2 %v1686_v15  ;;  %v1182_v24 = vcvt.s32.f32 %v670_v17  ;;  %v1190_v25 = vcvt.s32.f32 %v678_v18  ;;  %v926_v26 = vunpack.c.0.s8 %v486_v48  ;;  %v934_v27 = vunpack.c.1.s8 %v486_v48 }
  0x91   : >> { %1847 = vmatpush.bf16.msra.mxu3 %v1750_v20  ;;  %v1550_v29 = vpack.c.bf16 %v1062_v21, %v1054_v16  ;;  %v1310_v30 = vcvt.s32.f32 %v798_v22  ;;  %v1318_v31 = vcvt.s32.f32 %v806_v23  ;;  %v526_v32 = vunpack.c.2.s8 %v382_v19 }
  0x92   : >> { %v1614_v34 = vpack.c.bf16 %v1190_v25, %v1182_v24  ;;  %v1438_v35 = vcvt.s32.f32 %v926_v26  ;;  %v1446_v36 = vcvt.s32.f32 %v934_v27  ;;  %v534_v37 = vunpack.c.3.s8 %v382_v19  ;;  %v471_v24 = vld [vmem:[%s3502_s18 + $0x2c8] sm:$0xff] }
  0x93   : >> { %1809 = vmatpush.bf16.msra.mxu0 %v1550_v29  ;;  %v1678_v39 = vpack.c.bf16 %v1318_v31, %v1310_v30  ;;  %v1038_v40 = vcvt.s32.f32 %v526_v32  ;;  %v654_v41 = vunpack.c.2.s8 %v414_v28  ;;  %v662_v42 = vunpack.c.3.s8 %v414_v28  ;;  %v503_v29 = vld [vmem:[%s3502_s18 + $0x3c8] sm:$0xff] }
  0x94   : >> { %1822 = vmatpush.bf16.msra.mxu1 %v1614_v34  ;;  %v1742_v43 = vpack.c.bf16 %v1446_v36, %v1438_v35  ;;  %v1046_v44 = vcvt.s32.f32 %v534_v37  ;;  %v782_v45 = vunpack.c.2.s8 %v446_v33  ;;  %v790_v46 = vunpack.c.3.s8 %v446_v33 }
  0x95   : >> { %1835 = vmatpush.bf16.msra.mxu2 %v1678_v39  ;;  %v1166_v47 = vcvt.s32.f32 %v654_v41  ;;  %v1174_v48 = vcvt.s32.f32 %v662_v42  ;;  %v910_v49 = vunpack.c.2.s8 %v478_v38  ;;  %v918_v50 = vunpack.c.3.s8 %v478_v38  ;;  %v3528_v42 = vld [vmem:[#allocation1 + $0x12] sm:$0xff] }
  0x96   : >> { %1848 = vmatpush.bf16.msra.mxu3 %v1742_v43  ;;  %v1542_v51 = vpack.c.bf16 %v1046_v44, %v1038_v40  ;;  %v1294_v52 = vcvt.s32.f32 %v782_v45  ;;  %v1302_v53 = vcvt.s32.f32 %v790_v46  ;;  %v510_v54 = vunpack.c.0.s8 %v382_v19 }
  0x97   : >> { %v1606_v56 = vpack.c.bf16 %v1174_v48, %v1166_v47  ;;  %v1422_v57 = vcvt.s32.f32 %v910_v49  ;;  %v1430_v58 = vcvt.s32.f32 %v918_v50  ;;  %v518_v59 = vunpack.c.1.s8 %v382_v19  ;;  %v439_v19 = vld [vmem:[%s3502_s18 + $0x1c8] sm:$0xff]  ;;  %v3530_v47 = vld [vmem:[#allocation1 + $0x1b] sm:$0xff] }
  0x98   : >> { %1810 = vmatpush.bf16.msra.mxu0 %v1542_v51  ;;  %v1670_v60 = vpack.c.bf16 %v1302_v53, %v1294_v52  ;;  %v1022_v61 = vcvt.s32.f32 %v510_v54  ;;  %v638_v62 = vunpack.c.0.s8 %v414_v28  ;;  %v646_v63 = vunpack.c.1.s8 %v414_v28 }
  0x99   : >> { %1823 = vmatpush.bf16.msra.mxu1 %v1606_v56  ;;  %v1734_v11 = vpack.c.bf16 %v1430_v58, %v1422_v57  ;;  %v1030_v12 = vcvt.s32.f32 %v518_v59  ;;  %v766_v13 = vunpack.c.0.s8 %v446_v33  ;;  %v774_v14 = vunpack.c.1.s8 %v446_v33  ;;  %v399_v56 = vld [vmem:[%s3502_s18 + $0x88] sm:$0xff] }
  0x9a   : >> { %1836 = vmatpush.bf16.msra.mxu2 %v1670_v60  ;;  %v1150_v15 = vcvt.s32.f32 %v638_v62  ;;  %v1158_v16 = vcvt.s32.f32 %v646_v63  ;;  %v894_v17 = vunpack.c.0.s8 %v478_v38  ;;  %v902_v18 = vunpack.c.1.s8 %v478_v38  ;;  %v3537_v62 = vld [vmem:[#allocation1 + $0x9] sm:$0xff] }
  0x9b   : >> { %1849 = vmatpush.bf16.msra.mxu3 %v1734_v11  ;;  %v1534_v20 = vpack.c.bf16 %v1030_v12, %v1022_v61  ;;  %v1278_v21 = vcvt.s32.f32 %v766_v13  ;;  %v1286_v22 = vcvt.s32.f32 %v774_v14  ;;  %v623_v23 = vunpack.c.2.s8 %v407_v0  ;;  %v3535_v61 = vld [vmem:[#allocation1] sm:$0xff]  ;;  %v431_v13 = vld [vmem:[%s3502_s18 + $0x188] sm:$0xff] }
  0x9c   : >> { %v1598_v25 = vpack.c.bf16 %v1158_v16, %v1150_v15  ;;  %v1406_v26 = vcvt.s32.f32 %v894_v17  ;;  %v1414_v27 = vcvt.s32.f32 %v902_v18  ;;  %v631_v28 = vunpack.c.3.s8 %v407_v0  ;;  %v463_v18 = vld [vmem:[%s3502_s18 + $0x288] sm:$0xff] }
  0x9d   : >> { %1811 = vmatpush.bf16.msra.mxu0 %v1534_v20  ;;  %v1662_v30 = vpack.c.bf16 %v1286_v22, %v1278_v21  ;;  %v1135_v31 = vcvt.s32.f32 %v623_v23  ;;  %v751_v32 = vunpack.c.2.s8 %v439_v19  ;;  %v759_v33 = vunpack.c.3.s8 %v439_v19  ;;  %v495_v23 = vld [vmem:[%s3502_s18 + $0x388] sm:$0xff] }
  0x9e   : >> { %1824 = vmatpush.bf16.msra.mxu1 %v1598_v25  ;;  %v1726_v34 = vpack.c.bf16 %v1414_v27, %v1406_v26  ;;  %v1143_v35 = vcvt.s32.f32 %v631_v28  ;;  %v879_v36 = vunpack.c.2.s8 %v471_v24  ;;  %v887_v37 = vunpack.c.3.s8 %v471_v24 }
  0x9f   : >> { %1837 = vmatpush.bf16.msra.mxu2 %v1662_v30  ;;  %v1263_v38 = vcvt.s32.f32 %v751_v32  ;;  %v1271_v39 = vcvt.s32.f32 %v759_v33  ;;  %v1007_v40 = vunpack.c.2.s8 %v503_v29  ;;  %v1015_v41 = vunpack.c.3.s8 %v503_v29 }
  0xa0   : >> { %1850 = vmatpush.bf16.msra.mxu3 %v1726_v34  ;;  %v1591_v43 = vpack.c.bf16 %v1143_v35, %v1135_v31  ;;  %v1391_v44 = vcvt.s32.f32 %v879_v36  ;;  %v1399_v45 = vcvt.s32.f32 %v887_v37  ;;  %v607_v46 = vunpack.c.0.s8 %v407_v0  ;;  %1812 = vmatmul.bf16.vlgmr.msra.gmra.mxu0 %v3535_v61 }
  0xa1   : >> { %v1655_v48 = vpack.c.bf16 %v1271_v39, %v1263_v38  ;;  %v1519_v49 = vcvt.s32.f32 %v1007_v40  ;;  %v1527_v50 = vcvt.s32.f32 %v1015_v41  ;;  %v615_v51 = vunpack.c.1.s8 %v407_v0  ;;  %1825 = vmatmul.bf16.vlgmr.msra.gmra.mxu1 %v3537_v62 }
  0xa2   : >> { %1856 = vmatpush.bf16.msrb.mxu0 %v1591_v43  ;;  %v1719_v52 = vpack.c.bf16 %v1399_v45, %v1391_v44  ;;  %v1119_v53 = vcvt.s32.f32 %v607_v46  ;;  %v735_v54 = vunpack.c.0.s8 %v439_v19  ;;  %v743_v55 = vunpack.c.1.s8 %v439_v19  ;;  %1838 = vmatmul.bf16.vlgmr.msra.gmra.mxu2 %v3528_v42 }
  0xa3   : >> { %1869 = vmatpush.bf16.msrb.mxu1 %v1655_v48  ;;  %v1783_v57 = vpack.c.bf16 %v1527_v50, %v1519_v49  ;;  %v1127_v58 = vcvt.s32.f32 %v615_v51  ;;  %v863_v59 = vunpack.c.0.s8 %v471_v24  ;;  %v871_v60 = vunpack.c.1.s8 %v471_v24  ;;  %1851 = vmatmul.bf16.vlgmr.msra.gmra.mxu3 %v3530_v47  ;;  %v391_v50 = vld [vmem:[%s3502_s18 + $0x48] sm:$0xff] }
  0xa4   : >> { %1882 = vmatpush.bf16.msrb.mxu2 %v1719_v52  ;;  %v1247_v63 = vcvt.s32.f32 %v735_v54  ;;  %v1255_v0 = vcvt.s32.f32 %v743_v55  ;;  %v991_v11 = vunpack.c.0.s8 %v503_v29  ;;  %v999_v12 = vunpack.c.1.s8 %v503_v29 }
  0xa5   : >> { %1895 = vmatpush.bf16.msrb.mxu3 %v1783_v57  ;;  %v1583_v14 = vpack.c.bf16 %v1127_v58, %v1119_v53  ;;  %v1375_v15 = vcvt.s32.f32 %v863_v59  ;;  %v1383_v16 = vcvt.s32.f32 %v871_v60  ;;  %v591_v17 = vunpack.c.2.s8 %v399_v56 }
  0xa6   : >> { %v1647_v19 = vpack.c.bf16 %v1255_v0, %v1247_v63  ;;  %v1503_v20 = vcvt.s32.f32 %v991_v11  ;;  %v1511_v21 = vcvt.s32.f32 %v999_v12  ;;  %v599_v22 = vunpack.c.3.s8 %v399_v56  ;;  %v455_v12 = vld [vmem:[%s3502_s18 + $0x248] sm:$0xff] }
  0xa7   : >> { %1857 = vmatpush.bf16.msrb.mxu0 %v1583_v14  ;;  %v1711_v24 = vpack.c.bf16 %v1383_v16, %v1375_v15  ;;  %v1103_v25 = vcvt.s32.f32 %v591_v17  ;;  %v719_v26 = vunpack.c.2.s8 %v431_v13  ;;  %v727_v27 = vunpack.c.3.s8 %v431_v13  ;;  %v487_v17 = vld [vmem:[%s3502_s18 + $0x348] sm:$0xff] }
  0xa8   : >> { %1870 = vmatpush.bf16.msrb.mxu1 %v1647_v19  ;;  %v1775_v28 = vpack.c.bf16 %v1511_v21, %v1503_v20  ;;  %v1111_v29 = vcvt.s32.f32 %v599_v22  ;;  %v847_v30 = vunpack.c.2.s8 %v463_v18  ;;  %v855_v31 = vunpack.c.3.s8 %v463_v18 }
  0xa9   : >> { %1883 = vmatpush.bf16.msrb.mxu2 %v1711_v24  ;;  %v1231_v32 = vcvt.s32.f32 %v719_v26  ;;  %v1239_v33 = vcvt.s32.f32 %v727_v27  ;;  %v975_v34 = vunpack.c.2.s8 %v495_v23  ;;  %v983_v35 = vunpack.c.3.s8 %v495_v23 }
  0xaa   : >> { %1896 = vmatpush.bf16.msrb.mxu3 %v1775_v28  ;;  %v1575_v36 = vpack.c.bf16 %v1111_v29, %v1103_v25  ;;  %v1359_v37 = vcvt.s32.f32 %v847_v30  ;;  %v1367_v38 = vcvt.s32.f32 %v855_v31  ;;  %v575_v39 = vunpack.c.0.s8 %v399_v56 }
  0xab   : >> { %v1639_v40 = vpack.c.bf16 %v1239_v33, %v1231_v32  ;;  %v1487_v41 = vcvt.s32.f32 %v975_v34  ;;  %v1495_v43 = vcvt.s32.f32 %v983_v35  ;;  %v583_v44 = vunpack.c.1.s8 %v399_v56  ;;  %v423_v56 = vld [vmem:[%s3502_s18 + $0x148] sm:$0xff] }
  0xac   : >> { %1858 = vmatpush.bf16.msrb.mxu0 %v1575_v36  ;;  %v1703_v45 = vpack.c.bf16 %v1367_v38, %v1359_v37  ;;  %v1087_v46 = vcvt.s32.f32 %v575_v39  ;;  %v703_v48 = vunpack.c.0.s8 %v431_v13  ;;  %v711_v49 = vunpack.c.1.s8 %v431_v13 }
  0xad   : >> { %1871 = vmatpush.bf16.msrb.mxu1 %v1639_v40  ;;  %v1767_v51 = vpack.c.bf16 %v1495_v43, %v1487_v41  ;;  %v1095_v52 = vcvt.s32.f32 %v583_v44  ;;  %v831_v53 = vunpack.c.0.s8 %v463_v18  ;;  %v839_v54 = vunpack.c.1.s8 %v463_v18  ;;  %v383_v43 = vld [vmem:[%s3502_s18 + $0x8] sm:$0xff] }
  0xae   : >> { %1884 = vmatpush.bf16.msrb.mxu2 %v1703_v45  ;;  %v1215_v55 = vcvt.s32.f32 %v703_v48  ;;  %v1223_v57 = vcvt.s32.f32 %v711_v49  ;;  %v959_v58 = vunpack.c.0.s8 %v495_v23  ;;  %v967_v59 = vunpack.c.1.s8 %v495_v23 }
  0xaf   : >> { %1897 = vmatpush.bf16.msrb.mxu3 %v1767_v51  ;;  %v1567_v60 = vpack.c.bf16 %v1095_v52, %v1087_v46  ;;  %v1343_v63 = vcvt.s32.f32 %v831_v53  ;;  %v1351_v0 = vcvt.s32.f32 %v839_v54  ;;  %v559_v11 = vunpack.c.2.s8 %v391_v50 }
  0xb0   : >> { %v1631_v13 = vpack.c.bf16 %v1223_v57, %v1215_v55  ;;  %v1471_v14 = vcvt.s32.f32 %v959_v58  ;;  %v1479_v15 = vcvt.s32.f32 %v967_v59  ;;  %v567_v16 = vunpack.c.3.s8 %v391_v50  ;;  %v447_v59 = vld [vmem:[%s3502_s18 + $0x208] sm:$0xff] }
  0xb1   : >> { %1859 = vmatpush.bf16.msrb.mxu0 %v1567_v60  ;;  %v1695_v18 = vpack.c.bf16 %v1351_v0, %v1343_v63  ;;  %v1071_v19 = vcvt.s32.f32 %v559_v11  ;;  %v687_v20 = vunpack.c.2.s8 %v423_v56  ;;  %v695_v21 = vunpack.c.3.s8 %v423_v56  ;;  %v479_v11 = vld [vmem:[%s3502_s18 + $0x308] sm:$0xff] }
  0xb2   : >> { %1872 = vmatpush.bf16.msrb.mxu1 %v1631_v13  ;;  %v1759_v22 = vpack.c.bf16 %v1479_v15, %v1471_v14  ;;  %v1079_v23 = vcvt.s32.f32 %v567_v16  ;;  %v815_v24 = vunpack.c.2.s8 %v455_v12  ;;  %v823_v25 = vunpack.c.3.s8 %v455_v12 }
  0xb3   : >> { %1885 = vmatpush.bf16.msrb.mxu2 %v1695_v18  ;;  %v1199_v26 = vcvt.s32.f32 %v687_v20  ;;  %v1207_v27 = vcvt.s32.f32 %v695_v21  ;;  %v943_v28 = vunpack.c.2.s8 %v487_v17  ;;  %v951_v29 = vunpack.c.3.s8 %v487_v17 }
  0xb4   : >> { %1898 = vmatpush.bf16.msrb.mxu3 %v1759_v22  ;;  %v1559_v30 = vpack.c.bf16 %v1079_v23, %v1071_v19  ;;  %v1327_v31 = vcvt.s32.f32 %v815_v24  ;;  %v1335_v32 = vcvt.s32.f32 %v823_v25  ;;  %v543_v33 = vunpack.c.0.s8 %v391_v50 }
  0xb5   : >> { %v1623_v34 = vpack.c.bf16 %v1207_v27, %v1199_v26  ;;  %v1455_v35 = vcvt.s32.f32 %v943_v28  ;;  %v1463_v36 = vcvt.s32.f32 %v951_v29  ;;  %v551_v37 = vunpack.c.1.s8 %v391_v50  ;;  %v415_v50 = vld [vmem:[%s3502_s18 + $0x108] sm:$0xff] }
  0xb6   : >> { %1860 = vmatpush.bf16.msrb.mxu0 %v1559_v30  ;;  %v1687_v38 = vpack.c.bf16 %v1335_v32, %v1327_v31  ;;  %v1055_v39 = vcvt.s32.f32 %v543_v33  ;;  %v671_v40 = vunpack.c.0.s8 %v423_v56  ;;  %v679_v41 = vunpack.c.1.s8 %v423_v56 }
  0xb7   : >> { %1873 = vmatpush.bf16.msrb.mxu1 %v1623_v34  ;;  %v1751_v44 = vpack.c.bf16 %v1463_v36, %v1455_v35  ;;  %v1063_v45 = vcvt.s32.f32 %v551_v37  ;;  %v799_v46 = vunpack.c.0.s8 %v455_v12  ;;  %v807_v48 = vunpack.c.1.s8 %v455_v12  ;;  %v408_v36 = vld [vmem:[%s3502_s18 + $0xd0] sm:$0xff] }
  0xb8   : >> { %1886 = vmatpush.bf16.msrb.mxu2 %v1687_v38  ;;  %v1183_v49 = vcvt.s32.f32 %v671_v40  ;;  %v1191_v51 = vcvt.s32.f32 %v679_v41  ;;  %v927_v52 = vunpack.c.0.s8 %v487_v17  ;;  %v935_v53 = vunpack.c.1.s8 %v487_v17 }
  0xb9   : >> { %1899 = vmatpush.bf16.msrb.mxu3 %v1751_v44  ;;  %v1551_v54 = vpack.c.bf16 %v1063_v45, %v1055_v39  ;;  %v1311_v55 = vcvt.s32.f32 %v799_v46  ;;  %v1319_v57 = vcvt.s32.f32 %v807_v48  ;;  %v527_v58 = vunpack.c.2.s8 %v383_v43 }
  0xba   : >> { %v1615_v56 = vpack.c.bf16 %v1191_v51, %v1183_v49  ;;  %v1439_v60 = vcvt.s32.f32 %v927_v52  ;;  %v1447_v63 = vcvt.s32.f32 %v935_v53  ;;  %v535_v0 = vunpack.c.3.s8 %v383_v43  ;;  %v472_v53 = vld [vmem:[%s3502_s18 + $0x2d0] sm:$0xff] }
  0xbb   : >> { %1861 = vmatpush.bf16.msrb.mxu0 %v1551_v54  ;;  %v1679_v12 = vpack.c.bf16 %v1319_v57, %v1311_v55  ;;  %v1039_v13 = vcvt.s32.f32 %v527_v58  ;;  %v655_v14 = vunpack.c.2.s8 %v415_v50  ;;  %v663_v15 = vunpack.c.3.s8 %v415_v50  ;;  %v504_v58 = vld [vmem:[%s3502_s18 + $0x3d0] sm:$0xff] }
  0xbc   : >> { %1874 = vmatpush.bf16.msrb.mxu1 %v1615_v56  ;;  %v1743_v16 = vpack.c.bf16 %v1447_v63, %v1439_v60  ;;  %v1047_v17 = vcvt.s32.f32 %v535_v0  ;;  %v783_v18 = vunpack.c.2.s8 %v447_v59  ;;  %v791_v19 = vunpack.c.3.s8 %v447_v59 }
  0xbd   : >> { %1887 = vmatpush.bf16.msrb.mxu2 %v1679_v12  ;;  %v1167_v20 = vcvt.s32.f32 %v655_v14  ;;  %v1175_v21 = vcvt.s32.f32 %v663_v15  ;;  %v911_v22 = vunpack.c.2.s8 %v479_v11  ;;  %v919_v23 = vunpack.c.3.s8 %v479_v11 }
  0xbe   : >> { %1900 = vmatpush.bf16.msrb.mxu3 %v1743_v16  ;;  %v1543_v24 = vpack.c.bf16 %v1047_v17, %v1039_v13  ;;  %v1295_v25 = vcvt.s32.f32 %v783_v18  ;;  %v1303_v26 = vcvt.s32.f32 %v791_v19  ;;  %v511_v27 = vunpack.c.0.s8 %v383_v43 }
  0xbf   : >> { %v1607_v28 = vpack.c.bf16 %v1175_v21, %v1167_v20  ;;  %v1423_v29 = vcvt.s32.f32 %v911_v22  ;;  %v1431_v30 = vcvt.s32.f32 %v919_v23  ;;  %v519_v31 = vunpack.c.1.s8 %v383_v43  ;;  %v440_v43 = vld [vmem:[%s3502_s18 + $0x1d0] sm:$0xff] }
  0xc0   : >> { %1862 = vmatpush.bf16.msrb.mxu0 %v1543_v24  ;;  %v1671_v32 = vpack.c.bf16 %v1303_v26, %v1295_v25  ;;  %v1023_v33 = vcvt.s32.f32 %v511_v27  ;;  %v639_v34 = vunpack.c.0.s8 %v415_v50  ;;  %v647_v35 = vunpack.c.1.s8 %v415_v50 }
  0xc1   : >> { %1875 = vmatpush.bf16.msrb.mxu1 %v1607_v28  ;;  %v1735_v37 = vpack.c.bf16 %v1431_v30, %v1423_v29  ;;  %v1031_v38 = vcvt.s32.f32 %v519_v31  ;;  %v767_v39 = vunpack.c.0.s8 %v447_v59  ;;  %v775_v40 = vunpack.c.1.s8 %v447_v59  ;;  %v400_v30 = vld [vmem:[%s3502_s18 + $0x90] sm:$0xff] }
  0xc2   : >> { %1888 = vmatpush.bf16.msrb.mxu2 %v1671_v32  ;;  %v1151_v41 = vcvt.s32.f32 %v639_v34  ;;  %v1159_v44 = vcvt.s32.f32 %v647_v35  ;;  %v895_v45 = vunpack.c.0.s8 %v479_v11  ;;  %v903_v46 = vunpack.c.1.s8 %v479_v11 }
  0xc3   : >> { %1901 = vmatpush.bf16.msrb.mxu3 %v1735_v37  ;;  %v1535_v48 = vpack.c.bf16 %v1031_v38, %v1023_v33  ;;  %v1279_v49 = vcvt.s32.f32 %v767_v39  ;;  %v1287_v51 = vcvt.s32.f32 %v775_v40  ;;  %v624_v52 = vunpack.c.2.s8 %v408_v36  ;;  %v432_v39 = vld [vmem:[%s3502_s18 + $0x190] sm:$0xff] }
  0xc4   : >> { %v1599_v50 = vpack.c.bf16 %v1159_v44, %v1151_v41  ;;  %v1407_v54 = vcvt.s32.f32 %v895_v45  ;;  %v1415_v55 = vcvt.s32.f32 %v903_v46  ;;  %v632_v57 = vunpack.c.3.s8 %v408_v36  ;;  %v464_v46 = vld [vmem:[%s3502_s18 + $0x290] sm:$0xff] }
  0xc5   : >> { %1863 = vmatpush.bf16.msrb.mxu0 %v1535_v48  ;;  %v1663_v59 = vpack.c.bf16 %v1287_v51, %v1279_v49  ;;  %v1136_v56 = vcvt.s32.f32 %v624_v52  ;;  %v752_v60 = vunpack.c.2.s8 %v440_v43  ;;  %v760_v63 = vunpack.c.3.s8 %v440_v43  ;;  %v496_v52 = vld [vmem:[%s3502_s18 + $0x390] sm:$0xff] }
  0xc6   : >> { %1876 = vmatpush.bf16.msrb.mxu1 %v1599_v50  ;;  %v1727_v0 = vpack.c.bf16 %v1415_v55, %v1407_v54  ;;  %v1144_v11 = vcvt.s32.f32 %v632_v57  ;;  %v880_v12 = vunpack.c.2.s8 %v472_v53  ;;  %v888_v13 = vunpack.c.3.s8 %v472_v53 }
  0xc7   : >> { %1889 = vmatpush.bf16.msrb.mxu2 %v1663_v59  ;;  %v1264_v14 = vcvt.s32.f32 %v752_v60  ;;  %v1272_v15 = vcvt.s32.f32 %v760_v63  ;;  %v1008_v16 = vunpack.c.2.s8 %v504_v58  ;;  %v1016_v17 = vunpack.c.3.s8 %v504_v58 }
  0xc8   : >> { %1902 = vmatpush.bf16.msrb.mxu3 %v1727_v0  ;;  %v1592_v18 = vpack.c.bf16 %v1144_v11, %v1136_v56  ;;  %v1392_v19 = vcvt.s32.f32 %v880_v12  ;;  %v1400_v20 = vcvt.s32.f32 %v888_v13  ;;  %v608_v21 = vunpack.c.0.s8 %v408_v36  ;;  %1864 = vmatmul.bf16.vlgmr.msrb.gmra.mxu0 %v3535_v61 }
  0xc9   : >> { %v1656_v22 = vpack.c.bf16 %v1272_v15, %v1264_v14  ;;  %v1520_v23 = vcvt.s32.f32 %v1008_v16  ;;  %v1528_v24 = vcvt.s32.f32 %v1016_v17  ;;  %v616_v25 = vunpack.c.1.s8 %v408_v36  ;;  %1877 = vmatmul.bf16.vlgmr.msrb.gmra.mxu1 %v3537_v62 }
  0xca   : >> { %1908 = vmatpush.bf16.msra.mxu0 %v1592_v18  ;;  %v1720_v26 = vpack.c.bf16 %v1400_v20, %v1392_v19  ;;  %v1120_v27 = vcvt.s32.f32 %v608_v21  ;;  %v736_v28 = vunpack.c.0.s8 %v440_v43  ;;  %v744_v29 = vunpack.c.1.s8 %v440_v43  ;;  %1890 = vmatmul.bf16.vlgmr.msrb.gmra.mxu2 %v3528_v42 }
  0xcb   : >> { %1921 = vmatpush.bf16.msra.mxu1 %v1656_v22  ;;  %v1784_v31 = vpack.c.bf16 %v1528_v24, %v1520_v23  ;;  %v1128_v32 = vcvt.s32.f32 %v616_v25  ;;  %v864_v33 = vunpack.c.0.s8 %v472_v53  ;;  %v872_v34 = vunpack.c.1.s8 %v472_v53  ;;  %1903 = vmatmul.bf16.vlgmr.msrb.gmra.mxu3 %v3530_v47  ;;  %v392_v24 = vld [vmem:[%s3502_s18 + $0x50] sm:$0xff] }
  0xcc   : >> { %1934 = vmatpush.bf16.msra.mxu2 %v1720_v26  ;;  %v1248_v35 = vcvt.s32.f32 %v736_v28  ;;  %v1256_v36 = vcvt.s32.f32 %v744_v29  ;;  %v992_v37 = vunpack.c.0.s8 %v504_v58  ;;  %v1000_v38 = vunpack.c.1.s8 %v504_v58 }
  0xcd   : >> { %1947 = vmatpush.bf16.msra.mxu3 %v1784_v31  ;;  %v1584_v40 = vpack.c.bf16 %v1128_v32, %v1120_v27  ;;  %v1376_v41 = vcvt.s32.f32 %v864_v33  ;;  %v1384_v44 = vcvt.s32.f32 %v872_v34  ;;  %v592_v45 = vunpack.c.2.s8 %v400_v30 }
  0xce   : >> { %v1648_v43 = vpack.c.bf16 %v1256_v36, %v1248_v35  ;;  %v1504_v48 = vcvt.s32.f32 %v992_v37  ;;  %v1512_v49 = vcvt.s32.f32 %v1000_v38  ;;  %v600_v51 = vunpack.c.3.s8 %v400_v30  ;;  %v456_v38 = vld [vmem:[%s3502_s18 + $0x250] sm:$0xff] }
  0xcf   : >> { %1909 = vmatpush.bf16.msra.mxu0 %v1584_v40  ;;  %v1712_v53 = vpack.c.bf16 %v1384_v44, %v1376_v41  ;;  %v1104_v50 = vcvt.s32.f32 %v592_v45  ;;  %v720_v54 = vunpack.c.2.s8 %v432_v39  ;;  %v728_v55 = vunpack.c.3.s8 %v432_v39  ;;  %v488_v45 = vld [vmem:[%s3502_s18 + $0x350] sm:$0xff] }
  0xd0   : >> { %1922 = vmatpush.bf16.msra.mxu1 %v1648_v43  ;;  %v1776_v57 = vpack.c.bf16 %v1512_v49, %v1504_v48  ;;  %v1112_v58 = vcvt.s32.f32 %v600_v51  ;;  %v848_v59 = vunpack.c.2.s8 %v464_v46  ;;  %v856_v56 = vunpack.c.3.s8 %v464_v46 }
  0xd1   : >> { %1935 = vmatpush.bf16.msra.mxu2 %v1712_v53  ;;  %v1232_v60 = vcvt.s32.f32 %v720_v54  ;;  %v1240_v63 = vcvt.s32.f32 %v728_v55  ;;  %v976_v0 = vunpack.c.2.s8 %v496_v52  ;;  %v984_v11 = vunpack.c.3.s8 %v496_v52 }
  0xd2   : >> { %1948 = vmatpush.bf16.msra.mxu3 %v1776_v57  ;;  %v1576_v12 = vpack.c.bf16 %v1112_v58, %v1104_v50  ;;  %v1360_v13 = vcvt.s32.f32 %v848_v59  ;;  %v1368_v14 = vcvt.s32.f32 %v856_v56  ;;  %v576_v15 = vunpack.c.0.s8 %v400_v30 }
  0xd3   : >> { %v1640_v16 = vpack.c.bf16 %v1240_v63, %v1232_v60  ;;  %v1488_v17 = vcvt.s32.f32 %v976_v0  ;;  %v1496_v18 = vcvt.s32.f32 %v984_v11  ;;  %v584_v19 = vunpack.c.1.s8 %v400_v30  ;;  %v424_v30 = vld [vmem:[%s3502_s18 + $0x150] sm:$0xff] }
  0xd4   : >> { %1910 = vmatpush.bf16.msra.mxu0 %v1576_v12  ;;  %v1704_v20 = vpack.c.bf16 %v1368_v14, %v1360_v13  ;;  %v1088_v21 = vcvt.s32.f32 %v576_v15  ;;  %v704_v22 = vunpack.c.0.s8 %v432_v39  ;;  %v712_v23 = vunpack.c.1.s8 %v432_v39 }
  0xd5   : >> { %1923 = vmatpush.bf16.msra.mxu1 %v1640_v16  ;;  %v1768_v25 = vpack.c.bf16 %v1496_v18, %v1488_v17  ;;  %v1096_v26 = vcvt.s32.f32 %v584_v19  ;;  %v832_v27 = vunpack.c.0.s8 %v464_v46  ;;  %v840_v28 = vunpack.c.1.s8 %v464_v46  ;;  %v384_v18 = vld [vmem:[%s3502_s18 + $0x10] sm:$0xff] }
  0xd6   : >> { %1936 = vmatpush.bf16.msra.mxu2 %v1704_v20  ;;  %v1216_v29 = vcvt.s32.f32 %v704_v22  ;;  %v1224_v31 = vcvt.s32.f32 %v712_v23  ;;  %v960_v32 = vunpack.c.0.s8 %v496_v52  ;;  %v968_v33 = vunpack.c.1.s8 %v496_v52 }
  0xd7   : >> { %1949 = vmatpush.bf16.msra.mxu3 %v1768_v25  ;;  %v1568_v34 = vpack.c.bf16 %v1096_v26, %v1088_v21  ;;  %v1344_v35 = vcvt.s32.f32 %v832_v27  ;;  %v1352_v36 = vcvt.s32.f32 %v840_v28  ;;  %v560_v37 = vunpack.c.2.s8 %v392_v24 }
  0xd8   : >> { %v1632_v39 = vpack.c.bf16 %v1224_v31, %v1216_v29  ;;  %v1472_v40 = vcvt.s32.f32 %v960_v32  ;;  %v1480_v41 = vcvt.s32.f32 %v968_v33  ;;  %v568_v44 = vunpack.c.3.s8 %v392_v24  ;;  %v448_v33 = vld [vmem:[%s3502_s18 + $0x210] sm:$0xff] }
  0xd9   : >> { %1911 = vmatpush.bf16.msra.mxu0 %v1568_v34  ;;  %v1696_v46 = vpack.c.bf16 %v1352_v36, %v1344_v35  ;;  %v1072_v43 = vcvt.s32.f32 %v560_v37  ;;  %v688_v48 = vunpack.c.2.s8 %v424_v30  ;;  %v696_v49 = vunpack.c.3.s8 %v424_v30  ;;  %v480_v37 = vld [vmem:[%s3502_s18 + $0x310] sm:$0xff] }
  0xda   : >> { %1924 = vmatpush.bf16.msra.mxu1 %v1632_v39  ;;  %v1760_v51 = vpack.c.bf16 %v1480_v41, %v1472_v40  ;;  %v1080_v52 = vcvt.s32.f32 %v568_v44  ;;  %v816_v53 = vunpack.c.2.s8 %v456_v38  ;;  %v824_v50 = vunpack.c.3.s8 %v456_v38 }
  0xdb   : >> { %1937 = vmatpush.bf16.msra.mxu2 %v1696_v46  ;;  %v1200_v54 = vcvt.s32.f32 %v688_v48  ;;  %v1208_v55 = vcvt.s32.f32 %v696_v49  ;;  %v944_v57 = vunpack.c.2.s8 %v488_v45  ;;  %v952_v58 = vunpack.c.3.s8 %v488_v45 }
  0xdc   : >> { %1950 = vmatpush.bf16.msra.mxu3 %v1760_v51  ;;  %v1560_v59 = vpack.c.bf16 %v1080_v52, %v1072_v43  ;;  %v1328_v56 = vcvt.s32.f32 %v816_v53  ;;  %v1336_v60 = vcvt.s32.f32 %v824_v50  ;;  %v544_v63 = vunpack.c.0.s8 %v392_v24 }
  0xdd   : >> { %v1624_v0 = vpack.c.bf16 %v1208_v55, %v1200_v54  ;;  %v1456_v11 = vcvt.s32.f32 %v944_v57  ;;  %v1464_v12 = vcvt.s32.f32 %v952_v58  ;;  %v552_v13 = vunpack.c.1.s8 %v392_v24  ;;  %v416_v24 = vld [vmem:[%s3502_s18 + $0x110] sm:$0xff] }
  0xde   : >> { %1912 = vmatpush.bf16.msra.mxu0 %v1560_v59  ;;  %v1688_v14 = vpack.c.bf16 %v1336_v60, %v1328_v56  ;;  %v1056_v15 = vcvt.s32.f32 %v544_v63  ;;  %v672_v16 = vunpack.c.0.s8 %v424_v30  ;;  %v680_v17 = vunpack.c.1.s8 %v424_v30 }
  0xdf   : >> { %1925 = vmatpush.bf16.msra.mxu1 %v1624_v0  ;;  %v1752_v19 = vpack.c.bf16 %v1464_v12, %v1456_v11  ;;  %v1064_v20 = vcvt.s32.f32 %v552_v13  ;;  %v800_v21 = vunpack.c.0.s8 %v456_v38  ;;  %v808_v22 = vunpack.c.1.s8 %v456_v38  ;;  %v409_v12 = vld [vmem:[%s3502_s18 + $0xd8] sm:$0xff] }
  0xe0   : >> { %1938 = vmatpush.bf16.msra.mxu2 %v1688_v14  ;;  %v1184_v23 = vcvt.s32.f32 %v672_v16  ;;  %v1192_v25 = vcvt.s32.f32 %v680_v17  ;;  %v928_v26 = vunpack.c.0.s8 %v488_v45  ;;  %v936_v27 = vunpack.c.1.s8 %v488_v45 }
  0xe1   : >> { %1951 = vmatpush.bf16.msra.mxu3 %v1752_v19  ;;  %v1552_v28 = vpack.c.bf16 %v1064_v20, %v1056_v15  ;;  %v1312_v29 = vcvt.s32.f32 %v800_v21  ;;  %v1320_v31 = vcvt.s32.f32 %v808_v22  ;;  %v528_v32 = vunpack.c.2.s8 %v384_v18 }
  0xe2   : >> { %v1616_v30 = vpack.c.bf16 %v1192_v25, %v1184_v23  ;;  %v1440_v34 = vcvt.s32.f32 %v928_v26  ;;  %v1448_v35 = vcvt.s32.f32 %v936_v27  ;;  %v536_v36 = vunpack.c.3.s8 %v384_v18  ;;  %v473_v27 = vld [vmem:[%s3502_s18 + $0x2d8] sm:$0xff] }
  0xe3   : >> { %1913 = vmatpush.bf16.msra.mxu0 %v1552_v28  ;;  %v1680_v38 = vpack.c.bf16 %v1320_v31, %v1312_v29  ;;  %v1040_v39 = vcvt.s32.f32 %v528_v32  ;;  %v656_v40 = vunpack.c.2.s8 %v416_v24  ;;  %v664_v41 = vunpack.c.3.s8 %v416_v24  ;;  %v505_v32 = vld [vmem:[%s3502_s18 + $0x3d8] sm:$0xff] }
  0xe4   : >> { %1926 = vmatpush.bf16.msra.mxu1 %v1616_v30  ;;  %v1744_v44 = vpack.c.bf16 %v1448_v35, %v1440_v34  ;;  %v1048_v45 = vcvt.s32.f32 %v536_v36  ;;  %v784_v46 = vunpack.c.2.s8 %v448_v33  ;;  %v792_v43 = vunpack.c.3.s8 %v448_v33 }
  0xe5   : >> { %1939 = vmatpush.bf16.msra.mxu2 %v1680_v38  ;;  %v1168_v48 = vcvt.s32.f32 %v656_v40  ;;  %v1176_v49 = vcvt.s32.f32 %v664_v41  ;;  %v912_v51 = vunpack.c.2.s8 %v480_v37  ;;  %v920_v52 = vunpack.c.3.s8 %v480_v37 }
  0xe6   : >> { %1952 = vmatpush.bf16.msra.mxu3 %v1744_v44  ;;  %v1544_v53 = vpack.c.bf16 %v1048_v45, %v1040_v39  ;;  %v1296_v50 = vcvt.s32.f32 %v784_v46  ;;  %v1304_v54 = vcvt.s32.f32 %v792_v43  ;;  %v512_v55 = vunpack.c.0.s8 %v384_v18 }
  0xe7   : >> { %v1608_v57 = vpack.c.bf16 %v1176_v49, %v1168_v48  ;;  %v1424_v58 = vcvt.s32.f32 %v912_v51  ;;  %v1432_v59 = vcvt.s32.f32 %v920_v52  ;;  %v520_v56 = vunpack.c.1.s8 %v384_v18  ;;  %v441_v18 = vld [vmem:[%s3502_s18 + $0x1d8] sm:$0xff] }
  0xe8   : >> { %1914 = vmatpush.bf16.msra.mxu0 %v1544_v53  ;;  %v1672_v60 = vpack.c.bf16 %v1304_v54, %v1296_v50  ;;  %v1024_v63 = vcvt.s32.f32 %v512_v55  ;;  %v640_v0 = vunpack.c.0.s8 %v416_v24  ;;  %v648_v11 = vunpack.c.1.s8 %v416_v24 }
  0xe9   : >> { %1927 = vmatpush.bf16.msra.mxu1 %v1608_v57  ;;  %v1736_v13 = vpack.c.bf16 %v1432_v59, %v1424_v58  ;;  %v1032_v14 = vcvt.s32.f32 %v520_v56  ;;  %v768_v15 = vunpack.c.0.s8 %v448_v33  ;;  %v776_v16 = vunpack.c.1.s8 %v448_v33  ;;  %v401_v59 = vld [vmem:[%s3502_s18 + $0x98] sm:$0xff] }
  0xea   : >> { %1940 = vmatpush.bf16.msra.mxu2 %v1672_v60  ;;  %v1152_v17 = vcvt.s32.f32 %v640_v0  ;;  %v1160_v19 = vcvt.s32.f32 %v648_v11  ;;  %v896_v20 = vunpack.c.0.s8 %v480_v37  ;;  %v904_v21 = vunpack.c.1.s8 %v480_v37 }
  0xeb   : >> { %1953 = vmatpush.bf16.msra.mxu3 %v1736_v13  ;;  %v1536_v22 = vpack.c.bf16 %v1032_v14, %v1024_v63  ;;  %v1280_v23 = vcvt.s32.f32 %v768_v15  ;;  %v1288_v25 = vcvt.s32.f32 %v776_v16  ;;  %v625_v26 = vunpack.c.2.s8 %v409_v12  ;;  %v433_v13 = vld [vmem:[%s3502_s18 + $0x198] sm:$0xff] }
  0xec   : >> { %v1600_v24 = vpack.c.bf16 %v1160_v19, %v1152_v17  ;;  %v1408_v28 = vcvt.s32.f32 %v896_v20  ;;  %v1416_v29 = vcvt.s32.f32 %v904_v21  ;;  %v633_v31 = vunpack.c.3.s8 %v409_v12  ;;  %v465_v17 = vld [vmem:[%s3502_s18 + $0x298] sm:$0xff] }
  0xed   : >> { %1915 = vmatpush.bf16.msra.mxu0 %v1536_v22  ;;  %v1664_v33 = vpack.c.bf16 %v1288_v25, %v1280_v23  ;;  %v1137_v30 = vcvt.s32.f32 %v625_v26  ;;  %v753_v34 = vunpack.c.2.s8 %v441_v18  ;;  %v761_v35 = vunpack.c.3.s8 %v441_v18  ;;  %v497_v22 = vld [vmem:[%s3502_s18 + $0x398] sm:$0xff] }
  0xee   : >> { %1928 = vmatpush.bf16.msra.mxu1 %v1600_v24  ;;  %v1728_v36 = vpack.c.bf16 %v1416_v29, %v1408_v28  ;;  %v1145_v37 = vcvt.s32.f32 %v633_v31  ;;  %v881_v38 = vunpack.c.2.s8 %v473_v27  ;;  %v889_v39 = vunpack.c.3.s8 %v473_v27 }
  0xef   : >> { %1941 = vmatpush.bf16.msra.mxu2 %v1664_v33  ;;  %v1265_v40 = vcvt.s32.f32 %v753_v34  ;;  %v1273_v41 = vcvt.s32.f32 %v761_v35  ;;  %v1009_v44 = vunpack.c.2.s8 %v505_v32  ;;  %v1017_v45 = vunpack.c.3.s8 %v505_v32 }
  0xf0   : >> { %1954 = vmatpush.bf16.msra.mxu3 %v1728_v36  ;;  %v1593_v46 = vpack.c.bf16 %v1145_v37, %v1137_v30  ;;  %v1393_v43 = vcvt.s32.f32 %v881_v38  ;;  %v1401_v48 = vcvt.s32.f32 %v889_v39  ;;  %v609_v49 = vunpack.c.0.s8 %v409_v12  ;;  %1916 = vmatmul.bf16.vlgmr.msra.gmra.mxu0 %v3535_v61 }
  0xf1   : >> { %v1657_v51 = vpack.c.bf16 %v1273_v41, %v1265_v40  ;;  %v1521_v52 = vcvt.s32.f32 %v1009_v44  ;;  %v1529_v53 = vcvt.s32.f32 %v1017_v45  ;;  %v617_v50 = vunpack.c.1.s8 %v409_v12  ;;  %1929 = vmatmul.bf16.vlgmr.msra.gmra.mxu1 %v3537_v62 }
  0xf2   : >> { %1960 = vmatpush.bf16.msrb.mxu0 %v1593_v46  ;;  %v1721_v54 = vpack.c.bf16 %v1401_v48, %v1393_v43  ;;  %v1121_v55 = vcvt.s32.f32 %v609_v49  ;;  %v737_v57 = vunpack.c.0.s8 %v441_v18  ;;  %v745_v58 = vunpack.c.1.s8 %v441_v18  ;;  %1942 = vmatmul.bf16.vlgmr.msra.gmra.mxu2 %v3528_v42  ;;  %v393_v48 = vld [vmem:[%s3502_s18 + $0x58] sm:$0xff] }
  0xf3   : >> { %1973 = vmatpush.bf16.msrb.mxu1 %v1657_v51  ;;  %v1785_v56 = vpack.c.bf16 %v1529_v53, %v1521_v52  ;;  %v1129_v60 = vcvt.s32.f32 %v617_v50  ;;  %v865_v61 = vunpack.c.0.s8 %v473_v27  ;;  %v873_v63 = vunpack.c.1.s8 %v473_v27  ;;  %1955 = vmatmul.bf16.vlgmr.msra.gmra.mxu3 %v3530_v47 }
  0xf4   : >> { %1986 = vmatpush.bf16.msrb.mxu2 %v1721_v54  ;;  %v1249_v62 = vcvt.s32.f32 %v737_v57  ;;  %v1257_v0 = vcvt.s32.f32 %v745_v58  ;;  %v993_v11 = vunpack.c.0.s8 %v505_v32  ;;  %v1001_v12 = vunpack.c.1.s8 %v505_v32  ;;  %v425_v58 = vld [vmem:[%s3502_s18 + $0x158] sm:$0xff] }
  0xf5   : >> { %1999 = vmatpush.bf16.msrb.mxu3 %v1785_v56  ;;  %v1585_v14 = vpack.c.bf16 %v1129_v60, %v1121_v55  ;;  %v1377_v15 = vcvt.s32.f32 %v865_v61  ;;  %v1385_v16 = vcvt.s32.f32 %v873_v63  ;;  %v593_v42 = vunpack.c.2.s8 %v401_v59  ;;  %v457_v63 = vld [vmem:[%s3502_s18 + $0x258] sm:$0xff] }
  0xf6   : >> { %v1649_v19 = vpack.c.bf16 %v1257_v0, %v1249_v62  ;;  %v1505_v20 = vcvt.s32.f32 %v993_v11  ;;  %v1513_v21 = vcvt.s32.f32 %v1001_v12  ;;  %v601_v18 = vunpack.c.3.s8 %v401_v59 }
  0xf7   : >> { %1961 = vmatpush.bf16.msrb.mxu0 %v1585_v14  ;;  %v1713_v47 = vpack.c.bf16 %v1385_v16, %v1377_v15  ;;  %v1105_v23 = vcvt.s32.f32 %v593_v42  ;;  %v721_v25 = vunpack.c.2.s8 %v433_v13  ;;  %v729_v26 = vunpack.c.3.s8 %v433_v13 }
  0xf8   : >> { %1974 = vmatpush.bf16.msrb.mxu1 %v1649_v19  ;;  %v1777_v27 = vpack.c.bf16 %v1513_v21, %v1505_v20  ;;  %v1113_v24 = vcvt.s32.f32 %v601_v18  ;;  %v849_v28 = vunpack.c.2.s8 %v465_v17  ;;  %v857_v29 = vunpack.c.3.s8 %v465_v17 }
  0xf9   : >> { %1987 = vmatpush.bf16.msrb.mxu2 %v1713_v47  ;;  %v1233_v31 = vcvt.s32.f32 %v721_v25  ;;  %v1241_v32 = vcvt.s32.f32 %v729_v26  ;;  %v977_v33 = vunpack.c.2.s8 %v497_v22  ;;  %v985_v30 = vunpack.c.3.s8 %v497_v22 }
  0xfa   : >> { %2000 = vmatpush.bf16.msrb.mxu3 %v1777_v27  ;;  %v1577_v34 = vpack.c.bf16 %v1113_v24, %v1105_v23  ;;  %v1361_v35 = vcvt.s32.f32 %v849_v28  ;;  %v1369_v36 = vcvt.s32.f32 %v857_v29  ;;  %v577_v37 = vunpack.c.0.s8 %v401_v59 }
  0xfb   : >> { %v1641_v38 = vpack.c.bf16 %v1241_v32, %v1233_v31  ;;  %v1489_v39 = vcvt.s32.f32 %v977_v33  ;;  %v1497_v40 = vcvt.s32.f32 %v985_v30  ;;  %v585_v41 = vunpack.c.1.s8 %v401_v59 }
  0xfc   : >> { %1962 = vmatpush.bf16.msrb.mxu0 %v1577_v34  ;;  %v1705_v44 = vpack.c.bf16 %v1369_v36, %v1361_v35  ;;  %v1089_v45 = vcvt.s32.f32 %v577_v37  ;;  %v705_v46 = vunpack.c.0.s8 %v433_v13  ;;  %v713_v43 = vunpack.c.1.s8 %v433_v13  ;;  %v489_v13 = vld [vmem:[%s3502_s18 + $0x358] sm:$0xff] }
  0xfd   : >> { %1975 = vmatpush.bf16.msrb.mxu1 %v1641_v38  ;;  %v1769_v49 = vpack.c.bf16 %v1497_v40, %v1489_v39  ;;  %v1097_v51 = vcvt.s32.f32 %v585_v41  ;;  %v833_v52 = vunpack.c.0.s8 %v465_v17  ;;  %v841_v53 = vunpack.c.1.s8 %v465_v17  ;;  %v385_v36 = vld [vmem:[%s3502_s18 + $0x18] sm:$0xff] }
  0xfe   : >> { %1988 = vmatpush.bf16.msrb.mxu2 %v1705_v44  ;;  %v1217_v50 = vcvt.s32.f32 %v705_v46  ;;  %v1225_v54 = vcvt.s32.f32 %v713_v43  ;;  %v961_v55 = vunpack.c.0.s8 %v497_v22  ;;  %v969_v57 = vunpack.c.1.s8 %v497_v22  ;;  %v417_v43 = vld [vmem:[%s3502_s18 + $0x118] sm:$0xff] }
  0xff   : >> { %2001 = vmatpush.bf16.msrb.mxu3 %v1769_v49  ;;  %v1569_v59 = vpack.c.bf16 %v1097_v51, %v1089_v45  ;;  %v1345_v56 = vcvt.s32.f32 %v833_v52  ;;  %v1353_v60 = vcvt.s32.f32 %v841_v53  ;;  %v561_v61 = vunpack.c.2.s8 %v393_v48  ;;  %v449_v53 = vld [vmem:[%s3502_s18 + $0x218] sm:$0xff] }
 0x100   : >> { %v1633_v62 = vpack.c.bf16 %v1225_v54, %v1217_v50  ;;  %v1473_v0 = vcvt.s32.f32 %v961_v55  ;;  %v1481_v11 = vcvt.s32.f32 %v969_v57  ;;  %v569_v12 = vunpack.c.3.s8 %v393_v48 }
 0x101   : >> { %1963 = vmatpush.bf16.msrb.mxu0 %v1569_v59  ;;  %v1697_v14 = vpack.c.bf16 %v1353_v60, %v1345_v56  ;;  %v1073_v15 = vcvt.s32.f32 %v561_v61  ;;  %v689_v16 = vunpack.c.2.s8 %v425_v58  ;;  %v697_v42 = vunpack.c.3.s8 %v425_v58 }
 0x102   : >> { %1976 = vmatpush.bf16.msrb.mxu1 %v1633_v62  ;;  %v1761_v17 = vpack.c.bf16 %v1481_v11, %v1473_v0  ;;  %v1081_v19 = vcvt.s32.f32 %v569_v12  ;;  %v817_v20 = vunpack.c.2.s8 %v457_v63  ;;  %v825_v21 = vunpack.c.3.s8 %v457_v63 }
 0x103   : >> { %1989 = vmatpush.bf16.msrb.mxu2 %v1697_v14  ;;  %v1201_v18 = vcvt.s32.f32 %v689_v16  ;;  %v1209_v22 = vcvt.s32.f32 %v697_v42  ;;  %v945_v47 = vunpack.c.2.s8 %v489_v13  ;;  %v953_v23 = vunpack.c.3.s8 %v489_v13 }
 0x104   : >> { %2002 = vmatpush.bf16.msrb.mxu3 %v1761_v17  ;;  %v1561_v25 = vpack.c.bf16 %v1081_v19, %v1073_v15  ;;  %v1329_v26 = vcvt.s32.f32 %v817_v20  ;;  %v1337_v27 = vcvt.s32.f32 %v825_v21  ;;  %v545_v24 = vunpack.c.0.s8 %v393_v48 }
 0x105   : >> { %v1625_v28 = vpack.c.bf16 %v1209_v22, %v1201_v18  ;;  %v1457_v29 = vcvt.s32.f32 %v945_v47  ;;  %v1465_v31 = vcvt.s32.f32 %v953_v23  ;;  %v553_v32 = vunpack.c.1.s8 %v393_v48 }
 0x106   : >> { %1964 = vmatpush.bf16.msrb.mxu0 %v1561_v25  ;;  %v1689_v33 = vpack.c.bf16 %v1337_v27, %v1329_v26  ;;  %v1057_v30 = vcvt.s32.f32 %v545_v24  ;;  %v673_v34 = vunpack.c.0.s8 %v425_v58  ;;  %v681_v35 = vunpack.c.1.s8 %v425_v58  ;;  %v481_v58 = vld [vmem:[%s3502_s18 + $0x318] sm:$0xff]  ;;  %v410_v27 = vld [vmem:[%s3502_s18 + $0xe0] sm:$0xff] }
 0x107   : >> { %1977 = vmatpush.bf16.msrb.mxu1 %v1625_v28  ;;  %v1753_v37 = vpack.c.bf16 %v1465_v31, %v1457_v29  ;;  %v1065_v38 = vcvt.s32.f32 %v553_v32  ;;  %v801_v39 = vunpack.c.0.s8 %v457_v63  ;;  %v809_v40 = vunpack.c.1.s8 %v457_v63 }
 0x108   : >> { %1990 = vmatpush.bf16.msrb.mxu2 %v1689_v33  ;;  %v1185_v41 = vcvt.s32.f32 %v673_v34  ;;  %v1193_v44 = vcvt.s32.f32 %v681_v35  ;;  %v929_v45 = vunpack.c.0.s8 %v489_v13  ;;  %v937_v46 = vunpack.c.1.s8 %v489_v13  ;;  %v442_v35 = vld [vmem:[%s3502_s18 + $0x1e0] sm:$0xff] }
 0x109   : >> { %2003 = vmatpush.bf16.msrb.mxu3 %v1753_v37  ;;  %v1553_v48 = vpack.c.bf16 %v1065_v38, %v1057_v30  ;;  %v1313_v49 = vcvt.s32.f32 %v801_v39  ;;  %v1321_v51 = vcvt.s32.f32 %v809_v40  ;;  %v529_v52 = vunpack.c.2.s8 %v385_v36  ;;  %v474_v40 = vld [vmem:[%s3502_s18 + $0x2e0] sm:$0xff] }
 0x10a   : >> { %v1617_v50 = vpack.c.bf16 %v1193_v44, %v1185_v41  ;;  %v1441_v54 = vcvt.s32.f32 %v929_v45  ;;  %v1449_v55 = vcvt.s32.f32 %v937_v46  ;;  %v537_v57 = vunpack.c.3.s8 %v385_v36 }
 0x10b   : >> { %1965 = vmatpush.bf16.msrb.mxu0 %v1553_v48  ;;  %v1681_v59 = vpack.c.bf16 %v1321_v51, %v1313_v49  ;;  %v1041_v56 = vcvt.s32.f32 %v529_v52  ;;  %v657_v60 = vunpack.c.2.s8 %v417_v43  ;;  %v665_v61 = vunpack.c.3.s8 %v417_v43 }
 0x10c   : >> { %1978 = vmatpush.bf16.msrb.mxu1 %v1617_v50  ;;  %v1745_v63 = vpack.c.bf16 %v1449_v55, %v1441_v54  ;;  %v1049_v62 = vcvt.s32.f32 %v537_v57  ;;  %v785_v0 = vunpack.c.2.s8 %v449_v53  ;;  %v793_v11 = vunpack.c.3.s8 %v449_v53 }
 0x10d   : >> { %1991 = vmatpush.bf16.msrb.mxu2 %v1681_v59  ;;  %v1169_v12 = vcvt.s32.f32 %v657_v60  ;;  %v1177_v13 = vcvt.s32.f32 %v665_v61  ;;  %v913_v14 = vunpack.c.2.s8 %v481_v58  ;;  %v921_v15 = vunpack.c.3.s8 %v481_v58 }
 0x10e   : >> { %2004 = vmatpush.bf16.msrb.mxu3 %v1745_v63  ;;  %v1545_v16 = vpack.c.bf16 %v1049_v62, %v1041_v56  ;;  %v1297_v42 = vcvt.s32.f32 %v785_v0  ;;  %v1305_v17 = vcvt.s32.f32 %v793_v11  ;;  %v513_v19 = vunpack.c.0.s8 %v385_v36  ;;  %v3596_v0 = vld [vmem:[#allocation1] sm:$0xff] }
 0x10f   : >> { %v1609_v20 = vpack.c.bf16 %v1177_v13, %v1169_v12  ;;  %v1425_v21 = vcvt.s32.f32 %v913_v14  ;;  %v1433_v18 = vcvt.s32.f32 %v921_v15  ;;  %v521_v22 = vunpack.c.1.s8 %v385_v36  ;;  %v3599_v15 = vld [vmem:[#allocation1 + $0x9] sm:$0xff] }
 0x110   : >> { %1966 = vmatpush.bf16.msrb.mxu0 %v1545_v16  ;;  %v1673_v47 = vpack.c.bf16 %v1305_v17, %v1297_v42  ;;  %v1025_v23 = vcvt.s32.f32 %v513_v19  ;;  %v641_v25 = vunpack.c.0.s8 %v417_v43  ;;  %v649_v26 = vunpack.c.1.s8 %v417_v43  ;;  %v506_v43 = vld [vmem:[%s3502_s18 + $0x3e0] sm:$0xff] }
 0x111   : >> { %1979 = vmatpush.bf16.msrb.mxu1 %v1609_v20  ;;  %v1737_v24 = vpack.c.bf16 %v1433_v18, %v1425_v21  ;;  %v1033_v28 = vcvt.s32.f32 %v521_v22  ;;  %v769_v29 = vunpack.c.0.s8 %v449_v53  ;;  %v777_v31 = vunpack.c.1.s8 %v449_v53  ;;  %v402_v20 = vld [vmem:[%s3502_s18 + $0xa0] sm:$0xff]  ;;  %v3603_v21 = vld [vmem:[#allocation1 + $0x12] sm:$0xff] }
 0x112   : >> { %1992 = vmatpush.bf16.msrb.mxu2 %v1673_v47  ;;  %v1153_v32 = vcvt.s32.f32 %v641_v25  ;;  %v1161_v33 = vcvt.s32.f32 %v649_v26  ;;  %v897_v30 = vunpack.c.0.s8 %v481_v58  ;;  %v905_v34 = vunpack.c.1.s8 %v481_v58  ;;  %v3606_v25 = vld [vmem:[#allocation1 + $0x1b] sm:$0xff] }
 0x113   : >> { %2005 = vmatpush.bf16.msrb.mxu3 %v1737_v24  ;;  %v1537_v36 = vpack.c.bf16 %v1033_v28, %v1025_v23  ;;  %v1281_v37 = vcvt.s32.f32 %v769_v29  ;;  %v1289_v38 = vcvt.s32.f32 %v777_v31  ;;  %v626_v39 = vunpack.c.2.s8 %v410_v27  ;;  %v434_v29 = vld [vmem:[%s3502_s18 + $0x1a0] sm:$0xff] }
 0x114   : >> { %v1601_v41 = vpack.c.bf16 %v1161_v33, %v1153_v32  ;;  %v1409_v44 = vcvt.s32.f32 %v897_v30  ;;  %v1417_v45 = vcvt.s32.f32 %v905_v34  ;;  %v634_v46 = vunpack.c.3.s8 %v410_v27  ;;  %v466_v34 = vld [vmem:[%s3502_s18 + $0x2a0] sm:$0xff] }
 0x115   : >> { %1967 = vmatpush.bf16.msrb.mxu0 %v1537_v36  ;;  %v1665_v48 = vpack.c.bf16 %v1289_v38, %v1281_v37  ;;  %v1138_v49 = vcvt.s32.f32 %v626_v39  ;;  %v754_v51 = vunpack.c.2.s8 %v442_v35  ;;  %v762_v52 = vunpack.c.3.s8 %v442_v35  ;;  %v498_v39 = vld [vmem:[%s3502_s18 + $0x3a0] sm:$0xff] }
 0x116   : >> { %1980 = vmatpush.bf16.msrb.mxu1 %v1601_v41  ;;  %v1729_v53 = vpack.c.bf16 %v1417_v45, %v1409_v44  ;;  %v1146_v50 = vcvt.s32.f32 %v634_v46  ;;  %v882_v54 = vunpack.c.2.s8 %v474_v40  ;;  %v890_v55 = vunpack.c.3.s8 %v474_v40 }
 0x117   : >> { %1993 = vmatpush.bf16.msrb.mxu2 %v1665_v48  ;;  %v1266_v57 = vcvt.s32.f32 %v754_v51  ;;  %v1274_v58 = vcvt.s32.f32 %v762_v52  ;;  %v1010_v59 = vunpack.c.2.s8 %v506_v43  ;;  %v1018_v56 = vunpack.c.3.s8 %v506_v43 }
 0x118   : >> { %2006 = vmatpush.bf16.msrb.mxu3 %v1729_v53  ;;  %v1594_v60 = vpack.c.bf16 %v1146_v50, %v1138_v49  ;;  %v1394_v61 = vcvt.s32.f32 %v882_v54  ;;  %v1402_v63 = vcvt.s32.f32 %v890_v55  ;;  %v610_v62 = vunpack.c.0.s8 %v410_v27  ;;  %1968 = vmatmul.bf16.vlgmr.msrb.gmra.mxu0 %v3596_v0 }
 0x119   : >> { %v1658_v11 = vpack.c.bf16 %v1274_v58, %v1266_v57  ;;  %v1522_v12 = vcvt.s32.f32 %v1010_v59  ;;  %v1530_v13 = vcvt.s32.f32 %v1018_v56  ;;  %v618_v14 = vunpack.c.1.s8 %v410_v27  ;;  %1981 = vmatmul.bf16.vlgmr.msrb.gmra.mxu1 %v3599_v15 }
 0x11a   : >> { %2012 = vmatpush.bf16.msra.mxu0 %v1594_v60  ;;  %v1722_v16 = vpack.c.bf16 %v1402_v63, %v1394_v61  ;;  %v1122_v42 = vcvt.s32.f32 %v610_v62  ;;  %v738_v17 = vunpack.c.0.s8 %v442_v35  ;;  %v746_v19 = vunpack.c.1.s8 %v442_v35  ;;  %1994 = vmatmul.bf16.vlgmr.msrb.gmra.mxu2 %v3603_v21 }
 0x11b   : >> { %2025 = vmatpush.bf16.msra.mxu1 %v1658_v11  ;;  %v1786_v18 = vpack.c.bf16 %v1530_v13, %v1522_v12  ;;  %v1130_v22 = vcvt.s32.f32 %v618_v14  ;;  %v866_v47 = vunpack.c.0.s8 %v474_v40  ;;  %v874_v23 = vunpack.c.1.s8 %v474_v40  ;;  %2007 = vmatmul.bf16.vlgmr.msrb.gmra.mxu3 %v3606_v25  ;;  %v394_v13 = vld [vmem:[%s3502_s18 + $0x60] sm:$0xff] }
 0x11c   : >> { %2038 = vmatpush.bf16.msra.mxu2 %v1722_v16  ;;  %v1250_v26 = vcvt.s32.f32 %v738_v17  ;;  %v1258_v27 = vcvt.s32.f32 %v746_v19  ;;  %v994_v24 = vunpack.c.0.s8 %v506_v43  ;;  %v1002_v28 = vunpack.c.1.s8 %v506_v43 }
 0x11d   : >> { %2051 = vmatpush.bf16.msra.mxu3 %v1786_v18  ;;  %v1586_v31 = vpack.c.bf16 %v1130_v22, %v1122_v42  ;;  %v1378_v32 = vcvt.s32.f32 %v866_v47  ;;  %v1386_v33 = vcvt.s32.f32 %v874_v23  ;;  %v594_v30 = vunpack.c.2.s8 %v402_v20 }
 0x11e   : >> { %v1650_v35 = vpack.c.bf16 %v1258_v27, %v1250_v26  ;;  %v1506_v36 = vcvt.s32.f32 %v994_v24  ;;  %v1514_v37 = vcvt.s32.f32 %v1002_v28  ;;  %v602_v38 = vunpack.c.3.s8 %v402_v20  ;;  %v458_v28 = vld [vmem:[%s3502_s18 + $0x260] sm:$0xff] }
 0x11f   : >> { %2013 = vmatpush.bf16.msra.mxu0 %v1586_v31  ;;  %v1714_v40 = vpack.c.bf16 %v1386_v33, %v1378_v32  ;;  %v1106_v41 = vcvt.s32.f32 %v594_v30  ;;  %v722_v44 = vunpack.c.2.s8 %v434_v29  ;;  %v730_v45 = vunpack.c.3.s8 %v434_v29  ;;  %v490_v30 = vld [vmem:[%s3502_s18 + $0x360] sm:$0xff] }
 0x120   : >> { %2026 = vmatpush.bf16.msra.mxu1 %v1650_v35  ;;  %v1778_v46 = vpack.c.bf16 %v1514_v37, %v1506_v36  ;;  %v1114_v43 = vcvt.s32.f32 %v602_v38  ;;  %v850_v48 = vunpack.c.2.s8 %v466_v34  ;;  %v858_v49 = vunpack.c.3.s8 %v466_v34 }
 0x121   : >> { %2039 = vmatpush.bf16.msra.mxu2 %v1714_v40  ;;  %v1234_v51 = vcvt.s32.f32 %v722_v44  ;;  %v1242_v52 = vcvt.s32.f32 %v730_v45  ;;  %v978_v53 = vunpack.c.2.s8 %v498_v39  ;;  %v986_v50 = vunpack.c.3.s8 %v498_v39 }
 0x122   : >> { %2052 = vmatpush.bf16.msra.mxu3 %v1778_v46  ;;  %v1578_v54 = vpack.c.bf16 %v1114_v43, %v1106_v41  ;;  %v1362_v55 = vcvt.s32.f32 %v850_v48  ;;  %v1370_v57 = vcvt.s32.f32 %v858_v49  ;;  %v578_v58 = vunpack.c.0.s8 %v402_v20 }
 0x123   : >> { %v1642_v59 = vpack.c.bf16 %v1242_v52, %v1234_v51  ;;  %v1490_v56 = vcvt.s32.f32 %v978_v53  ;;  %v1498_v60 = vcvt.s32.f32 %v986_v50  ;;  %v586_v61 = vunpack.c.1.s8 %v402_v20  ;;  %v426_v20 = vld [vmem:[%s3502_s18 + $0x160] sm:$0xff] }
 0x124   : >> { %2014 = vmatpush.bf16.msra.mxu0 %v1578_v54  ;;  %v1706_v63 = vpack.c.bf16 %v1370_v57, %v1362_v55  ;;  %v1090_v62 = vcvt.s32.f32 %v578_v58  ;;  %v706_v11 = vunpack.c.0.s8 %v434_v29  ;;  %v714_v12 = vunpack.c.1.s8 %v434_v29 }
 0x125   : >> { %2027 = vmatpush.bf16.msra.mxu1 %v1642_v59  ;;  %v1770_v14 = vpack.c.bf16 %v1498_v60, %v1490_v56  ;;  %v1098_v16 = vcvt.s32.f32 %v586_v61  ;;  %v834_v42 = vunpack.c.0.s8 %v466_v34  ;;  %v842_v17 = vunpack.c.1.s8 %v466_v34  ;;  %v386_v60 = vld [vmem:[%s3502_s18 + $0x20] sm:$0xff] }
 0x126   : >> { %2040 = vmatpush.bf16.msra.mxu2 %v1706_v63  ;;  %v1218_v19 = vcvt.s32.f32 %v706_v11  ;;  %v1226_v18 = vcvt.s32.f32 %v714_v12  ;;  %v962_v22 = vunpack.c.0.s8 %v498_v39  ;;  %v970_v47 = vunpack.c.1.s8 %v498_v39 }
 0x127   : >> { %2053 = vmatpush.bf16.msra.mxu3 %v1770_v14  ;;  %v1570_v23 = vpack.c.bf16 %v1098_v16, %v1090_v62  ;;  %v1346_v26 = vcvt.s32.f32 %v834_v42  ;;  %v1354_v27 = vcvt.s32.f32 %v842_v17  ;;  %v562_v24 = vunpack.c.2.s8 %v394_v13 }
 0x128   : >> { %v1634_v29 = vpack.c.bf16 %v1226_v18, %v1218_v19  ;;  %v1474_v31 = vcvt.s32.f32 %v962_v22  ;;  %v1482_v32 = vcvt.s32.f32 %v970_v47  ;;  %v570_v33 = vunpack.c.3.s8 %v394_v13  ;;  %v450_v47 = vld [vmem:[%s3502_s18 + $0x220] sm:$0xff] }
 0x129   : >> { %2015 = vmatpush.bf16.msra.mxu0 %v1570_v23  ;;  %v1698_v34 = vpack.c.bf16 %v1354_v27, %v1346_v26  ;;  %v1074_v35 = vcvt.s32.f32 %v562_v24  ;;  %v690_v36 = vunpack.c.2.s8 %v426_v20  ;;  %v698_v37 = vunpack.c.3.s8 %v426_v20  ;;  %v482_v24 = vld [vmem:[%s3502_s18 + $0x320] sm:$0xff] }
 0x12a   : >> { %2028 = vmatpush.bf16.msra.mxu1 %v1634_v29  ;;  %v1762_v38 = vpack.c.bf16 %v1482_v32, %v1474_v31  ;;  %v1082_v39 = vcvt.s32.f32 %v570_v33  ;;  %v818_v40 = vunpack.c.2.s8 %v458_v28  ;;  %v826_v41 = vunpack.c.3.s8 %v458_v28 }
 0x12b   : >> { %2041 = vmatpush.bf16.msra.mxu2 %v1698_v34  ;;  %v1202_v44 = vcvt.s32.f32 %v690_v36  ;;  %v1210_v45 = vcvt.s32.f32 %v698_v37  ;;  %v946_v46 = vunpack.c.2.s8 %v490_v30  ;;  %v954_v43 = vunpack.c.3.s8 %v490_v30 }
 0x12c   : >> { %2054 = vmatpush.bf16.msra.mxu3 %v1762_v38  ;;  %v1562_v48 = vpack.c.bf16 %v1082_v39, %v1074_v35  ;;  %v1330_v49 = vcvt.s32.f32 %v818_v40  ;;  %v1338_v51 = vcvt.s32.f32 %v826_v41  ;;  %v546_v52 = vunpack.c.0.s8 %v394_v13 }
 0x12d   : >> { %v1626_v53 = vpack.c.bf16 %v1210_v45, %v1202_v44  ;;  %v1458_v50 = vcvt.s32.f32 %v946_v46  ;;  %v1466_v54 = vcvt.s32.f32 %v954_v43  ;;  %v554_v55 = vunpack.c.1.s8 %v394_v13  ;;  %v418_v13 = vld [vmem:[%s3502_s18 + $0x120] sm:$0xff] }
 0x12e   : >> { %2016 = vmatpush.bf16.msra.mxu0 %v1562_v48  ;;  %v1690_v57 = vpack.c.bf16 %v1338_v51, %v1330_v49  ;;  %v1058_v58 = vcvt.s32.f32 %v546_v52  ;;  %v674_v59 = vunpack.c.0.s8 %v426_v20  ;;  %v682_v56 = vunpack.c.1.s8 %v426_v20 }
 0x12f   : >> { %2029 = vmatpush.bf16.msra.mxu1 %v1626_v53  ;;  %v1754_v61 = vpack.c.bf16 %v1466_v54, %v1458_v50  ;;  %v1066_v63 = vcvt.s32.f32 %v554_v55  ;;  %v802_v62 = vunpack.c.0.s8 %v458_v28  ;;  %v810_v11 = vunpack.c.1.s8 %v458_v28  ;;  %v411_v54 = vld [vmem:[%s3502_s18 + $0xe8] sm:$0xff] }
 0x130   : >> { %2042 = vmatpush.bf16.msra.mxu2 %v1690_v57  ;;  %v1186_v12 = vcvt.s32.f32 %v674_v59  ;;  %v1194_v14 = vcvt.s32.f32 %v682_v56  ;;  %v930_v16 = vunpack.c.0.s8 %v490_v30  ;;  %v938_v42 = vunpack.c.1.s8 %v490_v30 }
 0x131   : >> { %2055 = vmatpush.bf16.msra.mxu3 %v1754_v61  ;;  %v1554_v17 = vpack.c.bf16 %v1066_v63, %v1058_v58  ;;  %v1314_v19 = vcvt.s32.f32 %v802_v62  ;;  %v1322_v18 = vcvt.s32.f32 %v810_v11  ;;  %v530_v22 = vunpack.c.2.s8 %v386_v60 }
 0x132   : >> { %v1618_v20 = vpack.c.bf16 %v1194_v14, %v1186_v12  ;;  %v1442_v23 = vcvt.s32.f32 %v930_v16  ;;  %v1450_v26 = vcvt.s32.f32 %v938_v42  ;;  %v538_v27 = vunpack.c.3.s8 %v386_v60  ;;  %v475_v42 = vld [vmem:[%s3502_s18 + $0x2e8] sm:$0xff] }
 0x133   : >> { %2017 = vmatpush.bf16.msra.mxu0 %v1554_v17  ;;  %v1682_v28 = vpack.c.bf16 %v1322_v18, %v1314_v19  ;;  %v1042_v29 = vcvt.s32.f32 %v530_v22  ;;  %v658_v31 = vunpack.c.2.s8 %v418_v13  ;;  %v666_v32 = vunpack.c.3.s8 %v418_v13  ;;  %v507_v22 = vld [vmem:[%s3502_s18 + $0x3e8] sm:$0xff] }
 0x134   : >> { %2030 = vmatpush.bf16.msra.mxu1 %v1618_v20  ;;  %v1746_v33 = vpack.c.bf16 %v1450_v26, %v1442_v23  ;;  %v1050_v30 = vcvt.s32.f32 %v538_v27  ;;  %v786_v34 = vunpack.c.2.s8 %v450_v47  ;;  %v794_v35 = vunpack.c.3.s8 %v450_v47 }
 0x135   : >> { %2043 = vmatpush.bf16.msra.mxu2 %v1682_v28  ;;  %v1170_v36 = vcvt.s32.f32 %v658_v31  ;;  %v1178_v37 = vcvt.s32.f32 %v666_v32  ;;  %v914_v38 = vunpack.c.2.s8 %v482_v24  ;;  %v922_v39 = vunpack.c.3.s8 %v482_v24 }
 0x136   : >> { %2056 = vmatpush.bf16.msra.mxu3 %v1746_v33  ;;  %v1546_v40 = vpack.c.bf16 %v1050_v30, %v1042_v29  ;;  %v1298_v41 = vcvt.s32.f32 %v786_v34  ;;  %v1306_v44 = vcvt.s32.f32 %v794_v35  ;;  %v514_v45 = vunpack.c.0.s8 %v386_v60 }
 0x137   : >> { %v1610_v46 = vpack.c.bf16 %v1178_v37, %v1170_v36  ;;  %v1426_v43 = vcvt.s32.f32 %v914_v38  ;;  %v1434_v48 = vcvt.s32.f32 %v922_v39  ;;  %v522_v49 = vunpack.c.1.s8 %v386_v60  ;;  %v443_v60 = vld [vmem:[%s3502_s18 + $0x1e8] sm:$0xff] }
 0x138   : >> { %2018 = vmatpush.bf16.msra.mxu0 %v1546_v40  ;;  %v1674_v51 = vpack.c.bf16 %v1306_v44, %v1298_v41  ;;  %v1026_v52 = vcvt.s32.f32 %v514_v45  ;;  %v642_v53 = vunpack.c.0.s8 %v418_v13  ;;  %v650_v50 = vunpack.c.1.s8 %v418_v13 }
 0x139   : >> { %2031 = vmatpush.bf16.msra.mxu1 %v1610_v46  ;;  %v1738_v55 = vpack.c.bf16 %v1434_v48, %v1426_v43  ;;  %v1034_v57 = vcvt.s32.f32 %v522_v49  ;;  %v770_v58 = vunpack.c.0.s8 %v450_v47  ;;  %v778_v59 = vunpack.c.1.s8 %v450_v47  ;;  %v403_v48 = vld [vmem:[%s3502_s18 + $0xa8] sm:$0xff] }
 0x13a   : >> { %2044 = vmatpush.bf16.msra.mxu2 %v1674_v51  ;;  %v1154_v56 = vcvt.s32.f32 %v642_v53  ;;  %v1162_v61 = vcvt.s32.f32 %v650_v50  ;;  %v898_v63 = vunpack.c.0.s8 %v482_v24  ;;  %v906_v62 = vunpack.c.1.s8 %v482_v24 }
 0x13b   : >> { %2057 = vmatpush.bf16.msra.mxu3 %v1738_v55  ;;  %v1538_v11 = vpack.c.bf16 %v1034_v57, %v1026_v52  ;;  %v1282_v12 = vcvt.s32.f32 %v770_v58  ;;  %v1290_v14 = vcvt.s32.f32 %v778_v59  ;;  %v627_v16 = vunpack.c.2.s8 %v411_v54  ;;  %v435_v58 = vld [vmem:[%s3502_s18 + $0x1a8] sm:$0xff] }
 0x13c   : >> { %v1602_v13 = vpack.c.bf16 %v1162_v61, %v1154_v56  ;;  %v1410_v17 = vcvt.s32.f32 %v898_v63  ;;  %v1418_v19 = vcvt.s32.f32 %v906_v62  ;;  %v635_v18 = vunpack.c.3.s8 %v411_v54  ;;  %v467_v62 = vld [vmem:[%s3502_s18 + $0x2a8] sm:$0xff] }
 0x13d   : >> { %2019 = vmatpush.bf16.msra.mxu0 %v1538_v11  ;;  %v1666_v47 = vpack.c.bf16 %v1290_v14, %v1282_v12  ;;  %v1139_v20 = vcvt.s32.f32 %v627_v16  ;;  %v755_v23 = vunpack.c.2.s8 %v443_v60  ;;  %v763_v26 = vunpack.c.3.s8 %v443_v60  ;;  %v499_v16 = vld [vmem:[%s3502_s18 + $0x3a8] sm:$0xff] }
 0x13e   : >> { %2032 = vmatpush.bf16.msra.mxu1 %v1602_v13  ;;  %v1730_v27 = vpack.c.bf16 %v1418_v19, %v1410_v17  ;;  %v1147_v24 = vcvt.s32.f32 %v635_v18  ;;  %v883_v28 = vunpack.c.2.s8 %v475_v42  ;;  %v891_v29 = vunpack.c.3.s8 %v475_v42 }
 0x13f   : >> { %2045 = vmatpush.bf16.msra.mxu2 %v1666_v47  ;;  %v1267_v31 = vcvt.s32.f32 %v755_v23  ;;  %v1275_v32 = vcvt.s32.f32 %v763_v26  ;;  %v1011_v33 = vunpack.c.2.s8 %v507_v22  ;;  %v1019_v30 = vunpack.c.3.s8 %v507_v22 }
 0x140   : >> { %2058 = vmatpush.bf16.msra.mxu3 %v1730_v27  ;;  %v1595_v34 = vpack.c.bf16 %v1147_v24, %v1139_v20  ;;  %v1395_v35 = vcvt.s32.f32 %v883_v28  ;;  %v1403_v36 = vcvt.s32.f32 %v891_v29  ;;  %v611_v37 = vunpack.c.0.s8 %v411_v54  ;;  %2020 = vmatmul.bf16.vlgmr.msra.gmra.mxu0 %v3596_v0 }
 0x141   : >> { %v1659_v38 = vpack.c.bf16 %v1275_v32, %v1267_v31  ;;  %v1523_v39 = vcvt.s32.f32 %v1011_v33  ;;  %v1531_v40 = vcvt.s32.f32 %v1019_v30  ;;  %v619_v41 = vunpack.c.1.s8 %v411_v54  ;;  %2033 = vmatmul.bf16.vlgmr.msra.gmra.mxu1 %v3599_v15 }
 0x142   : >> { %2064 = vmatpush.bf16.msrb.mxu0 %v1595_v34  ;;  %v1723_v44 = vpack.c.bf16 %v1403_v36, %v1395_v35  ;;  %v1123_v45 = vcvt.s32.f32 %v611_v37  ;;  %v739_v46 = vunpack.c.0.s8 %v443_v60  ;;  %v747_v43 = vunpack.c.1.s8 %v443_v60  ;;  %2046 = vmatmul.bf16.vlgmr.msra.gmra.mxu2 %v3603_v21 }
 0x143   : >> { %2077 = vmatpush.bf16.msrb.mxu1 %v1659_v38  ;;  %v1787_v49 = vpack.c.bf16 %v1531_v40, %v1523_v39  ;;  %v1131_v51 = vcvt.s32.f32 %v619_v41  ;;  %v867_v52 = vunpack.c.0.s8 %v475_v42  ;;  %v875_v53 = vunpack.c.1.s8 %v475_v42  ;;  %2059 = vmatmul.bf16.vlgmr.msra.gmra.mxu3 %v3606_v25  ;;  %v395_v40 = vld [vmem:[%s3502_s18 + $0x68] sm:$0xff] }
 0x144   : >> { %2090 = vmatpush.bf16.msrb.mxu2 %v1723_v44  ;;  %v1251_v50 = vcvt.s32.f32 %v739_v46  ;;  %v1259_v54 = vcvt.s32.f32 %v747_v43  ;;  %v995_v55 = vunpack.c.0.s8 %v507_v22  ;;  %v1003_v57 = vunpack.c.1.s8 %v507_v22 }
 0x145   : >> { %2103 = vmatpush.bf16.msrb.mxu3 %v1787_v49  ;;  %v1587_v59 = vpack.c.bf16 %v1131_v51, %v1123_v45  ;;  %v1379_v56 = vcvt.s32.f32 %v867_v52  ;;  %v1387_v61 = vcvt.s32.f32 %v875_v53  ;;  %v595_v63 = vunpack.c.2.s8 %v403_v48 }
 0x146   : >> { %v1651_v60 = vpack.c.bf16 %v1259_v54, %v1251_v50  ;;  %v1507_v11 = vcvt.s32.f32 %v995_v55  ;;  %v1515_v12 = vcvt.s32.f32 %v1003_v57  ;;  %v603_v14 = vunpack.c.3.s8 %v403_v48  ;;  %v459_v57 = vld [vmem:[%s3502_s18 + $0x268] sm:$0xff] }
 0x147   : >> { %2065 = vmatpush.bf16.msrb.mxu0 %v1587_v59  ;;  %v1715_v42 = vpack.c.bf16 %v1387_v61, %v1379_v56  ;;  %v1107_v13 = vcvt.s32.f32 %v595_v63  ;;  %v723_v17 = vunpack.c.2.s8 %v435_v58  ;;  %v731_v19 = vunpack.c.3.s8 %v435_v58  ;;  %v491_v63 = vld [vmem:[%s3502_s18 + $0x368] sm:$0xff] }
 0x148   : >> { %2078 = vmatpush.bf16.msrb.mxu1 %v1651_v60  ;;  %v1779_v18 = vpack.c.bf16 %v1515_v12, %v1507_v11  ;;  %v1115_v22 = vcvt.s32.f32 %v603_v14  ;;  %v851_v47 = vunpack.c.2.s8 %v467_v62  ;;  %v859_v20 = vunpack.c.3.s8 %v467_v62 }
 0x149   : >> { %2091 = vmatpush.bf16.msrb.mxu2 %v1715_v42  ;;  %v1235_v23 = vcvt.s32.f32 %v723_v17  ;;  %v1243_v26 = vcvt.s32.f32 %v731_v19  ;;  %v979_v27 = vunpack.c.2.s8 %v499_v16  ;;  %v987_v24 = vunpack.c.3.s8 %v499_v16  ;;  %v3636_v17 = vpop.f32.mrf.mxu0  ;;  %v3638_v19 = vpop.f32.mrf.mxu1 }
 0x14a   : >> { %2104 = vmatpush.bf16.msrb.mxu3 %v1779_v18  ;;  %v1579_v28 = vpack.c.bf16 %v1115_v22, %v1107_v13  ;;  %v1363_v29 = vcvt.s32.f32 %v851_v47  ;;  %v1371_v31 = vcvt.s32.f32 %v859_v20  ;;  %v579_v32 = vunpack.c.0.s8 %v403_v48 }
 0x14b   : >> { %v1643_v33 = vpack.c.bf16 %v1243_v26, %v1235_v23  ;;  %v1491_v30 = vcvt.s32.f32 %v979_v27  ;;  %v1499_v34 = vcvt.s32.f32 %v987_v24  ;;  %v587_v35 = vunpack.c.1.s8 %v403_v48  ;;  %v427_v48 = vld [vmem:[%s3502_s18 + $0x168] sm:$0xff]  ;;  %v3640_v23 = vpop.f32.mrf.mxu2  ;;  %v3642_v26 = vpop.f32.mrf.mxu3 }
 0x14c   : >> { %2066 = vmatpush.bf16.msrb.mxu0 %v1579_v28  ;;  %v1707_v36 = vpack.c.bf16 %v1371_v31, %v1363_v29  ;;  %v1091_v37 = vcvt.s32.f32 %v579_v32  ;;  %v707_v38 = vunpack.c.0.s8 %v435_v58  ;;  %v715_v39 = vunpack.c.1.s8 %v435_v58 }
 0x14d   : >> { %2079 = vmatpush.bf16.msrb.mxu1 %v1643_v33  ;;  %v1771_v41 = vpack.c.bf16 %v1499_v34, %v1491_v30  ;;  %v1099_v44 = vcvt.s32.f32 %v587_v35  ;;  %v835_v45 = vunpack.c.0.s8 %v467_v62  ;;  %v843_v46 = vunpack.c.1.s8 %v467_v62 }
 0x14e   : >> { %2092 = vmatpush.bf16.msrb.mxu2 %v1707_v36  ;;  %v1219_v43 = vcvt.s32.f32 %v707_v38  ;;  %v1227_v49 = vcvt.s32.f32 %v715_v39  ;;  %v963_v51 = vunpack.c.0.s8 %v499_v16  ;;  %v971_v52 = vunpack.c.1.s8 %v499_v16  ;;  %v387_v38 = vld [vmem:[%s3502_s18 + $0x28] sm:$0xff] }
 0x14f   : >> { %2105 = vmatpush.bf16.msrb.mxu3 %v1771_v41  ;;  %v1571_v53 = vpack.c.bf16 %v1099_v44, %v1091_v37  ;;  %v1347_v50 = vcvt.s32.f32 %v835_v45  ;;  %v1355_v54 = vcvt.s32.f32 %v843_v46  ;;  %v563_v55 = vunpack.c.2.s8 %v395_v40 }
 0x150   : >> { %v1635_v58 = vpack.c.bf16 %v1227_v49, %v1219_v43  ;;  %v1475_v59 = vcvt.s32.f32 %v963_v51  ;;  %v1483_v56 = vcvt.s32.f32 %v971_v52  ;;  %v571_v61 = vunpack.c.3.s8 %v395_v40 }
 0x151   : >> { %2067 = vmatpush.bf16.msrb.mxu0 %v1571_v53  ;;  %v1699_v62 = vpack.c.bf16 %v1355_v54, %v1347_v50  ;;  %v1075_v60 = vcvt.s32.f32 %v563_v55  ;;  %v691_v11 = vunpack.c.2.s8 %v427_v48  ;;  %v699_v12 = vunpack.c.3.s8 %v427_v48 }
 0x152   : >> { %2080 = vmatpush.bf16.msrb.mxu1 %v1635_v58  ;;  %v1763_v14 = vpack.c.bf16 %v1483_v56, %v1475_v59  ;;  %v1083_v16 = vcvt.s32.f32 %v571_v61  ;;  %v819_v42 = vunpack.c.2.s8 %v459_v57  ;;  %v827_v13 = vunpack.c.3.s8 %v459_v57  ;;  %v483_v61 = vld [vmem:[%s3502_s18 + $0x328] sm:$0xff] }
 0x153   : >> { %2093 = vmatpush.bf16.msrb.mxu2 %v1699_v62  ;;  %v1203_v18 = vcvt.s32.f32 %v691_v11  ;;  %v1211_v22 = vcvt.s32.f32 %v699_v12  ;;  %v947_v47 = vunpack.c.2.s8 %v491_v63  ;;  %v955_v20 = vunpack.c.3.s8 %v491_v63  ;;  %v1815_v62 = vpop.f32.mrf.mxu0 }
 0x154   : >> { %2106 = vmatpush.bf16.msrb.mxu3 %v1763_v14  ;;  %v1563_v27 = vpack.c.bf16 %v1083_v16, %v1075_v60  ;;  %v1331_v24 = vcvt.s32.f32 %v819_v42  ;;  %v1339_v28 = vcvt.s32.f32 %v827_v13  ;;  %v547_v29 = vunpack.c.0.s8 %v395_v40  ;;  %v1854_v16 = vpop.f32.mrf.mxu3 }
 0x155   : >> { %v1627_v31 = vpack.c.bf16 %v1211_v22, %v1203_v18  ;;  %v1459_v32 = vcvt.s32.f32 %v947_v47  ;;  %v1467_v33 = vcvt.s32.f32 %v955_v20  ;;  %v555_v30 = vunpack.c.1.s8 %v395_v40  ;;  %v419_v40 = vld [vmem:[%s3502_s18 + $0x128] sm:$0xff] }
 0x156   : >> { %2068 = vmatpush.bf16.msrb.mxu0 %v1563_v27  ;;  %v1691_v34 = vpack.c.bf16 %v1339_v28, %v1331_v24  ;;  %v1059_v35 = vcvt.s32.f32 %v547_v29  ;;  %v675_v36 = vunpack.c.0.s8 %v427_v48  ;;  %v683_v37 = vunpack.c.1.s8 %v427_v48  ;;  %v451_v48 = vld [vmem:[%s3502_s18 + $0x228] sm:$0xff] }
 0x157   : >> { %2081 = vmatpush.bf16.msrb.mxu1 %v1627_v31  ;;  %v1755_v39 = vpack.c.bf16 %v1467_v33, %v1459_v32  ;;  %v1067_v41 = vcvt.s32.f32 %v555_v30  ;;  %v803_v44 = vunpack.c.0.s8 %v459_v57  ;;  %v811_v45 = vunpack.c.1.s8 %v459_v57  ;;  %v1828_v57 = vpop.f32.mrf.mxu1 }
 0x158   : >> { %2094 = vmatpush.bf16.msrb.mxu2 %v1691_v34  ;;  %v1187_v46 = vcvt.s32.f32 %v675_v36  ;;  %v1195_v43 = vcvt.s32.f32 %v683_v37  ;;  %v931_v49 = vunpack.c.0.s8 %v491_v63  ;;  %v939_v51 = vunpack.c.1.s8 %v491_v63  ;;  %v1841_v63 = vpop.f32.mrf.mxu2 }
 0x159   : >> { %2107 = vmatpush.bf16.msrb.mxu3 %v1755_v39  ;;  %v1555_v52 = vpack.c.bf16 %v1067_v41, %v1059_v35  ;;  %v1315_v53 = vcvt.s32.f32 %v803_v44  ;;  %v1323_v50 = vcvt.s32.f32 %v811_v45  ;;  %v531_v54 = vunpack.c.2.s8 %v387_v38  ;;  %v412_v44 = vld [vmem:[%s3502_s18 + $0xf0] sm:$0xff] }
 0x15a   : >> { %v1619_v55 = vpack.c.bf16 %v1195_v43, %v1187_v46  ;;  %v1443_v58 = vcvt.s32.f32 %v931_v49  ;;  %v1451_v59 = vcvt.s32.f32 %v939_v51  ;;  %v539_v56 = vunpack.c.3.s8 %v387_v38 }
 0x15b   : >> { %2069 = vmatpush.bf16.msrb.mxu0 %v1555_v52  ;;  %v1683_v60 = vpack.c.bf16 %v1323_v50, %v1315_v53  ;;  %v1043_v11 = vcvt.s32.f32 %v531_v54  ;;  %v659_v12 = vunpack.c.2.s8 %v419_v40  ;;  %v667_v14 = vunpack.c.3.s8 %v419_v40 }
 0x15c   : >> { %2082 = vmatpush.bf16.msrb.mxu1 %v1619_v55  ;;  %v1747_v42 = vpack.c.bf16 %v1451_v59, %v1443_v58  ;;  %v1051_v13 = vcvt.s32.f32 %v539_v56  ;;  %v787_v18 = vunpack.c.2.s8 %v451_v48  ;;  %v795_v22 = vunpack.c.3.s8 %v451_v48 }
 0x15d   : >> { %2095 = vmatpush.bf16.msrb.mxu2 %v1683_v60  ;;  %v1171_v47 = vcvt.s32.f32 %v659_v12  ;;  %v1179_v20 = vcvt.s32.f32 %v667_v14  ;;  %v915_v27 = vunpack.c.2.s8 %v483_v61  ;;  %v923_v24 = vunpack.c.3.s8 %v483_v61 }
 0x15e   : >> { %2108 = vmatpush.bf16.msrb.mxu3 %v1747_v42  ;;  %v1547_v28 = vpack.c.bf16 %v1051_v13, %v1043_v11  ;;  %v1299_v29 = vcvt.s32.f32 %v787_v18  ;;  %v1307_v31 = vcvt.s32.f32 %v795_v22  ;;  %v515_v32 = vunpack.c.0.s8 %v387_v38  ;;  %v508_v11 = vld [vmem:[%s3502_s18 + $0x3f0] sm:$0xff] }
 0x15f   : >> { %v1611_v33 = vpack.c.bf16 %v1179_v20, %v1171_v47  ;;  %v1427_v30 = vcvt.s32.f32 %v915_v27  ;;  %v1435_v34 = vcvt.s32.f32 %v923_v24  ;;  %v523_v35 = vunpack.c.1.s8 %v387_v38  ;;  %v444_v38 = vld [vmem:[%s3502_s18 + $0x1f0] sm:$0xff] }
 0x160   : >> { %2070 = vmatpush.bf16.msrb.mxu0 %v1547_v28  ;;  %v1675_v36 = vpack.c.bf16 %v1307_v31, %v1299_v29  ;;  %v1027_v37 = vcvt.s32.f32 %v515_v32  ;;  %v643_v39 = vunpack.c.0.s8 %v419_v40  ;;  %v651_v41 = vunpack.c.1.s8 %v419_v40  ;;  %v476_v40 = vld [vmem:[%s3502_s18 + $0x2f0] sm:$0xff] }
 0x161   : >> { %2083 = vmatpush.bf16.msrb.mxu1 %v1611_v33  ;;  %v1739_v45 = vpack.c.bf16 %v1435_v34, %v1427_v30  ;;  %v1035_v46 = vcvt.s32.f32 %v523_v35  ;;  %v771_v43 = vunpack.c.0.s8 %v451_v48  ;;  %v779_v49 = vunpack.c.1.s8 %v451_v48 }
 0x162   : >> { %2096 = vmatpush.bf16.msrb.mxu2 %v1675_v36  ;;  %v1155_v51 = vcvt.s32.f32 %v643_v39  ;;  %v1163_v52 = vcvt.s32.f32 %v651_v41  ;;  %v899_v53 = vunpack.c.0.s8 %v483_v61  ;;  %v907_v50 = vunpack.c.1.s8 %v483_v61 }
 0x163   : >> { %2109 = vmatpush.bf16.msrb.mxu3 %v1739_v45  ;;  %v1539_v54 = vpack.c.bf16 %v1035_v46, %v1027_v37  ;;  %v1283_v55 = vcvt.s32.f32 %v771_v43  ;;  %v1291_v58 = vcvt.s32.f32 %v779_v49  ;;  %v628_v59 = vunpack.c.2.s8 %v412_v44  ;;  %v404_v49 = vld [vmem:[%s3502_s18 + $0xb0] sm:$0xff] }
 0x164   : >> { %v1603_v56 = vpack.c.bf16 %v1163_v52, %v1155_v51  ;;  %v1411_v62 = vcvt.s32.f32 %v899_v53  ;;  %v1419_v57 = vcvt.s32.f32 %v907_v50  ;;  %v636_v60 = vunpack.c.3.s8 %v412_v44  ;;  %v436_v50 = vld [vmem:[%s3502_s18 + $0x1b0] sm:$0xff] }
 0x165   : >> { %2071 = vmatpush.bf16.msrb.mxu0 %v1539_v54  ;;  %v1667_v48 = vpack.c.bf16 %v1291_v58, %v1283_v55  ;;  %v1140_v12 = vcvt.s32.f32 %v628_v59  ;;  %v756_v14 = vunpack.c.2.s8 %v444_v38  ;;  %v764_v63 = vunpack.c.3.s8 %v444_v38 }
 0x166   : >> { %2084 = vmatpush.bf16.msrb.mxu1 %v1603_v56  ;;  %v1731_v16 = vpack.c.bf16 %v1419_v57, %v1411_v62  ;;  %v1148_v61 = vcvt.s32.f32 %v636_v60  ;;  %v884_v42 = vunpack.c.2.s8 %v476_v40  ;;  %v892_v13 = vunpack.c.3.s8 %v476_v40  ;;  %v500_v56 = vld [vmem:[%s3502_s18 + $0x3b0] sm:$0xff] }
 0x167   : >> { %2097 = vmatpush.bf16.msrb.mxu2 %v1667_v48  ;;  %v1268_v18 = vcvt.s32.f32 %v756_v14  ;;  %v1276_v22 = vcvt.s32.f32 %v764_v63  ;;  %v1012_v47 = vunpack.c.2.s8 %v508_v11  ;;  %v1020_v20 = vunpack.c.3.s8 %v508_v11 }
 0x168   : >> { %2110 = vmatpush.bf16.msrb.mxu3 %v1731_v16  ;;  %v1596_v27 = vpack.c.bf16 %v1148_v61, %v1140_v12  ;;  %v1396_v24 = vcvt.s32.f32 %v884_v42  ;;  %v1404_v28 = vcvt.s32.f32 %v892_v13  ;;  %v612_v29 = vunpack.c.0.s8 %v412_v44  ;;  %2072 = vmatmul.bf16.vlgmr.msrb.gmra.mxu0 %v3596_v0 }
 0x169   : >> { %v1660_v31 = vpack.c.bf16 %v1276_v22, %v1268_v18  ;;  %v1524_v32 = vcvt.s32.f32 %v1012_v47  ;;  %v1532_v33 = vcvt.s32.f32 %v1020_v20  ;;  %v620_v30 = vunpack.c.1.s8 %v412_v44  ;;  %2085 = vmatmul.bf16.vlgmr.msrb.gmra.mxu1 %v3599_v15 }
 0x16a   : >> { %2116 = vmatpush.bf16.msra.mxu0 %v1596_v27  ;;  %v1724_v34 = vpack.c.bf16 %v1404_v28, %v1396_v24  ;;  %v1124_v35 = vcvt.s32.f32 %v612_v29  ;;  %v740_v36 = vunpack.c.0.s8 %v444_v38  ;;  %v748_v37 = vunpack.c.1.s8 %v444_v38  ;;  %2098 = vmatmul.bf16.vlgmr.msrb.gmra.mxu2 %v3603_v21 }
 0x16b   : >> { %2129 = vmatpush.bf16.msra.mxu1 %v1660_v31  ;;  %v1788_v39 = vpack.c.bf16 %v1532_v33, %v1524_v32  ;;  %v1132_v41 = vcvt.s32.f32 %v620_v30  ;;  %v868_v45 = vunpack.c.0.s8 %v476_v40  ;;  %v876_v0 = vunpack.c.1.s8 %v476_v40  ;;  %2111 = vmatmul.bf16.vlgmr.msrb.gmra.mxu3 %v3606_v25  ;;  %v468_v25 = vld [vmem:[%s3502_s18 + $0x2b0] sm:$0xff] }
 0x16c   : >> { %2142 = vmatpush.bf16.msra.mxu2 %v1724_v34  ;;  %v1252_v44 = vcvt.s32.f32 %v740_v36  ;;  %v1260_v15 = vcvt.s32.f32 %v748_v37  ;;  %v996_v46 = vunpack.c.0.s8 %v508_v11  ;;  %v1004_v43 = vunpack.c.1.s8 %v508_v11  ;;  %v396_v30 = vld [vmem:[%s3502_s18 + $0x70] sm:$0xff] }
 0x16d   : >> { %2155 = vmatpush.bf16.msra.mxu3 %v1788_v39  ;;  %v1588_v51 = vpack.c.bf16 %v1132_v41, %v1124_v35  ;;  %v1380_v52 = vcvt.s32.f32 %v868_v45  ;;  %v1388_v21 = vcvt.s32.f32 %v876_v0  ;;  %v1827_v53 = vadd.f32 %v3638_v19, %v3636_v17  ;;  %v428_v39 = vld [vmem:[%s3502_s18 + $0x170] sm:$0xff] }
 0x16e   : >> { %v1652_v38 = vpack.c.bf16 %v1260_v15, %v1252_v44  ;;  %v1508_v54 = vcvt.s32.f32 %v996_v46  ;;  %v1516_v55 = vcvt.s32.f32 %v1004_v43  ;;  %v596_v40 = vunpack.c.2.s8 %v404_v49  ;;  %v460_v15 = vld [vmem:[%s3502_s18 + $0x270] sm:$0xff] }
 0x16f   : >> { %2117 = vmatpush.bf16.msra.mxu0 %v1588_v51  ;;  %v1716_v58 = vpack.c.bf16 %v1388_v21, %v1380_v52  ;;  %v1840_v59 = vadd.f32 %v3640_v23, %v1827_v53  ;;  %v604_v57 = vunpack.c.3.s8 %v404_v49  ;;  %v724_v60 = vunpack.c.2.s8 %v436_v50  ;;  %v492_v52 = vld [vmem:[%s3502_s18 + $0x370] sm:$0xff] }
 0x170   : >> { %2130 = vmatpush.bf16.msra.mxu1 %v1652_v38  ;;  %v1780_v62 = vpack.c.bf16 %v1516_v55, %v1508_v54  ;;  %v732_v11 = vunpack.c.3.s8 %v436_v50  ;;  %v1108_v17 = vcvt.s32.f32 %v596_v40  ;;  %v852_v19 = vunpack.c.2.s8 %v468_v25 }
 0x171   : >> { %2143 = vmatpush.bf16.msra.mxu2 %v1716_v58  ;;  %v1853_v48 = vadd.f32 %v3642_v26, %v1840_v59  ;;  %v860_v12 = vunpack.c.3.s8 %v468_v25  ;;  %v1116_v14 = vcvt.s32.f32 %v604_v57  ;;  %v1236_v63 = vcvt.s32.f32 %v724_v60  ;;  %v3671_v57 = vpop.f32.mrf.mxu0  ;;  %v3673_v60 = vpop.f32.mrf.mxu1 }
 0x172   : >> { %2156 = vmatpush.bf16.msra.mxu3 %v1780_v62  ;;  %v1244_v16 = vcvt.s32.f32 %v732_v11  ;;  %v980_v61 = vunpack.c.2.s8 %v500_v56  ;;  %v1364_v42 = vcvt.s32.f32 %v852_v19  ;;  %v988_v18 = vunpack.c.3.s8 %v500_v56 }
 0x173   : >> { %v3665_v10 = vadd.f32 %v3172_v10, %v1853_v48   ;;  %v1372_v13 = vcvt.s32.f32 %v860_v12  ;;  %v1580_v22 = vpack.c.bf16 %v1116_v14, %v1108_v17  ;;  %v580_v27 = vunpack.c.0.s8 %v404_v49  ;;  %v3675_v12 = vpop.f32.mrf.mxu2  ;;  %v3677_v14 = vpop.f32.mrf.mxu3 }
 0x174   : >> { %v1644_v47 = vpack.c.bf16 %v1244_v16, %v1236_v63  ;;  %v1492_v20 = vcvt.s32.f32 %v980_v61  ;;  %v1500_v24 = vcvt.s32.f32 %v988_v18  ;;  %v588_v28 = vunpack.c.1.s8 %v404_v49 }
 0x175   : >> { %v3917_v23 = vmov %v3665_v10  ;;  %v1708_v26 = vpack.c.bf16 %v1372_v13, %v1364_v42  ;;  %v708_v29 = vunpack.c.0.s8 %v436_v50  ;;  %2118 = vmatpush.bf16.msra.mxu0 %v1580_v22  ;;  %v1092_v31 = vcvt.s32.f32 %v580_v27 }
 0x176   : >> { %2131 = vmatpush.bf16.msra.mxu1 %v1644_v47  ;;  %v716_v32 = vunpack.c.1.s8 %v436_v50  ;;  %v836_v33 = vunpack.c.0.s8 %v468_v25  ;;  %v844_v10 = vunpack.c.1.s8 %v468_v25  ;;  %v1772_v34 = vpack.c.bf16 %v1500_v24, %v1492_v20 }
 0x177   : >> { %2144 = vmatpush.bf16.msra.mxu2 %v1708_v26  ;;  %v1100_v35 = vcvt.s32.f32 %v588_v28  ;;  %v1220_v36 = vcvt.s32.f32 %v708_v29  ;;  %v964_v37 = vunpack.c.0.s8 %v500_v56  ;;  %v972_v44 = vunpack.c.1.s8 %v500_v56  ;;  %v388_v28 = vld [vmem:[%s3502_s18 + $0x30] sm:$0xff] }
 0x178   : >> { %v1228_v41 = vcvt.s32.f32 %v716_v32  ;;  %v1348_v45 = vcvt.s32.f32 %v836_v33  ;;  %v1356_v0 = vcvt.s32.f32 %v844_v10  ;;  %2157 = vmatpush.bf16.msra.mxu3 %v1772_v34  ;;  %v564_v49 = vunpack.c.2.s8 %v396_v30  ;;  %v420_v10 = vld [vmem:[%s3502_s18 + $0x130] sm:$0xff] }
 0x179   : >> { %v1572_v46 = vpack.c.bf16 %v1100_v35, %v1092_v31  ;;  %v1476_v43 = vcvt.s32.f32 %v964_v37  ;;  %v572_v51 = vunpack.c.3.s8 %v396_v30  ;;  %v1484_v50 = vcvt.s32.f32 %v972_v44  ;;  %v452_v37 = vld [vmem:[%s3502_s18 + $0x230] sm:$0xff] }
 0x17a   : >> { %v1636_v21 = vpack.c.bf16 %v1228_v41, %v1220_v36  ;;  %v1700_v53 = vpack.c.bf16 %v1356_v0, %v1348_v45  ;;  %v692_v38 = vunpack.c.2.s8 %v428_v39  ;;  %v1076_v54 = vcvt.s32.f32 %v564_v49 }
 0x17b   : >> { %2119 = vmatpush.bf16.msra.mxu0 %v1572_v46  ;;  %v1084_v55 = vcvt.s32.f32 %v572_v51  ;;  %v700_v25 = vunpack.c.3.s8 %v428_v39  ;;  %v820_v58 = vunpack.c.2.s8 %v460_v15  ;;  %v1764_v59 = vpack.c.bf16 %v1484_v50, %v1476_v43  ;;  %v484_v51 = vld [vmem:[%s3502_s18 + $0x330] sm:$0xff] }
 0x17c   : >> { %2132 = vmatpush.bf16.msra.mxu1 %v1636_v21  ;;  %2145 = vmatpush.bf16.msra.mxu2 %v1700_v53  ;;  %v1204_v40 = vcvt.s32.f32 %v692_v38  ;;  %v828_v56 = vunpack.c.3.s8 %v460_v15  ;;  %v948_v62 = vunpack.c.2.s8 %v492_v52  ;;  %v956_v19 = vunpack.c.3.s8 %v492_v52  ;;  %v1880_v21 = vpop.f32.mrf.mxu1 }
 0x17d   : >> { %v1564_v11 = vpack.c.bf16 %v1084_v55, %v1076_v54  ;;  %v1212_v48 = vcvt.s32.f32 %v700_v25  ;;  %v1332_v17 = vcvt.s32.f32 %v820_v58  ;;  %2158 = vmatpush.bf16.msra.mxu3 %v1764_v59  ;;  %v548_v61 = vunpack.c.0.s8 %v396_v30  ;;  %v1906_v55 = vpop.f32.mrf.mxu3 }
 0x17e   : >> { %v1340_v63 = vcvt.s32.f32 %v828_v56  ;;  %v1460_v16 = vcvt.s32.f32 %v948_v62  ;;  %v556_v42 = vunpack.c.1.s8 %v396_v30  ;;  %v1468_v18 = vcvt.s32.f32 %v956_v19 }
 0x17f   : >> { %2120 = vmatpush.bf16.msra.mxu0 %v1564_v11  ;;  %v1628_v13 = vpack.c.bf16 %v1212_v48, %v1204_v40  ;;  %v676_v22 = vunpack.c.0.s8 %v428_v39  ;;  %v684_v47 = vunpack.c.1.s8 %v428_v39  ;;  %v1060_v27 = vcvt.s32.f32 %v548_v61 }
 0x180   : >> { %v1692_v20 = vpack.c.bf16 %v1340_v63, %v1332_v17  ;;  %v1068_v26 = vcvt.s32.f32 %v556_v42  ;;  %v804_v24 = vunpack.c.0.s8 %v460_v15  ;;  %v1756_v29 = vpack.c.bf16 %v1468_v18, %v1460_v16 }
 0x181   : >> { %2133 = vmatpush.bf16.msra.mxu1 %v1628_v13  ;;  %v1188_v31 = vcvt.s32.f32 %v676_v22  ;;  %v1196_v32 = vcvt.s32.f32 %v684_v47  ;;  %v812_v33 = vunpack.c.1.s8 %v460_v15  ;;  %v932_v35 = vunpack.c.0.s8 %v492_v52  ;;  %v1867_v15 = vpop.f32.mrf.mxu0 }
 0x182   : >> { %2146 = vmatpush.bf16.msra.mxu2 %v1692_v20  ;;  %v1556_v30 = vpack.c.bf16 %v1068_v26, %v1060_v27  ;;  %v1316_v34 = vcvt.s32.f32 %v804_v24  ;;  %v940_v36 = vunpack.c.1.s8 %v492_v52  ;;  %2159 = vmatpush.bf16.msra.mxu3 %v1756_v29  ;;  %v532_v45 = vunpack.c.2.s8 %v388_v28  ;;  %v1893_v52 = vpop.f32.mrf.mxu2  ;;  %v413_v26 = vld [vmem:[%s3502_s18 + $0xf8] sm:$0xff] }
 0x183   : >> { %v1620_v39 = vpack.c.bf16 %v1196_v32, %v1188_v31  ;;  %v1324_v41 = vcvt.s32.f32 %v812_v33  ;;  %v540_v0 = vunpack.c.3.s8 %v388_v28  ;;  %v1444_v44 = vcvt.s32.f32 %v932_v35  ;;  %v445_v33 = vld [vmem:[%s3502_s18 + $0x1f8] sm:$0xff] }
 0x184   : >> { %2121 = vmatpush.bf16.msra.mxu0 %v1556_v30  ;;  %v1452_v46 = vcvt.s32.f32 %v940_v36  ;;  %v660_v43 = vunpack.c.2.s8 %v420_v10  ;;  %v668_v49 = vunpack.c.3.s8 %v420_v10  ;;  %v1044_v50 = vcvt.s32.f32 %v532_v45  ;;  %v477_v36 = vld [vmem:[%s3502_s18 + $0x2f8] sm:$0xff] }
 0x185   : >> { %2134 = vmatpush.bf16.msra.mxu1 %v1620_v39  ;;  %v1684_v53 = vpack.c.bf16 %v1324_v41, %v1316_v34  ;;  %v1052_v38 = vcvt.s32.f32 %v540_v0  ;;  %v788_v54 = vunpack.c.2.s8 %v452_v37  ;;  %v796_v40 = vunpack.c.3.s8 %v452_v37 }
 0x186   : >> { %v1748_v25 = vpack.c.bf16 %v1452_v46, %v1444_v44  ;;  %v1172_v58 = vcvt.s32.f32 %v660_v43  ;;  %v1180_v59 = vcvt.s32.f32 %v668_v49  ;;  %v916_v11 = vunpack.c.2.s8 %v484_v51  ;;  %v509_v49 = vld [vmem:[%s3502_s18 + $0x3f8] sm:$0xff] }
 0x187   : >> { %2147 = vmatpush.bf16.msra.mxu2 %v1684_v53  ;;  %v1548_v56 = vpack.c.bf16 %v1052_v38, %v1044_v50  ;;  %v1300_v62 = vcvt.s32.f32 %v788_v54  ;;  %v924_v48 = vunpack.c.3.s8 %v484_v51  ;;  %v1308_v19 = vcvt.s32.f32 %v796_v40 }
 0x188   : >> { %2160 = vmatpush.bf16.msra.mxu3 %v1748_v25  ;;  %v1612_v17 = vpack.c.bf16 %v1180_v59, %v1172_v58  ;;  %v516_v63 = vunpack.c.0.s8 %v388_v28  ;;  %v524_v16 = vunpack.c.1.s8 %v388_v28  ;;  %v1428_v61 = vcvt.s32.f32 %v916_v11  ;;  %v3687_v59 = vld [vmem:[#allocation1] sm:$0xff] }
 0x189   : >> { %2122 = vmatpush.bf16.msra.mxu0 %v1548_v56  ;;  %v1436_v42 = vcvt.s32.f32 %v924_v48  ;;  %v644_v13 = vunpack.c.0.s8 %v420_v10  ;;  %v652_v18 = vunpack.c.1.s8 %v420_v10  ;;  %v1676_v22 = vpack.c.bf16 %v1308_v19, %v1300_v62  ;;  %v3690_v48 = vld [vmem:[#allocation1 + $0x9] sm:$0xff] }
 0x18a   : >> { %2135 = vmatpush.bf16.msra.mxu1 %v1612_v17  ;;  %v1028_v47 = vcvt.s32.f32 %v516_v63  ;;  %v1036_v20 = vcvt.s32.f32 %v524_v16  ;;  %v772_v27 = vunpack.c.0.s8 %v452_v37  ;;  %v780_v32 = vunpack.c.1.s8 %v452_v37 }
 0x18b   : >> { %v1740_v24 = vpack.c.bf16 %v1436_v42, %v1428_v61  ;;  %v1156_v29 = vcvt.s32.f32 %v644_v13  ;;  %v1164_v31 = vcvt.s32.f32 %v652_v18  ;;  %2148 = vmatpush.bf16.msra.mxu2 %v1676_v22  ;;  %v900_v34 = vunpack.c.0.s8 %v484_v51  ;;  %v3693_v22 = vld [vmem:[#allocation1 + $0x12] sm:$0xff] }
 0x18c   : >> { %v1540_v28 = vpack.c.bf16 %v1036_v20, %v1028_v47  ;;  %v1284_v30 = vcvt.s32.f32 %v772_v27  ;;  %v908_v35 = vunpack.c.1.s8 %v484_v51  ;;  %v1292_v39 = vcvt.s32.f32 %v780_v32 }
 0x18d   : >> { %2161 = vmatpush.bf16.msra.mxu3 %v1740_v24  ;;  %v1604_v10 = vpack.c.bf16 %v1164_v31, %v1156_v29  ;;  %v629_v41 = vunpack.c.2.s8 %v413_v26  ;;  %v637_v45 = vunpack.c.3.s8 %v413_v26  ;;  %v1412_v0 = vcvt.s32.f32 %v900_v34  ;;  %v3696_v24 = vld [vmem:[#allocation1 + $0x1b] sm:$0xff] }
 0x18e   : >> { %2123 = vmatpush.bf16.msra.mxu0 %v1540_v28  ;;  %v1420_v44 = vcvt.s32.f32 %v908_v35  ;;  %v757_v46 = vunpack.c.2.s8 %v445_v33  ;;  %v765_v43 = vunpack.c.3.s8 %v445_v33  ;;  %v1668_v37 = vpack.c.bf16 %v1292_v39, %v1284_v30  ;;  %v405_v29 = vld [vmem:[%s3502_s18 + $0xb8] sm:$0xff] }
 0x18f   : >> { %2136 = vmatpush.bf16.msra.mxu1 %v1604_v10  ;;  %v1141_v15 = vcvt.s32.f32 %v629_v41  ;;  %v1149_v21 = vcvt.s32.f32 %v637_v45  ;;  %v885_v53 = vunpack.c.2.s8 %v477_v36  ;;  %v893_v54 = vunpack.c.3.s8 %v477_v36  ;;  %v437_v30 = vld [vmem:[%s3502_s18 + $0x1b8] sm:$0xff] }
 0x190   : >> { %v1732_v50 = vpack.c.bf16 %v1420_v44, %v1412_v0  ;;  %v1269_v38 = vcvt.s32.f32 %v757_v46  ;;  %v1277_v51 = vcvt.s32.f32 %v765_v43  ;;  %2149 = vmatpush.bf16.msra.mxu2 %v1668_v37  ;;  %v1013_v25 = vunpack.c.2.s8 %v509_v49  ;;  %v469_v39 = vld [vmem:[%s3502_s18 + $0x2b8] sm:$0xff] }
 0x191   : >> { %v1597_v52 = vpack.c.bf16 %v1149_v21, %v1141_v15  ;;  %v1397_v55 = vcvt.s32.f32 %v885_v53  ;;  %v1021_v58 = vunpack.c.3.s8 %v509_v49  ;;  %2124 = vmatmul.bf16.vlgmr.msra.gmra.mxu0 %v3687_v59  ;;  %v1405_v56 = vcvt.s32.f32 %v893_v54 }
 0x192   : >> { %2162 = vmatpush.bf16.msra.mxu3 %v1732_v50  ;;  %v1661_v40 = vpack.c.bf16 %v1277_v51, %v1269_v38  ;;  %v613_v62 = vunpack.c.0.s8 %v413_v26  ;;  %v621_v11 = vunpack.c.1.s8 %v413_v26  ;;  %2137 = vmatmul.bf16.vlgmr.msra.gmra.mxu1 %v3690_v48  ;;  %v1525_v17 = vcvt.s32.f32 %v1013_v25 }
 0x193   : >> { %2168 = vmatpush.bf16.msrb.mxu0 %v1597_v52  ;;  %v1533_v19 = vcvt.s32.f32 %v1021_v58  ;;  %v741_v63 = vunpack.c.0.s8 %v445_v33  ;;  %v749_v16 = vunpack.c.1.s8 %v445_v33  ;;  %v1725_v61 = vpack.c.bf16 %v1405_v56, %v1397_v55  ;;  %2150 = vmatmul.bf16.vlgmr.msra.gmra.mxu2 %v3693_v22 }
 0x194   : >> { %2181 = vmatpush.bf16.msrb.mxu1 %v1661_v40  ;;  %v1125_v42 = vcvt.s32.f32 %v613_v62  ;;  %v1133_v13 = vcvt.s32.f32 %v621_v11  ;;  %v869_v18 = vunpack.c.0.s8 %v477_v36  ;;  %v877_v26 = vunpack.c.1.s8 %v477_v36 }
 0x195   : >> { %v1789_v47 = vpack.c.bf16 %v1533_v19, %v1525_v17  ;;  %v1253_v20 = vcvt.s32.f32 %v741_v63  ;;  %v1261_v27 = vcvt.s32.f32 %v749_v16  ;;  %2163 = vmatmul.bf16.vlgmr.msra.gmra.mxu3 %v3696_v24  ;;  %2194 = vmatpush.bf16.msrb.mxu2 %v1725_v61  ;;  %v997_v33 = vunpack.c.0.s8 %v509_v49  ;;  %v3712_v19 = vpop.f32.mrf.mxu1 }
 0x196   : >> { %v1589_v31 = vpack.c.bf16 %v1133_v13, %v1125_v42  ;;  %v1381_v32 = vcvt.s32.f32 %v869_v18  ;;  %v1005_v28 = vunpack.c.1.s8 %v509_v49  ;;  %v1389_v35 = vcvt.s32.f32 %v877_v26  ;;  %v501_v49 = vld [vmem:[%s3502_s18 + $0x3b8] sm:$0xff]  ;;  %v3715_v18 = vpop.f32.mrf.mxu2 }
 0x197   : >> { %2207 = vmatpush.bf16.msrb.mxu3 %v1789_v47  ;;  %v1653_v34 = vpack.c.bf16 %v1261_v27, %v1253_v20  ;;  %v1879_v10 = vadd.f32 %v3673_v60, %v3671_v57  ;;  %v1509_v36 = vcvt.s32.f32 %v997_v33  ;;  %v597_v45 = vunpack.c.2.s8 %v405_v29  ;;  %v397_v13 = vld [vmem:[%s3502_s18 + $0x78] sm:$0xff] }
 0x198   : >> { %2169 = vmatpush.bf16.msrb.mxu0 %v1589_v31  ;;  %v1517_v41 = vcvt.s32.f32 %v1005_v28  ;;  %v1717_v0 = vpack.c.bf16 %v1389_v35, %v1381_v32  ;;  %v605_v46 = vunpack.c.3.s8 %v405_v29  ;;  %v725_v43 = vunpack.c.2.s8 %v437_v30  ;;  %v429_v28 = vld [vmem:[%s3502_s18 + $0x178] sm:$0xff] }
 0x199   : >> { %2182 = vmatpush.bf16.msrb.mxu1 %v1653_v34  ;;  %v1892_v44 = vadd.f32 %v3675_v12, %v1879_v10  ;;  %v1109_v15 = vcvt.s32.f32 %v597_v45  ;;  %v733_v21 = vunpack.c.3.s8 %v437_v30  ;;  %v853_v53 = vunpack.c.2.s8 %v469_v39 }
 0x19a   : >> { %v1781_v37 = vpack.c.bf16 %v1517_v41, %v1509_v36  ;;  %2195 = vmatpush.bf16.msrb.mxu2 %v1717_v0  ;;  %v1117_v57 = vcvt.s32.f32 %v605_v46  ;;  %v1237_v60 = vcvt.s32.f32 %v725_v43  ;;  %v861_v38 = vunpack.c.3.s8 %v469_v39  ;;  %v461_v36 = vld [vmem:[%s3502_s18 + $0x278] sm:$0xff] }
 0x19b   : >> { %v1905_v50 = vadd.f32 %v3677_v14, %v1892_v44  ;;  %v1245_v51 = vcvt.s32.f32 %v733_v21  ;;  %v1365_v54 = vcvt.s32.f32 %v853_v53  ;;  %v981_v52 = vunpack.c.2.s8 %v501_v49  ;;  %v3710_v14 = vpop.f32.mrf.mxu0  ;;  %v493_v46 = vld [vmem:[%s3502_s18 + $0x378] sm:$0xff] }
 0x19c   : >> { %2208 = vmatpush.bf16.msrb.mxu3 %v1781_v37  ;;  %v989_v55 = vunpack.c.3.s8 %v501_v49  ;;  %v1581_v25 = vpack.c.bf16 %v1117_v57, %v1109_v15  ;;  %v1373_v58 = vcvt.s32.f32 %v861_v38  ;;  %v581_v40 = vunpack.c.0.s8 %v405_v29 }
 0x19d   : >> { %v3708_v9 = vadd.f32 %v3168_v9, %v1905_v50   ;;  %v1645_v56 = vpack.c.bf16 %v1245_v51, %v1237_v60  ;;  %v1493_v62 = vcvt.s32.f32 %v981_v52  ;;  %v589_v17 = vunpack.c.1.s8 %v405_v29  ;;  %v1932_v52 = vpop.f32.mrf.mxu1 }
 0x19e   : >> { %v1501_v11 = vcvt.s32.f32 %v989_v55  ;;  %2170 = vmatpush.bf16.msrb.mxu0 %v1581_v25  ;;  %v1709_v63 = vpack.c.bf16 %v1373_v58, %v1365_v54  ;;  %v1093_v16 = vcvt.s32.f32 %v581_v40  ;;  %v709_v61 = vunpack.c.0.s8 %v437_v30 }
 0x19f   : >> { %v3918_v12 = vmov %v3708_v9  ;;  %v717_v42 = vunpack.c.1.s8 %v437_v30  ;;  %v3717_v9 = vpop.f32.mrf.mxu3  ;;  %2183 = vmatpush.bf16.msrb.mxu1 %v1645_v56  ;;  %v1101_v20 = vcvt.s32.f32 %v589_v17  ;;  %v837_v27 = vunpack.c.0.s8 %v469_v39  ;;  %v1945_v56 = vpop.f32.mrf.mxu2 }
 0x1a0   : >> { %v1773_v47 = vpack.c.bf16 %v1501_v11, %v1493_v62  ;;  %v845_v26 = vunpack.c.1.s8 %v469_v39  ;;  %2196 = vmatpush.bf16.msrb.mxu2 %v1709_v63  ;;  %v1221_v29 = vcvt.s32.f32 %v709_v61  ;;  %v965_v32 = vunpack.c.0.s8 %v501_v49 }
 0x1a1   : >> { %v1229_v31 = vcvt.s32.f32 %v717_v42  ;;  %v973_v33 = vunpack.c.1.s8 %v501_v49  ;;  %v1573_v30 = vpack.c.bf16 %v1101_v20, %v1093_v16  ;;  %v1349_v34 = vcvt.s32.f32 %v837_v27  ;;  %v389_v27 = vld [vmem:[%s3502_s18 + $0x38] sm:$0xff] }
 0x1a2   : >> { %2209 = vmatpush.bf16.msrb.mxu3 %v1773_v47  ;;  %v1357_v35 = vcvt.s32.f32 %v845_v26  ;;  %v565_v10 = vunpack.c.2.s8 %v397_v13  ;;  %v1477_v45 = vcvt.s32.f32 %v965_v32  ;;  %v573_v44 = vunpack.c.3.s8 %v397_v13 }
 0x1a3   : >> { %v1637_v41 = vpack.c.bf16 %v1229_v31, %v1221_v29  ;;  %v1485_v0 = vcvt.s32.f32 %v973_v33  ;;  %2171 = vmatpush.bf16.msrb.mxu0 %v1573_v30  ;;  %v693_v37 = vunpack.c.2.s8 %v429_v28  ;;  %v701_v15 = vunpack.c.3.s8 %v429_v28  ;;  %v1919_v54 = vpop.f32.mrf.mxu0 }
 0x1a4   : >> { %v1701_v39 = vpack.c.bf16 %v1357_v35, %v1349_v34  ;;  %v1077_v43 = vcvt.s32.f32 %v565_v10  ;;  %v1085_v49 = vcvt.s32.f32 %v573_v44  ;;  %v821_v53 = vunpack.c.2.s8 %v461_v36 }
 0x1a5   : >> { %2184 = vmatpush.bf16.msrb.mxu1 %v1637_v41  ;;  %v1765_v21 = vpack.c.bf16 %v1485_v0, %v1477_v45  ;;  %v829_v50 = vunpack.c.3.s8 %v461_v36  ;;  %v1205_v57 = vcvt.s32.f32 %v693_v37  ;;  %v1213_v60 = vcvt.s32.f32 %v701_v15  ;;  %v485_v15 = vld [vmem:[%s3502_s18 + $0x338] sm:$0xff] }
 0x1a6   : >> { %2197 = vmatpush.bf16.msrb.mxu2 %v1701_v39  ;;  %v949_v38 = vunpack.c.2.s8 %v493_v46  ;;  %v957_v51 = vunpack.c.3.s8 %v493_v46  ;;  %v1565_v55 = vpack.c.bf16 %v1085_v49, %v1077_v43  ;;  %v1333_v25 = vcvt.s32.f32 %v821_v53 }
 0x1a7   : >> { %2210 = vmatpush.bf16.msrb.mxu3 %v1765_v21  ;;  %v1341_v58 = vcvt.s32.f32 %v829_v50  ;;  %v549_v40 = vunpack.c.0.s8 %v397_v13  ;;  %v1958_v62 = vpop.f32.mrf.mxu3  ;;  %v1629_v11 = vpack.c.bf16 %v1213_v60, %v1205_v57  ;;  %v557_v16 = vunpack.c.1.s8 %v397_v13  ;;  %v421_v13 = vld [vmem:[%s3502_s18 + $0x138] sm:$0xff]  ;;  %v1982_v57 = vpop.f32.mrf.mxu1 }
 0x1a8   : >> { %v1461_v17 = vcvt.s32.f32 %v949_v38  ;;  %v1469_v63 = vcvt.s32.f32 %v957_v51  ;;  %2172 = vmatpush.bf16.msrb.mxu0 %v1565_v55  ;;  %v677_v47 = vunpack.c.0.s8 %v429_v28  ;;  %v685_v20 = vunpack.c.1.s8 %v429_v28  ;;  %v453_v28 = vld [vmem:[%s3502_s18 + $0x238] sm:$0xff]  ;;  %v1995_v54 = vpop.f32.mrf.mxu2 }
 0x1a9   : >> { %v1693_v61 = vpack.c.bf16 %v1341_v58, %v1333_v25  ;;  %v1061_v42 = vcvt.s32.f32 %v549_v40  ;;  %2185 = vmatpush.bf16.msrb.mxu1 %v1629_v11  ;;  %v1069_v29 = vcvt.s32.f32 %v557_v16  ;;  %v805_v31 = vunpack.c.0.s8 %v461_v36 }
 0x1aa   : >> { %v1757_v26 = vpack.c.bf16 %v1469_v63, %v1461_v17  ;;  %v813_v32 = vunpack.c.1.s8 %v461_v36  ;;  %v1189_v33 = vcvt.s32.f32 %v677_v47  ;;  %v1197_v30 = vcvt.s32.f32 %v685_v20 }
 0x1ab   : >> { %2198 = vmatpush.bf16.msrb.mxu2 %v1693_v61  ;;  %v933_v34 = vunpack.c.0.s8 %v493_v46  ;;  %v941_v35 = vunpack.c.1.s8 %v493_v46  ;;  %v1557_v10 = vpack.c.bf16 %v1069_v29, %v1061_v42  ;;  %v1317_v41 = vcvt.s32.f32 %v805_v31  ;;  %v1969_v50 = vpop.f32.mrf.mxu0 }
 0x1ac   : >> { %2211 = vmatpush.bf16.msrb.mxu3 %v1757_v26  ;;  %v1325_v45 = vcvt.s32.f32 %v813_v32  ;;  %v533_v0 = vunpack.c.2.s8 %v389_v27  ;;  %v1621_v44 = vpack.c.bf16 %v1197_v30, %v1189_v33  ;;  %v541_v37 = vunpack.c.3.s8 %v389_v27 }
 0x1ad   : >> { %v1445_v39 = vcvt.s32.f32 %v933_v34  ;;  %v1453_v43 = vcvt.s32.f32 %v941_v35  ;;  %2173 = vmatpush.bf16.msrb.mxu0 %v1557_v10  ;;  %v661_v49 = vunpack.c.2.s8 %v421_v13  ;;  %v669_v53 = vunpack.c.3.s8 %v421_v13 }
 0x1ae   : >> { %v1685_v36 = vpack.c.bf16 %v1325_v45, %v1317_v41  ;;  %v1045_v21 = vcvt.s32.f32 %v533_v0  ;;  %2186 = vmatpush.bf16.msrb.mxu1 %v1621_v44  ;;  %v1053_v60 = vcvt.s32.f32 %v541_v37  ;;  %v789_v38 = vunpack.c.2.s8 %v453_v28 }
 0x1af   : >> { %v1749_v46 = vpack.c.bf16 %v1453_v43, %v1445_v39  ;;  %v797_v51 = vunpack.c.3.s8 %v453_v28  ;;  %v2008_v52 = vpop.f32.mrf.mxu3  ;;  %v1173_v55 = vcvt.s32.f32 %v661_v49  ;;  %v1181_v25 = vcvt.s32.f32 %v669_v53  ;;  %v1984_v43 = vpop.f32.mrf.mxu1 }
 0x1b0   : >> { %2199 = vmatpush.bf16.msrb.mxu2 %v1685_v36  ;;  %v917_v58 = vunpack.c.2.s8 %v485_v15  ;;  %v925_v40 = vunpack.c.3.s8 %v485_v15  ;;  %v1549_v56 = vpack.c.bf16 %v1053_v60, %v1045_v21  ;;  %v1301_v62 = vcvt.s32.f32 %v789_v38  ;;  %v1997_v21 = vpop.f32.mrf.mxu2 }
 0x1b1   : >> { %2212 = vmatpush.bf16.msrb.mxu3 %v1749_v46  ;;  %v1309_v11 = vcvt.s32.f32 %v797_v51  ;;  %v517_v17 = vunpack.c.0.s8 %v389_v27  ;;  %v1613_v63 = vpack.c.bf16 %v1181_v25, %v1173_v55  ;;  %v525_v42 = vunpack.c.1.s8 %v389_v27 }
 0x1b2   : >> { %v1429_v16 = vcvt.s32.f32 %v917_v58  ;;  %v1437_v61 = vcvt.s32.f32 %v925_v40  ;;  %2174 = vmatpush.bf16.msrb.mxu0 %v1549_v56  ;;  %v645_v26 = vunpack.c.0.s8 %v421_v13  ;;  %v653_v29 = vunpack.c.1.s8 %v421_v13 }
 0x1b3   : >> { %v1677_v47 = vpack.c.bf16 %v1309_v11, %v1301_v62  ;;  %v1029_v20 = vcvt.s32.f32 %v517_v17  ;;  %2187 = vmatpush.bf16.msrb.mxu1 %v1613_v63  ;;  %v1037_v32 = vcvt.s32.f32 %v525_v42  ;;  %v773_v33 = vunpack.c.0.s8 %v453_v28  ;;  %v1971_v39 = vpop.f32.mrf.mxu0 }
 0x1b4   : >> { %v1741_v31 = vpack.c.bf16 %v1437_v61, %v1429_v16  ;;  %v781_v30 = vunpack.c.1.s8 %v453_v28  ;;  %v1157_v34 = vcvt.s32.f32 %v645_v26  ;;  %v1165_v35 = vcvt.s32.f32 %v653_v29 }
 0x1b5   : >> { %2200 = vmatpush.bf16.msrb.mxu2 %v1677_v47  ;;  %v901_v10 = vunpack.c.0.s8 %v485_v15  ;;  %v909_v41 = vunpack.c.1.s8 %v485_v15  ;;  %v1541_v45 = vpack.c.bf16 %v1037_v32, %v1029_v20  ;;  %v1285_v0 = vcvt.s32.f32 %v773_v33 }
 0x1b6   : >> { %2213 = vmatpush.bf16.msrb.mxu3 %v1741_v31  ;;  %v1293_v44 = vcvt.s32.f32 %v781_v30  ;;  %v1931_v27 = vadd.f32 %v3712_v19, %v3710_v14  ;;  %v1605_v13 = vpack.c.bf16 %v1165_v35, %v1157_v34  ;;  %v1983_v46 = vadd.f32 %v1982_v57, %v1969_v50 }
 0x1b7   : >> { %v1413_v37 = vcvt.s32.f32 %v901_v10  ;;  %v1421_v36 = vcvt.s32.f32 %v909_v41  ;;  %v2010_v49 = vpop.f32.mrf.mxu3  ;;  %2175 = vmatpush.bf16.msrb.mxu0 %v1541_v45 }
 0x1b8   : >> { %v1669_v28 = vpack.c.bf16 %v1293_v44, %v1285_v0  ;;  %v1944_v53 = vadd.f32 %v3715_v18, %v1931_v27  ;;  %2188 = vmatpush.bf16.msrb.mxu1 %v1605_v13  ;;  %v1996_v38 = vadd.f32 %v1995_v54, %v1983_v46  ;;  %v2236_v49 = vrot.slane (%p364_p11), %v3918_v12, 6 }
 0x1b9   : >> { %v1733_v15 = vpack.c.bf16 %v1421_v36, %v1413_v37 }
 0x1ba   : >> { %2201 = vmatpush.bf16.msrb.mxu2 %v1669_v28  ;;  %v1957_v60 = vadd.f32 %v3717_v9, %v1944_v53  ;;  %2176 = vmatmul.bf16.vlgmr.msrb.gmra.mxu0 %v3687_v59  ;;  %v2009_v19 = vadd.f32 %v2008_v52, %v1996_v38 }
 0x1bb   : >> { %2214 = vmatpush.bf16.msrb.mxu3 %v1733_v15  ;;  %2189 = vmatmul.bf16.vlgmr.msrb.gmra.mxu1 %v3690_v48 }
 0x1bc   : >> { %v3733_v8 = vadd.f32 %v3164_v8, %v1957_v60   ;;  %v3738_v7 = vadd.f32 %v3160_v7, %v2009_v19   ;;  %v2243_v60 = vsel (%p364_p11), %vm2242_vm0, %v3917_v23, %v2236_v49 }
 0x1bd   : >> { %2202 = vmatmul.bf16.vlgmr.msrb.gmra.mxu2 %v3693_v22  ;;  %v2021_v50 = vpop.f32.mrf.mxu0 }
 0x1be   : >> { %v3919_v14 = vmov %v3733_v8  ;;  %2215 = vmatmul.bf16.vlgmr.msrb.gmra.mxu3 %v3696_v24  ;;  %v3920_v18 = vmov %v3738_v7  ;;  %v2034_v57 = vpop.f32.mrf.mxu1 }
 0x1bf   : >> { %v2035_v9 = vadd.f32 %v2034_v57, %v2021_v50  ;;  %v2237_v28 = vrot.slane (%p364_p11), %v3919_v14, 4  ;;  %v2238_v53 = vrot.slane (%p364_p11), %v3920_v18, 2 }
 0x1c1   : > { %v2245_v38 = vsel (%p364_p11), %vm2244_vm1, %v2237_v28, %v2238_v53 }
 0x1c2   : > { %v2247_v50 = vsel (%p364_p11), %vm2246_vm2, %v2243_v60, %v2245_v38 }
 0x1c5   : >> { %v2047_v51 = vpop.f32.mrf.mxu2  ;;  %v2023_v59 = vpop.f32.mrf.mxu0 }
 0x1c6   : >> { %v2048_v54 = vadd.f32 %v2047_v51, %v2035_v9  ;;  %v2060_v55 = vpop.f32.mrf.mxu3  ;;  %v2036_v25 = vpop.f32.mrf.mxu1  ;;  %v3928_v9 = vmov %v3918_v12 }
 0x1c8   : >> { %v2061_v48 = vadd.f32 %v2060_v55, %v2048_v54 }
 0x1ca   : >> { %v3741_v6 = vadd.f32 %v3156_v6, %v2061_v48  }
 0x1cc   : >> { %v3921_v58 = vmov %v3741_v6 }
 0x1cd   : >> { %v2049_v8 = vpop.f32.mrf.mxu2 }
 0x1ce   : >> { %v2062_v52 = vpop.f32.mrf.mxu3  ;;  %v3927_v8 = vmov %v3919_v14 }
 0x1e5   : >> { %v2073_v22 = vpop.f32.mrf.mxu0 }
 0x1e6   : >> { %v2086_v40 = vpop.f32.mrf.mxu1 }
 0x1e7   : >> { %v2087_v24 = vadd.f32 %v2086_v40, %v2073_v22 }
 0x1ed   : >> { %v2099_v56 = vpop.f32.mrf.mxu2  ;;  %v2075_v62 = vpop.f32.mrf.mxu0 }
 0x1ee   : >> { %v2100_v7 = vadd.f32 %v2099_v56, %v2087_v24  ;;  %v2112_v11 = vpop.f32.mrf.mxu3  ;;  %v2088_v17 = vpop.f32.mrf.mxu1 }
 0x1f0   : >> { %v2113_v63 = vadd.f32 %v2112_v11, %v2100_v7  ;;  %v3926_v7 = vmov %v3920_v18 }
 0x1f2   : >> { %v2225_v16 = vadd.f32 %v3152_v5, %v2113_v63  }
 0x1f4   : > { %v2239_v46 = vrot.slane (%p364_p11), %v2225_v16, 6 }
 0x1f5   : >> { %v2101_v61 = vpop.f32.mrf.mxu2 }
 0x1f6   : >> { %v2114_v42 = vpop.f32.mrf.mxu3 }
 0x20e   : >> { %v2125_v47 = vpop.f32.mrf.mxu0 }
 0x20f   : >> { %v2138_v20 = vpop.f32.mrf.mxu1 }
 0x210   : >> { %v2139_v26 = vadd.f32 %v2138_v20, %v2125_v47 }
 0x216   : >> { %v2127_v29 = vpop.f32.mrf.mxu0  ;;  %v2151_v6 = vpop.f32.mrf.mxu2 }
 0x217   : >> { %v2140_v31 = vpop.f32.mrf.mxu1  ;;  %v2152_v32 = vadd.f32 %v2151_v6, %v2139_v26  ;;  %v3925_v6 = vmov %v3921_v58 }
 0x218   : >> { %v2164_v33 = vpop.f32.mrf.mxu3 }
 0x219   : >> { %v2165_v30 = vadd.f32 %v2164_v33, %v2152_v32 }
 0x21b   : >> { %v2226_v34 = vadd.f32 %v3148_v4, %v2165_v30  }
 0x21d   : >> { %v3923_v4 = vmov %v2226_v34  ;;  %v2240_v15 = vrot.slane (%p364_p11), %v2226_v34, 4 }
 0x21e   : >> { %v2153_v35 = vpop.f32.mrf.mxu2  ;;  %v2253_v4 = vadd.f32 (%p364_p11), %v2247_v50, %v3448_v1 }
 0x220   : >> { %v2166_v10 = vpop.f32.mrf.mxu3  ;;  %2255 = vst [vmem:[#allocation2] sm:$0xff] (%p364_p11), %v2253_v4 }
 0x221   : >> { %v3929_v10 = vmov %v3917_v23 }
 0x237   : >> { %v2177_v41 = vpop.f32.mrf.mxu0 }
 0x238   : >> { %v2190_v45 = vpop.f32.mrf.mxu1 }
 0x239   : >> { %v2191_v0 = vadd.f32 %v2190_v45, %v2177_v41 }
 0x23f   : >> { %v2179_v5 = vpop.f32.mrf.mxu0 }
 0x240   : >> { %v2203_v44 = vpop.f32.mrf.mxu2  ;;  %v2192_v43 = vpop.f32.mrf.mxu1  ;;  %v3924_v5 = vmov %v2225_v16 }
 0x241   : >> { %v2204_v27 = vadd.f32 %v2203_v44, %v2191_v0  ;;  %v2216_v39 = vpop.f32.mrf.mxu3 }
 0x243   : >> { %v2217_v13 = vadd.f32 %v2216_v39, %v2204_v27 }
 0x245   : >> { %v2227_v37 = vadd.f32 %v3144_v3, %v2217_v13   ;;  %366 = sbr.rel (!%p364_p11) target bundleno = 112 (0x70), region = 136 }
 0x247   : >> { %v3922_v3 = vmov %v2227_v37  ;;  %v2241_v19 = vrot.slane (%p364_p11), %v2227_v37, 2 }
 0x248   : >> { %v2205_v36 = vpop.f32.mrf.mxu2  ;;  %v2248_v3 = vsel (%p364_p11), %vm2242_vm0, %v3921_v58, %v2239_v46 }
 0x249   : >> { %v2218_v21 = vpop.f32.mrf.mxu3  ;;  %v2249_v12 = vsel (%p364_p11), %vm2244_vm1, %v2240_v15, %v2241_v19 }
 0x24a   : > { %v2250_v14 = vsel %vm2246_vm2, %v2248_v3, %v2249_v12  ;;  %2260 = sbr.rel (%p2590_p3) target bundleno = 627 (0x273), region = 67 }
 0x24b   : > { %v2254_v18 = vadd.f32 %v2250_v14, %v3450_v2 }
 0x24d   : > { %2256 = vst [vmem:[#allocation2 + $0x8] sm:$0xff] %v2254_v18 }
 0x24f   : > { %v2263_v23 = vld [vmem:[%s298_s3] sm:$0xff]  ;;  %v2289_v57 = vld [vmem:[%s308_s12] sm:$0xff]  ;;  %vm2353_vm3 = vcmask 1040384   ;;  %vm2357_vm4 = vcmask 1042434   ;;  %vm2362_vm5 = vcmask 1044484   ;;  %vm2366_vm6 = vcmask 1046534  }
 0x250   : > { %v2265_v9 = vperm.slane %v2263_v23, 0  ;;  %v2266_v51 = vperm.slane %v2263_v23, 1  ;;  %v2267_v1 = vperm.slane %v2263_v23, 2  ;;  %v2268_v54 = vperm.slane %v2263_v23, 3  ;;  %v2261_v22 = vld [vmem:[#allocation2] sm:$0xff] }
 0x251   : > { %v2291_v55 = vperm.slane %v2289_v57, 0  ;;  %v2292_v59 = vperm.slane %v2289_v57, 1  ;;  %v2293_v25 = vperm.slane %v2289_v57, 2  ;;  %v2294_v48 = vperm.slane %v2289_v57, 3 }
 0x252   : > { %v2273_v58 = vrot.slane %v2266_v51, 6  ;;  %v2274_v2 = vrot.slane %v2267_v1, 4  ;;  %v2275_v8 = vrot.slane %v2268_v54, 2  ;;  %v2269_v52 = vperm.slane %v2263_v23, 4 }
 0x253   : > { %v2299_v40 = vrot.slane %v2292_v59, 6  ;;  %v2300_v24 = vrot.slane %v2293_v25, 4  ;;  %v2301_v56 = vrot.slane %v2294_v48, 2  ;;  %v2270_v62 = vperm.slane %v2263_v23, 5 }
 0x254   : > { %v2279_v7 = vsel %vm2242_vm0, %v2265_v9, %v2273_v58  ;;  %v2280_v11 = vsel %vm2244_vm1, %v2274_v2, %v2275_v8  ;;  %v2271_v17 = vperm.slane %v2263_v23, 6  ;;  %v2272_v63 = vperm.slane %v2263_v23, 7  ;;  %v2262_v31 = vld [vmem:[#allocation2 + $0x8] sm:$0xff] }
 0x255   : > { %v2281_v16 = vsel %vm2246_vm2, %v2279_v7, %v2280_v11  ;;  %v2305_v61 = vsel %vm2242_vm0, %v2291_v55, %v2299_v40  ;;  %v2306_v42 = vsel %vm2244_vm1, %v2300_v24, %v2301_v56  ;;  %v2276_v47 = vrot.slane %v2270_v62, 6 }
 0x256   : > { %v2287_v20 = vmul.f32 %v2281_v16, %v2261_v22  ;;  %v2307_v26 = vsel %vm2246_vm2, %v2305_v61, %v2306_v42  ;;  %v2277_v29 = vrot.slane %v2271_v17, 4  ;;  %v2278_v6 = vrot.slane %v2272_v63, 2 }
 0x257   : > { %v2282_v32 = vsel %vm2242_vm0, %v2269_v52, %v2276_v47  ;;  %v2295_v33 = vperm.slane %v2289_v57, 4  ;;  %v2296_v30 = vperm.slane %v2289_v57, 5  ;;  %v2297_v34 = vperm.slane %v2289_v57, 6 }
 0x258   : > { %v2313_v35 = vadd.f32 %v2307_v26, %v2287_v20  ;;  %v2283_v10 = vsel %vm2244_vm1, %v2277_v29, %v2278_v6  ;;  %v2298_v41 = vperm.slane %v2289_v57, 7 }
 0x259   : > { %v2284_v45 = vsel %vm2246_vm2, %v2282_v32, %v2283_v10  ;;  %v2302_v0 = vrot.slane %v2296_v30, 6  ;;  %v2303_v44 = vrot.slane %v2297_v34, 4 }
 0x25a   : > { %v2315_v5 = vmax.f32 %v2313_v35, 0.0  ;;  %v2288_v27 = vmul.f32 %v2284_v45, %v2262_v31  ;;  %v2304_v39 = vrot.slane %v2298_v41, 2 }
 0x25b   : > { %v2308_v43 = vsel %vm2242_vm0, %v2295_v33, %v2302_v0 }
 0x25c   : > { %2319 = vst [vmem:[#allocation1] ss:$4 sm:$0xff] %v2315_v5  ;;  %v2309_v13 = vsel %vm2244_vm1, %v2303_v44, %v2304_v39 }
 0x25d   : > { %v2310_v37 = vsel %vm2246_vm2, %v2308_v43, %v2309_v13 }
 0x25e   : > { %v2314_v36 = vadd.f32 %v2310_v37, %v2288_v27 }
 0x260   : > { %v2316_v21 = vmax.f32 %v2314_v36, 0.0 }
 0x262   : > { %2321 = vst [vmem:[#allocation1 + $0x20] ss:$4 sm:$0xff] %v2316_v21 }
 0x263   : > { %v2322_v49 = vld.sshfl [vmem:[#allocation1] sm:$0xff pattern:$0x73625140]  ;;  %v2323_v28 = vld.sshfl [vmem:[#allocation1 + $0x8] sm:$0xff pattern:$0x73625140] }
 0x264   : > { %v2324_v53 = vld.sshfl [vmem:[#allocation1 + $0x10] sm:$0xff pattern:$0x73625140]  ;;  %v2325_v46 = vld.sshfl [vmem:[#allocation1 + $0x18] sm:$0xff pattern:$0x73625140]  ;;  %v2338_v15 = vpack.c.bf16 %v2323_v28, %v2322_v49 }
 0x265   : > { %v2339_v60 = vpack.c.bf16 %v2325_v46, %v2324_v53 }
 0x266   : > { %v2346_v38 = vrot.slane %v2338_v15, 3 }
 0x267   : > { %v2347_v19 = vrot.slane %v2339_v60, 6  ;;  %v2348_v50 = vrot.slane %v2339_v60, 1 }
 0x268   : > { %v2356_v57 = vsel %vm2353_vm3, %v2338_v15, %v2346_v38 }
 0x269   : > { %v2326_v3 = vld.sshfl [vmem:[#allocation1 + $0x20] sm:$0xff pattern:$0x73625140]  ;;  %v2327_v4 = vld.sshfl [vmem:[#allocation1 + $0x28] sm:$0xff pattern:$0x73625140]  ;;  %v2360_v9 = vsel %vm2357_vm4, %v2347_v19, %v2348_v50 }
 0x26a   : > { %v2328_v12 = vld.sshfl [vmem:[#allocation1 + $0x30] sm:$0xff pattern:$0x73625140]  ;;  %v2329_v14 = vld.sshfl [vmem:[#allocation1 + $0x38] sm:$0xff pattern:$0x73625140]  ;;  %v2340_v18 = vpack.c.bf16 %v2327_v4, %v2326_v3  ;;  %v2361_v59 = vsel %vm2242_vm0, %v2356_v57, %v2360_v9 }
 0x26b   : > { %v2341_v23 = vpack.c.bf16 %v2329_v14, %v2328_v12 }
 0x26c   : > { %v2349_v51 = vrot.slane %v2340_v18, 4  ;;  %v2350_v1 = vrot.slane %v2340_v18, 7 }
 0x26d   : > { %v2351_v54 = vrot.slane %v2341_v23, 2  ;;  %v2352_v55 = vrot.slane %v2341_v23, 5 }
 0x26e   : > { %v2365_v25 = vsel %vm2362_vm5, %v2349_v51, %v2350_v1 }
 0x26f   : > { %v2369_v48 = vsel %vm2366_vm6, %v2351_v54, %v2352_v55 }
 0x270   : > { %v2370_v58 = vsel %vm2244_vm1, %v2365_v25, %v2369_v48 }
 0x271   : > { %v2371_v2 = vsel %vm2246_vm2, %v2361_v59, %v2370_v58 }
 0x272   : > { %2373 = vst [vmem:[%s348_s6] sm:$0xff] %v2371_v2 }
 0x273 PF: > { %s3931_s26 = sld [smem:[#allocation21_spill]]  ;;  %s2387_s20 = sshll.u32 %s348_s6, 4  ;;  %s2388_s20 = int_to_ptr.vmem [resolvable:$true] %s2387_s20 }
 0x274   : > { %s3932_s0 = sld [smem:[#allocation33_spill]]  ;;  %s2375_s29 = scalar_lea.sflag [#allocation5], %s3430_s25 }
 0x279   : > { %s2592_s13 = sshll.u32 %s3931_s26, 3 }
 0x27a   : > { %s2385_s17 = scalar_lea.hbm %s3932_s0, %s2592_s13  ;;  %s2966_s21 = scalar_lea.hbm %s3932_s0, 16 }
 0x27b   : > { %s2389_s23 = sshll.u32 %s2385_s17, 4  ;;  %s2390_s23 = int_to_ptr.hbm [resolvable:$true] %s2389_s23 }
 0x27c   : > { %s2960_s3 = sshra.s32 %s2390_s23, 4  ;;  %s2961_s3 = int_to_ptr.hbm [resolvable:$true] %s2960_s3 }
 0x27d   : > { %s2962_s7 = scalar_lea.hbm %s2961_s3, 8  ;;  %p2967_p10 = scmp.lt.s32.totalorder %s2961_s3, %s3932_s0 }
 0x27e   : > { %p2963_p4 = scmp.ne.s32.totalorder %s2961_s3, %s2962_s7  ;;  %p2968_p12 = scmp.lt.s32.totalorder %s2966_s21, %s2962_s7 }
 0x280   : > { %p2964_p7 = pnand %p2963_p4, %p3391_p8  ;;  %p2969_p13 = por %p2968_p12, %p2967_p10 }
 0x282   : > { %p2965_p9 = pneg %p2964_p7 }
 0x284   : > { %p2970_p0 = pnand %p2969_p13, %p2965_p9 }
 0x286   : > { %2973 = shalt.err (!%p2970_p0)
}
 0x287   : > { %2610 = dma.vmem_to_hbm [thread:$0]  (%p3391_p8), %s2388_s20, 128, %s2390_s23, %s2375_s29  }
 0x288 PF: > { %p2630_p2 = scmp.ge.s32.totalorder %s3140_s28, 2  ;;  %s2401_s25 = sand.u32 1, %s3088_s15  }
 0x289   : > { %s2402_s2 = scalar_lea.sflag [#allocation5], %s2401_s25 }
 0x28a   : > { %p2626_p1 = pnand %p2630_p2, %p3395_p5 }
 0x28c   : > { %p2627_p6 = pneg %p2626_p1 }
 0x28e   : > { %3083 = dma.done.wait (%p2627_p6), %s2402_s2, 128  }
 0x28f   : > { %3085 = vsyncadd (%p2627_p6), %s2402_s2, 4294967168  ;;  %s26_s28 = sadd.s32 1, %s3140_s28   ;;  %s3934_s1 = sld [smem:[#allocation17_spill]] }
 0x290   : > { %p3827_p11 = scmp.ge.s32.totalorder %s26_s28, 30   ;;  %s3935_s17 = sld [smem:[#allocation28_spill]] }
 0x291   : > { %s3936_s9 = sld [smem:[#allocation18_spill]]  ;;  %s3944_s15 = smov %s3092_s16 }
 0x292   : > { %s3937_s20 = sld [smem:[#allocation26_spill]]  ;;  %s3946_s18 = smov %s3104_s19 }
 0x293   : > { %s3938_s11 = sld [smem:[#allocation19_spill]]  ;;  %s3948_s21 = smov %s3116_s22 }
 0x294   : > { %s3939_s23 = sld [smem:[#allocation27_spill]] }
 0x295   : > { %s3940_s24 = sld [smem:[#allocation22_spill]]  ;;  %s3945_s16 = smov %s3934_s1 }
 0x296   : > { %s3941_s25 = sld [smem:[#allocation23_spill]]  ;;  %25 = sbr.rel (!%p3827_p11) target bundleno = 20 (0x14), region = 147 }
 0x297   : > { %s3942_s26 = sld [smem:[#allocation24_spill]]  ;;  %s3947_s19 = smov %s3936_s9 }
 0x298   : > { %s3943_s27 = sld [smem:[#allocation25_spill]] }
 0x299   : > { %s3949_s22 = smov %s3938_s11 }
 0x29b   :  { %2408 = vsyncpa [#allocation4], 1 }
 0x29c   :  { %2410 = vsyncpa [#allocation4 + $0x1], 1 }
 0x29d   :  { %2411 = vsyncpa [#allocation7], 1 }
 0x29e   :  { %2413 = vsyncpa [#allocation7 + $0x1], 1 }
 0x29f   :  { %2414 = vsyncpa [#allocation10], 1 }
 0x2a0   :  { %2416 = vsyncpa [#allocation10 + $0x1], 1 }
 0x2a1   :  { %2417 = vsyncpa [#allocation5], 1 }
 0x2a2   :  { %2419 = vsyncpa [#allocation5 + $0x1], 1 }

</bundles_post_ra>
